<compile_context>
chip_gen: v6e
topology: v6e:2x2x1
jax: 0.10.0
libtpu: 0.0.40
codegen_flags: <defaults>
</compile_context>

<pallas_src>
import numpy as np
import jax
import jax.numpy as jnp
from jax import lax
from jax.experimental import pallas as pl
from jax.experimental.pallas import tpu as pltpu

KSZ = 3   # conv3x3 kernel size
DIL = 2   # dilation
PAD = 3   # spatial padding


def model_tanh_forward(x_nchw, w1, b1, w3, b3):
    """x_nchw: (N,16,H,W); w1: (16,8); b1: (8,); w3: (3,3,8,8) HWIO; b3: (8,)."""
    N, Cin, H, W = x_nchw.shape
    Cmid = w1.shape[1]
    Cout = w3.shape[3]
    Ho = H + 2 * PAD - DIL * (KSZ - 1)
    Wo = W + 2 * PAD - DIL * (KSZ - 1)
    Hp, Wp = H + 2 * PAD, W + 2 * PAD

    # Host-side (tiny) weight prep: channels-first matmul layouts.
    x_flat = x_nchw.reshape(N, Cin, H * W)                     # free reshape (NCHW contiguous)
    w1t = jnp.transpose(w1, (1, 0))                            # (Cmid, Cin)
    b1c = b1.reshape(Cmid, 1)
    # w3t[co, (kh*3+kw)*Cmid + ci] = w3[kh, kw, ci, co]
    w3t = jnp.transpose(w3, (3, 0, 1, 2)).reshape(Cout, KSZ * KSZ * Cmid)
    b3c = b3.reshape(Cout, 1)

    def fused_kernel(x_ref, w1t_ref, b1_ref, w3t_ref, b3_ref, o_ref):
        # x_ref  : (1, Cin, H*W)     channels on sublanes, spatial on lanes
        # w1t_ref: (Cmid, Cin)
        # b1_ref : (Cmid, 1)
        # w3t_ref: (Cout, 9*Cmid)
        # b3_ref : (Cout, 1)
        # o_ref  : (1, Cout, Ho*Wo)  lane-dense output
        # v1 = relu(relu(relu(x))) == relu(x)
        v1 = jnp.maximum(x_ref[0], 0.0)                                   # (Cin, H*W)

        # 1x1 conv == channel matmul on the MXU, spatial on lanes.
        v2 = jnp.dot(w1t_ref[...], v1,
                     preferred_element_type=jnp.float32) + b1_ref[...]    # (Cmid, H*W)
        v2 = v2.reshape(Cmid, H, W)

        # Zero-pad spatial dims by PAD (value-level, no scratch).
        zrow = jnp.zeros((Cmid, PAD, W), jnp.float32)
        v2p = jnp.concatenate([zrow, v2, zrow], axis=1)                   # (Cmid, Hp, W)
        zcol = jnp.zeros((Cmid, Hp, PAD), jnp.float32)
        v2p = jnp.concatenate([zcol, v2p, zcol], axis=2)                  # (Cmid, Hp, Wp)

        # im2col: stack the 9 dilated taps along the contraction (sublane) axis.
        patches = []
        for kh in range(KSZ):
            for kw in range(KSZ):
                patches.append(
                    v2p[:, kh * DIL:kh * DIL + Ho, kw * DIL:kw * DIL + Wo]
                    .reshape(Cmid, Ho * Wo))
        col = jnp.concatenate(patches, axis=0)                            # (9*Cmid, Ho*Wo)

        # Dilated 3x3 conv as ONE matmul: (Cout, 72) @ (72, Ho*Wo).
        z = jnp.dot(w3t_ref[...], col,
                    preferred_element_type=jnp.float32) + b3_ref[...]     # (Cout, Ho*Wo)

        # tanh(relu(.)), lane-dense store.
        o_ref[0] = jnp.tanh(jnp.maximum(z, 0.0))

    out_flat = pl.pallas_call(
        fused_kernel,
        out_shape=jax.ShapeDtypeStruct((N, Cout, Ho * Wo), jnp.float32),
        grid_spec=pltpu.PrefetchScalarGridSpec(
            num_scalar_prefetch=0,
            grid=(N,),
            in_specs=[
                pl.BlockSpec((1, Cin, H * W), lambda n: (n, 0, 0)),
                pl.BlockSpec((Cmid, Cin), lambda n: (0, 0)),
                pl.BlockSpec((Cmid, 1), lambda n: (0, 0)),
                pl.BlockSpec((Cout, KSZ * KSZ * Cmid), lambda n: (0, 0)),
                pl.BlockSpec((Cout, 1), lambda n: (0, 0)),
            ],
            out_specs=pl.BlockSpec((1, Cout, Ho * Wo), lambda n: (n, 0, 0)),
        ),
        compiler_params=pltpu.CompilerParams(
            dimension_semantics=("parallel",)),
    )(x_flat, w1t, b1c, w3t, b3c)

    return out_flat.reshape(N, Cout, Ho, Wo)                              # NCHW out


def reference_forward(x_nchw, w1, b1, w3, b3):
    """Pure-JAX reference using lax convs in NCHW (default precision)."""
    Cmid = w1.shape[1]
    Cout = w3.shape[3]
    v1 = jnp.maximum(x_nchw, 0.0)
    w1_hwio = w1.reshape(1, 1, *w1.shape)
    v2 = lax.conv_general_dilated(
        v1, w1_hwio, (1, 1), 'VALID',
        dimension_numbers=('NCHW', 'HWIO', 'NCHW')) + b1.reshape(1, Cmid, 1, 1)
    v3 = lax.conv_general_dilated(
        v2, w3, (1, 1), [(PAD, PAD), (PAD, PAD)],
        rhs_dilation=(DIL, DIL),
        dimension_numbers=('NCHW', 'HWIO', 'NCHW')) + b3.reshape(1, Cout, 1, 1)
    return jnp.tanh(jnp.maximum(v3, 0.0))


if __name__ == "__main__":
    key = jax.random.PRNGKey(0)
    k1, k2, k3, k4, kx = jax.random.split(key, 5)

    # Deterministic synthetic parameters (shapes from the module's __init__).
    w1 = jax.random.normal(k1, (16, 8), jnp.float32) * 0.2      # conv1x1 weight (Cin, Cout)
    b1 = jax.random.normal(k2, (8,), jnp.float32) * 0.1
    w3 = jax.random.normal(k3, (KSZ, KSZ, 8, 8), jnp.float32) * 0.2   # conv3x3 weight HWIO
    b3 = jax.random.normal(k4, (8,), jnp.float32) * 0.1

    # Small NCHW input; 16 channels required by the (overwritten-ReLU) forward.
    x = jax.random.normal(kx, (2, 16, 16, 16), jnp.float32)

    fwd = jax.jit(model_tanh_forward)
    ref_fwd = jax.jit(reference_forward)

    out = jax.block_until_ready(fwd(x, w1, b1, w3, b3))
    ref = jax.block_until_ready(ref_fwd(x, w1, b1, w3, b3))

    assert out.shape == (2, 8, 18, 18), out.shape
    # Both paths use default MXU precision (bf16 multiply / f32 accumulate),
    # so the check is looser than the old f32-HIGHEST 1e-4 tolerance; any
    # structural bug would show up as O(0.1) error on this tanh-bounded output.
    err = float(np.max(np.abs(np.asarray(out) - np.asarray(ref))))
    assert err < 1e-2, err

    print("KERNEL_OK")
</pallas_src>

<mosaic_0001>
module attributes {stable_mosaic.version = 11 : i64} {
  func.func @fused_kernel(%arg0: i32, %arg1: memref<1x16x256xf32, #tpu.memory_space<vmem>>, %arg2: memref<8x16xf32, #tpu.memory_space<vmem>>, %arg3: memref<8x1xf32, #tpu.memory_space<vmem>>, %arg4: memref<8x72xf32, #tpu.memory_space<vmem>>, %arg5: memref<8x1xf32, #tpu.memory_space<vmem>>, %arg6: memref<1x8x324xf32, #tpu.memory_space<vmem>>) attributes {dimension_semantics = [#tpu.dimension_semantics<parallel>], iteration_bounds = array<i64: 2>, scalar_prefetch = 0 : i64, scratch_operands = 0 : i64, tpu.core_type = #tpu.core_type<tc>, window_params = [{transform_indices = @transform_0, window_bounds = array<i64: 1, 16, 256>}, {pipeline_mode = #tpu.pipeline_mode<synchronous>, transform_indices = @transform_1, window_bounds = array<i64: 8, 16>}, {pipeline_mode = #tpu.pipeline_mode<synchronous>, transform_indices = @transform_2, window_bounds = array<i64: 8, 1>}, {pipeline_mode = #tpu.pipeline_mode<synchronous>, transform_indices = @transform_3, window_bounds = array<i64: 8, 72>}, {pipeline_mode = #tpu.pipeline_mode<synchronous>, transform_indices = @transform_4, window_bounds = array<i64: 8, 1>}, {transform_indices = @transform_5, window_bounds = array<i64: 1, 8, 324>}]} {
    %c0 = arith.constant 0 : index
    %c0_0 = arith.constant 0 : index
    %c0_1 = arith.constant 0 : index
    %0 = vector.load %arg1[%c0, %c0_0, %c0_1] : memref<1x16x256xf32, #tpu.memory_space<vmem>>, vector<1x16x256xf32>
    %1 = vector.shape_cast %0 : vector<1x16x256xf32> to vector<16x256xf32>
    %cst = arith.constant 0.000000e+00 : f32
    %2 = vector.broadcast %cst : f32 to vector<16x256xf32>
    %3 = arith.maximumf %1, %2 : vector<16x256xf32>
    %c0_2 = arith.constant 0 : index
    %c0_3 = arith.constant 0 : index
    %4 = vector.load %arg2[%c0_2, %c0_3] : memref<8x16xf32, #tpu.memory_space<vmem>>, vector<8x16xf32>
    %cst_4 = arith.constant dense<0.000000e+00> : vector<8x256xf32>
    %5 = tpu.matmul %4, %3, %cst_4 {dimension_numbers = #tpu.dot_dimension_numbers<[1], [0], [0], [1], [0, 0, 1, 1], [], []>} : vector<8x16xf32>, vector<16x256xf32>, vector<8x256xf32> -> vector<8x256xf32>
    %c0_5 = arith.constant 0 : index
    %c0_6 = arith.constant 0 : index
    %6 = vector.load %arg3[%c0_5, %c0_6] : memref<8x1xf32, #tpu.memory_space<vmem>>, vector<8x1xf32>
    %7 = vector.broadcast %6 : vector<8x1xf32> to vector<8x256xf32>
    %8 = arith.addf %5, %7 : vector<8x256xf32>
    %9 = vector.shape_cast %8 : vector<8x256xf32> to vector<8x16x16xf32>
    %cst_7 = arith.constant 0.000000e+00 : f32
    %10 = vector.broadcast %cst_7 : f32 to vector<8x3x16xf32>
    %11 = tpu.concatenate %10, %9, %10 in 1 : vector<8x3x16xf32>, vector<8x16x16xf32>, vector<8x3x16xf32> -> vector<8x22x16xf32>
    %cst_8 = arith.constant 0.000000e+00 : f32
    %12 = vector.broadcast %cst_8 : f32 to vector<8x22x3xf32>
    %13 = tpu.concatenate %12, %11, %12 in 2 : vector<8x22x3xf32>, vector<8x22x16xf32>, vector<8x22x3xf32> -> vector<8x22x22xf32>
    %14 = vector.extract_strided_slice %13 {offsets = [0, 0, 0], sizes = [8, 18, 18], strides = [1, 1, 1]} : vector<8x22x22xf32> to vector<8x18x18xf32>
    %15 = vector.shape_cast %14 : vector<8x18x18xf32> to vector<8x324xf32>
    %16 = vector.extract_strided_slice %13 {offsets = [0, 0, 2], sizes = [8, 18, 18], strides = [1, 1, 1]} : vector<8x22x22xf32> to vector<8x18x18xf32>
    %17 = vector.shape_cast %16 : vector<8x18x18xf32> to vector<8x324xf32>
    %18 = vector.extract_strided_slice %13 {offsets = [0, 0, 4], sizes = [8, 18, 18], strides = [1, 1, 1]} : vector<8x22x22xf32> to vector<8x18x18xf32>
    %19 = vector.shape_cast %18 : vector<8x18x18xf32> to vector<8x324xf32>
    %20 = vector.extract_strided_slice %13 {offsets = [0, 2, 0], sizes = [8, 18, 18], strides = [1, 1, 1]} : vector<8x22x22xf32> to vector<8x18x18xf32>
    %21 = vector.shape_cast %20 : vector<8x18x18xf32> to vector<8x324xf32>
    %22 = vector.extract_strided_slice %13 {offsets = [0, 2, 2], sizes = [8, 18, 18], strides = [1, 1, 1]} : vector<8x22x22xf32> to vector<8x18x18xf32>
    %23 = vector.shape_cast %22 : vector<8x18x18xf32> to vector<8x324xf32>
    %24 = vector.extract_strided_slice %13 {offsets = [0, 2, 4], sizes = [8, 18, 18], strides = [1, 1, 1]} : vector<8x22x22xf32> to vector<8x18x18xf32>
    %25 = vector.shape_cast %24 : vector<8x18x18xf32> to vector<8x324xf32>
    %26 = vector.extract_strided_slice %13 {offsets = [0, 4, 0], sizes = [8, 18, 18], strides = [1, 1, 1]} : vector<8x22x22xf32> to vector<8x18x18xf32>
    %27 = vector.shape_cast %26 : vector<8x18x18xf32> to vector<8x324xf32>
    %28 = vector.extract_strided_slice %13 {offsets = [0, 4, 2], sizes = [8, 18, 18], strides = [1, 1, 1]} : vector<8x22x22xf32> to vector<8x18x18xf32>
    %29 = vector.shape_cast %28 : vector<8x18x18xf32> to vector<8x324xf32>
    %30 = vector.extract_strided_slice %13 {offsets = [0, 4, 4], sizes = [8, 18, 18], strides = [1, 1, 1]} : vector<8x22x22xf32> to vector<8x18x18xf32>
    %31 = vector.shape_cast %30 : vector<8x18x18xf32> to vector<8x324xf32>
    %32 = tpu.concatenate %15, %17, %19, %21, %23, %25, %27, %29, %31 in 0 : vector<8x324xf32>, vector<8x324xf32>, vector<8x324xf32>, vector<8x324xf32>, vector<8x324xf32>, vector<8x324xf32>, vector<8x324xf32>, vector<8x324xf32>, vector<8x324xf32> -> vector<72x324xf32>
    %c0_9 = arith.constant 0 : index
    %c0_10 = arith.constant 0 : index
    %33 = vector.load %arg4[%c0_9, %c0_10] : memref<8x72xf32, #tpu.memory_space<vmem>>, vector<8x72xf32>
    %cst_11 = arith.constant dense<0.000000e+00> : vector<8x324xf32>
    %34 = tpu.matmul %33, %32, %cst_11 {dimension_numbers = #tpu.dot_dimension_numbers<[1], [0], [0], [1], [0, 0, 1, 1], [], []>} : vector<8x72xf32>, vector<72x324xf32>, vector<8x324xf32> -> vector<8x324xf32>
    %c0_12 = arith.constant 0 : index
    %c0_13 = arith.constant 0 : index
    %35 = vector.load %arg5[%c0_12, %c0_13] : memref<8x1xf32, #tpu.memory_space<vmem>>, vector<8x1xf32>
    %36 = vector.broadcast %35 : vector<8x1xf32> to vector<8x324xf32>
    %37 = arith.addf %34, %36 : vector<8x324xf32>
    %cst_14 = arith.constant 0.000000e+00 : f32
    %38 = vector.broadcast %cst_14 : f32 to vector<8x324xf32>
    %39 = arith.maximumf %37, %38 : vector<8x324xf32>
    %40 = math.tanh %39 : vector<8x324xf32>
    %c0_15 = arith.constant 0 : index
    %c0_16 = arith.constant 0 : index
    %c0_17 = arith.constant 0 : index
    %41 = vector.load %arg6[%c0_15, %c0_16, %c0_17] : memref<1x8x324xf32, #tpu.memory_space<vmem>>, vector<1x8x324xf32>
    %42 = vector.shape_cast %41 : vector<1x8x324xf32> to vector<8x324xf32>
    %43 = vector.shape_cast %40 : vector<8x324xf32> to vector<1x8x324xf32>
    tpu.vector_store %arg6[%c0_15, %c0_16, %c0_17], %43 {strides = array<i32>} : memref<1x8x324xf32, #tpu.memory_space<vmem>>, vector<1x8x324xf32>,
    return
  }
  func.func @transform_0(%arg0: i32) -> (i32, i32, i32) {
    %c0_i32 = arith.constant 0 : i32
    %c0_i32_0 = arith.constant 0 : i32
    %c0_i32_1 = arith.constant 0 : i32
    return %arg0, %c0_i32, %c0_i32_0 : i32, i32, i32
  }
  func.func @transform_1(%arg0: i32) -> (i32, i32) {
    %c0_i32 = arith.constant 0 : i32
    %c0_i32_0 = arith.constant 0 : i32
    %c0_i32_1 = arith.constant 0 : i32
    return %c0_i32, %c0_i32_0 : i32, i32
  }
  func.func @transform_2(%arg0: i32) -> (i32, i32) {
    %c0_i32 = arith.constant 0 : i32
    %c0_i32_0 = arith.constant 0 : i32
    %c0_i32_1 = arith.constant 0 : i32
    return %c0_i32, %c0_i32_0 : i32, i32
  }
  func.func @transform_3(%arg0: i32) -> (i32, i32) {
    %c0_i32 = arith.constant 0 : i32
    %c0_i32_0 = arith.constant 0 : i32
    %c0_i32_1 = arith.constant 0 : i32
    return %c0_i32, %c0_i32_0 : i32, i32
  }
  func.func @transform_4(%arg0: i32) -> (i32, i32) {
    %c0_i32 = arith.constant 0 : i32
    %c0_i32_0 = arith.constant 0 : i32
    %c0_i32_1 = arith.constant 0 : i32
    return %c0_i32, %c0_i32_0 : i32, i32
  }
  func.func @transform_5(%arg0: i32) -> (i32, i32, i32) {
    %c0_i32 = arith.constant 0 : i32
    %c0_i32_0 = arith.constant 0 : i32
    %c0_i32_1 = arith.constant 0 : i32
    return %arg0, %c0_i32, %c0_i32_0 : i32, i32, i32
  }
}

</mosaic_0001>

<bundles_post_ra>
// kernel: model_tanh_forward.1
= control target key start
LH: loop header
LB: loop body
LE: loop exit
PB: predicated region body
PF: predicated region fallthrough
CT: control target
= control target key end

     0   :  { %s5478_s18 = smov 0   ;;  %s8570_s0 = inlined_call_operand.vmem [shape: f32[2,16,256], index: 0, kind: input, shape index: {}]   ;;  %s8571_s1 = inlined_call_operand.vmem [shape: f32[8,16], index: 1, kind: input, shape index: {}]   ;;  %s8572_s2 = inlined_call_operand.vmem [shape: f32[8,1], index: 2, kind: input, shape index: {}]   ;;  %s8573_s3 = inlined_call_operand.vmem [shape: f32[8,72], index: 3, kind: input, shape index: {}]   ;;  %s8574_s4 = inlined_call_operand.vmem [shape: f32[8,1], index: 4, kind: input, shape index: {}]   ;;  %s8575_s5 = inlined_call_operand.vmem [shape: f32[2,8,324], index: 5, kind: output, shape index: {}]  }
   0x1 LB: > { %s5323_s19 = sadd.s32 4294967295, %s5418_s18   ;;  %p5327_p0 = scmp.ge.s32.totalorder %s5418_s18, 1  ;;  %s5418_s18 = sphi %s5478_s18, %s15_s18  }
   0x2   : > { %p187_p1 = scmp.lt.s32.totalorder %s5418_s18, 3 }
   0x4   : > { %p188_p2 = pnand %p5327_p0, %p187_p1 }
   0x6   : > { %191 = sbr.rel (%p188_p2) target bundleno = 1404 (0x57c), region = 40 }
   0xb   : > { %p215_p3 = scmp.lt.s32.totalorder %s5323_s19, 1  ;;  %v234_v0 = vld [vmem:[%s8572_s2] sm:$0xff]  ;;  %v8576_v1 = vmov 0.0   ;;  %v5421_v2 = vmov 0   ;;  %vm240_vm0 = vcmask 130048   ;;  %s5422_s28 = smov 96   ;;  %v364_v21 = vlaneseq }
   0xc   : > { %308 = vmatprep.mubr.f32.mxu0 %v8576_v1  ;;  %5405 = vset.pattern.permute.xlu0 %v5421_v2  ;;  %v233_v11 = vld [vmem:[%s8571_s1] sm:$0xff]  ;;  %s5423_s29 = smov 112   ;;  %s5424_s30 = smov 80   ;;  %v5429_v19 = vmov 1983009808   ;;  %vm647_vm1 = vcmask 1042432  }
   0xd   : > { %s9365_s19 = smov (!%p215_p3, %s5323_s19), 1  ;;  %237 = vperm.xlu0 %5405, %v234_v0   ;;  %5181 = vmatprep.mubr.f32.mxu1 %v8576_v1  ;;  %s5425_s6 = smov 64   ;;  %v362_v20 = vunpack.c.l.s4 %v5429_v19  ;;  %v365_v25 = vshrl.u32 %v364_v21, 7  ;;  %v5430_v26 = vmov 1934713408   ;;  %vm792_vm2 = vcmask 23552  }
   0xe   : > { %s5336_s22 = sshll.u32 %s9365_s19, 5  ;;  %s5426_s7 = smov 48   ;;  %v426_v27 = vunpack.c.l.s4 %v5430_v26  ;;  %vm817_vm3 = vcmask 154624   ;;  %vm2247_vm4 = vcmask 1045504   ;;  %vm3677_vm5 = vcmask 1043456  }
   0xf   : > { %s219_s25 = scalar_lea.vmem %s8570_s0, %s5336_s22  ;;  %s5427_s8 = smov 32   ;;  %v363_v24 = vunpack.c.0.s8 %v362_v20  ;;  %vm8775_vm6 = vcmask 277504   ;;  %vm1249_vm7 = vcmask 424960   ;;  %vm1251_vm8 = vcmask 572416  }
  0x10   : > { %v228_v3 = vld [vmem:[%s219_s25 + $0x18] sm:$0xff]  ;;  %v227_v4 = vld [vmem:[%s219_s25 + $0x10] sm:$0xff]  ;;  %v226_v5 = vld [vmem:[%s219_s25 + $0x8] sm:$0xff]  ;;  %s5428_s9 = smov 16   ;;  %v427_v33 = vunpack.c.0.s8 %v426_v27  ;;  %s5431_s10 = smov 3   ;;  %vm1253_vm9 = vcmask 719872  }
  0x11   : > { %v232_v6 = vmax.f32 %v228_v3, 0.0  ;;  %v231_v7 = vmax.f32 %v227_v4, 0.0  ;;  %v230_v8 = vmax.f32 %v226_v5, 0.0  ;;  %v225_v9 = vld [vmem:[%s219_s25] sm:$0xff]  ;;  %v5524_v31 = vsub.s32 %v363_v24, %v365_v25  ;;  %s5432_s11 = smov 126   ;;  %s5433_s12 = smov 124  }
  0x12   : > { %v229_v10 = vmax.f32 %v225_v9, 0.0  ;;  %v5532_v44 = vsub.s32 %v427_v33, %v365_v25  ;;  %s5434_s13 = smov 18   ;;  %s5435_s14 = smov 36   ;;  %vm1255_vm10 = vcmask 867328   ;;  %vm1259_vm11 = vcmask 113664  }
  0x13   : > { %272 = vmatprep.subr.mxu0 %v232_v6  ;;  %s5436_s15 = smov 54   ;;  %s5437_s16 = smov 72   ;;  %vm8774_vm12 = vcmask 1014784   ;;  %vm1261_vm13 = vcmask 261120   ;;  %vm8773_vm14 = vcmask 408576   ;;  %vm5447_vm15 = vmmov 0  }
  0x14   : > { %273 = vmatpush1.msra.mxu0 %v231_v7  ;;  %s5438_s17 = smov 90   ;;  %s5439_s20 = smov 108  }
  0x15   : > { %274 = vmatprep.subr.mxu0 %v230_v8  ;;  %s5440_s21 = smov 34   ;;  %s5441_s22 = smov 52  }
  0x16   : > { %275 = vmatpush1.msra.mxu0 %v229_v10  ;;  %s5442_s23 = smov 70   ;;  %s5443_s24 = smov 88  }
  0x17   : > { %5331 = vmatmul.mubr.msk.f32.vlgmr.msra.gmra.mxu0 %vm240_vm0, %v233_v11  ;;  %5347 = vmatprep.subr.mxu0 %v8576_v1  ;;  %s5444_s25 = smov 106   ;;  %s5445_s26 = smov 14  }
  0x18   : > { %s5446_s27 = smov 50  }
  0x88   : > { %v238_v12 = vpop.permute.xlu0 %237 }
  0xd7   : > { %v310_v13 = vpop.f32.mrf.mxu0 }
  0xd8   : > { %v5502_v14 = vadd.f32 %v310_v13, %v238_v12 }
  0xd9   : > { %v312_v15 = vpop.f32.mrf.mxu0 }
  0xda   : > { %319 = vrot.lane.b32.xlu1 %v5502_v14, %s5422_s28  ;;  %316 = vrot.lane.b32.xlu0 %v5502_v14, %s5423_s29  ;;  %v5511_v16 = vadd.f32 %v312_v15, %v238_v12 }
  0xde   : > { %322 = vrot.lane.b32.xlu1 %v5502_v14, %s5424_s30  ;;  %325 = vrot.lane.b32.xlu0 %v5502_v14, %s5425_s6 }
  0xe2   : > { %328 = vrot.lane.b32.xlu1 %v5502_v14, %s5426_s7  ;;  %331 = vrot.lane.b32.xlu0 %v5502_v14, %s5427_s8 }
  0xe6   : > { %334 = vrot.lane.b32.xlu1 %v5502_v14, %s5428_s9  ;;  %338 = vrot.lane.b32.xlu0 %v5511_v16, %s5423_s29 }
  0xea   : > { %341 = vrot.lane.b32.xlu1 %v5511_v16, %s5422_s28  ;;  %344 = vrot.lane.b32.xlu0 %v5511_v16, %s5424_s30 }
  0xee   : > { %347 = vrot.lane.b32.xlu1 %v5511_v16, %s5425_s6  ;;  %350 = vrot.lane.b32.xlu0 %v5511_v16, %s5426_s7  ;;  %s5368_s7 = smul.u32 24, %s9365_s19 }
  0xf2   : > { %353 = vrot.lane.b32.xlu1 %v5511_v16, %s5427_s8  ;;  %356 = vrot.lane.b32.xlu0 %v5511_v16, %s5428_s9 }
 0x14c   : > { %v320_v17 = vpop.permute.xlu1 %319  ;;  %v317_v18 = vpop.permute.xlu0 %316 }
 0x14d   : > { %v359_v32 = vcombine.low %v5502_v14, %v320_v17  ;;  %v360_v43 = vcombine.high %v5502_v14, %v320_v17 }
 0x14f   : > { %v367_v40 = vrot.slane %v359_v32, %v5524_v31  ;;  %v374_v56 = vrot.slane %v360_v43, %v5524_v31 }
 0x150   : > { %v323_v22 = vpop.permute.xlu1 %322  ;;  %v326_v23 = vpop.permute.xlu0 %325 }
 0x151   : > { %v375_v28 = vcombine.low %v317_v18, %v323_v22  ;;  %v376_v36 = vcombine.high %v317_v18, %v323_v22 }
 0x153   : > { %v383_v34 = vrot.slane %v375_v28, %v5524_v31  ;;  %v390_v49 = vrot.slane %v376_v36, %v5524_v31 }
 0x154   : > { %v329_v29 = vpop.permute.xlu1 %328  ;;  %v332_v30 = vpop.permute.xlu0 %331 }
 0x155   : > { %v391_v35 = vcombine.low %v326_v23, %v332_v30  ;;  %v392_v37 = vcombine.high %v326_v23, %v332_v30  ;;  %v423_v45 = vcombine.low %v367_v40, %v383_v34  ;;  %v424_v50 = vcombine.high %v367_v40, %v383_v34 }
 0x156   : > { %v439_v61 = vcombine.low %v374_v56, %v390_v49  ;;  %v440_v12 = vcombine.high %v374_v56, %v390_v49 }
 0x157   : > { %v399_v46 = vrot.slane %v391_v35, %v5524_v31  ;;  %v406_v51 = vrot.slane %v392_v37, %v5524_v31  ;;  %v431_v58 = vrot.slane %v423_v45, %v5532_v44  ;;  %v438_v3 = vrot.slane %v424_v50, %v5532_v44 }
 0x158   : > { %v335_v38 = vpop.permute.xlu1 %334  ;;  %v5528_v39 = vpop.permute.xlu0 %338  ;;  %v447_v18 = vrot.slane %v439_v61, %v5532_v44  ;;  %v454_v32 = vrot.slane %v440_v12, %v5532_v44 }
 0x159   : > { %v407_v41 = vcombine.low %v329_v29, %v335_v38  ;;  %v408_v42 = vcombine.high %v329_v29, %v335_v38 }
 0x15b   : > { %v415_v47 = vrot.slane %v407_v41, %v5524_v31  ;;  %v422_v48 = vrot.slane %v408_v42, %v5524_v31 }
 0x15c   : > { %v5539_v52 = vpop.permute.xlu1 %341  ;;  %v5541_v53 = vpop.permute.xlu0 %344 }
 0x15d   : > { %v455_v54 = vcombine.low %v399_v46, %v415_v47  ;;  %v456_v55 = vcombine.high %v399_v46, %v415_v47  ;;  %v471_v57 = vcombine.low %v406_v51, %v422_v48  ;;  %v495_v62 = vcombine.low %v5511_v16, %v5539_v52 }
 0x15e   : > { %v511_v63 = vcombine.low %v5528_v39, %v5541_v53  ;;  %v472_v4 = vcombine.high %v406_v51, %v422_v48 }
 0x15f   : > { %v463_v59 = vrot.slane %v455_v54, %v5532_v44  ;;  %v470_v60 = vrot.slane %v456_v55, %v5532_v44  ;;  %v479_v8 = vrot.slane %v471_v57, %v5532_v44  ;;  %v503_v13 = vrot.slane %v495_v62, %v5524_v31 }
 0x160   : > { %v348_v0 = vpop.permute.xlu1 %347  ;;  %v351_v2 = vpop.permute.xlu0 %350  ;;  %v519_v14 = vrot.slane %v511_v63, %v5524_v31  ;;  %v486_v21 = vrot.slane %v472_v4, %v5532_v44  ;;  %v496_v54 = vcombine.high %v5511_v16, %v5539_v52  ;;  %v512_v55 = vcombine.high %v5528_v39, %v5541_v53 }
 0x161   : > { %v488_v5 = vcombine.high %v431_v58, %v463_v59  ;;  %v487_v6 = vcombine.low %v431_v58, %v463_v59  ;;  %v490_v7 = vcombine.high %v438_v3, %v470_v60  ;;  %v489_v11 = vcombine.low %v438_v3, %v470_v60 }
 0x162   : > { %v492_v25 = vcombine.high %v447_v18, %v479_v8  ;;  %v491_v29 = vcombine.low %v447_v18, %v479_v8  ;;  %v559_v30 = vcombine.low %v503_v13, %v519_v14  ;;  %v494_v36 = vcombine.high %v454_v32, %v486_v21 }
 0x163   : > { %v5553_v9 = vrot.slane %v488_v5, 5  ;;  %v648_v10 = vrot.slane %v487_v6, 5  ;;  %v5562_v24 = vrot.slane %v490_v7, 5  ;;  %v654_v28 = vrot.slane %v489_v11, 5 }
 0x164   : > { %v354_v15 = vpop.permute.xlu1 %353  ;;  %v357_v17 = vpop.permute.xlu0 %356  ;;  %v5571_v35 = vrot.slane %v492_v25, 5  ;;  %v5575_v38 = vrot.slane %v491_v29, 5  ;;  %v493_v40 = vcombine.low %v454_v32, %v486_v21  ;;  %v567_v42 = vrot.slane %v559_v30, %v5532_v44 }
 0x165   : > { %v527_v19 = vcombine.low %v348_v0, %v354_v15  ;;  %v543_v20 = vcombine.low %v351_v2, %v357_v17  ;;  %v689_v22 = vsel %vm647_vm1, 0.0, %v5553_v9  ;;  %v688_v23 = vsel %vm647_vm1, 0.0, %v648_v10 }
 0x166   : > { %726 = vrot.lane.b32.xlu0 %v689_v22, %s5431_s10  ;;  %720 = vrot.lane.b32.xlu1 %v688_v23, %s5431_s10  ;;  %v691_v34 = vsel %vm647_vm1, 0.0, %v5562_v24  ;;  %v690_v37 = vsel %vm647_vm1, 0.0, %v654_v28  ;;  %v528_v43 = vcombine.high %v348_v0, %v354_v15  ;;  %v544_v45 = vcombine.high %v351_v2, %v357_v17 }
 0x167   : > { %v535_v26 = vrot.slane %v527_v19, %v5524_v31  ;;  %v551_v27 = vrot.slane %v543_v20, %v5524_v31  ;;  %v693_v47 = vsel %vm647_vm1, 0.0, %v5571_v35  ;;  %v5582_v48 = vrot.slane %v494_v36, 5 }
 0x168   : > { %v692_v50 = vsel %vm647_vm1, 0.0, %v5575_v38  ;;  %v666_v51 = vrot.slane %v493_v40, 5  ;;  %v560_v56 = vcombine.high %v503_v13, %v519_v14  ;;  %v542_v57 = vrot.slane %v528_v43, %v5524_v31 }
 0x169   : > { %v591_v33 = vcombine.low %v535_v26, %v551_v27  ;;  %v592_v46 = vcombine.high %v535_v26, %v551_v27  ;;  %v558_v58 = vrot.slane %v544_v45, %v5524_v31  ;;  %v695_v59 = vsel %vm647_vm1, 0.0, %v5582_v48 }
 0x16a   : > { %738 = vrot.lane.b32.xlu0 %v691_v34, %s5431_s10  ;;  %732 = vrot.lane.b32.xlu1 %v690_v37, %s5431_s10  ;;  %v694_v16 = vsel %vm647_vm1, 0.0, %v666_v51  ;;  %v510_v39 = vrot.slane %v496_v54, %v5524_v31  ;;  %v526_v52 = vrot.slane %v512_v55, %v5524_v31  ;;  %v574_v53 = vrot.slane %v560_v56, %v5532_v44 }
 0x16b   : > { %v599_v41 = vrot.slane %v591_v33, %v5532_v44  ;;  %v606_v62 = vrot.slane %v592_v46, %v5532_v44  ;;  %v607_v63 = vcombine.low %v542_v57, %v558_v58  ;;  %v608_v13 = vcombine.high %v542_v57, %v558_v58 }
 0x16c   : > { %v575_v5 = vcombine.low %v510_v39, %v526_v52  ;;  %v576_v19 = vcombine.high %v510_v39, %v526_v52 }
 0x16d   : > { %v623_v49 = vcombine.low %v567_v42, %v599_v41  ;;  %v624_v61 = vcombine.high %v567_v42, %v599_v41  ;;  %v625_v3 = vcombine.low %v574_v53, %v606_v62  ;;  %v626_v8 = vcombine.high %v574_v53, %v606_v62 }
 0x16e   : > { %750 = vrot.lane.b32.xlu0 %v693_v47, %s5431_s10  ;;  %744 = vrot.lane.b32.xlu1 %v692_v50, %s5431_s10  ;;  %v615_v11 = vrot.slane %v607_v63, %v5532_v44  ;;  %v622_v22 = vrot.slane %v608_v13, %v5532_v44  ;;  %v590_v25 = vrot.slane %v576_v19, %v5532_v44 }
 0x16f   : > { %v649_v60 = vrot.slane %v623_v49, 5  ;;  %v652_v2 = vrot.slane %v624_v61, 5  ;;  %v655_v7 = vrot.slane %v625_v3, 5  ;;  %v658_v15 = vrot.slane %v626_v8, 5 }
 0x170   : > { %v630_v32 = vcombine.high %v590_v25, %v622_v22 }
 0x171   : > { %v650_v0 = vsel %vm647_vm1, %v648_v10, %v649_v60  ;;  %v696_v4 = vsel %vm647_vm1, %v649_v60, 0.0  ;;  %v697_v6 = vsel %vm647_vm1, %v652_v2, 0.0  ;;  %v653_v12 = vsel %vm647_vm1, %v5553_v9, %v652_v2 }
 0x172   : > { %762 = vrot.lane.b32.xlu0 %v695_v59, %s5431_s10  ;;  %756 = vrot.lane.b32.xlu1 %v694_v16, %s5431_s10  ;;  %v583_v10 = vrot.slane %v575_v5, %v5532_v44  ;;  %v656_v14 = vsel %vm647_vm1, %v654_v28, %v655_v7  ;;  %v698_v18 = vsel %vm647_vm1, %v655_v7, 0.0  ;;  %v699_v9 = vsel %vm647_vm1, %v658_v15, 0.0 }
 0x173   : > { %v659_v23 = vsel %vm647_vm1, %v5562_v24, %v658_v15  ;;  %v629_v28 = vcombine.low %v590_v25, %v622_v22  ;;  %v670_v36 = vrot.slane %v630_v32, 5 }
 0x174   : > { %v627_v17 = vcombine.low %v583_v10, %v615_v11  ;;  %v628_v21 = vcombine.high %v583_v10, %v615_v11 }
 0x175   : > { %v667_v24 = vrot.slane %v629_v28, 5  ;;  %v671_v40 = vsel %vm647_vm1, %v5582_v48, %v670_v36 }
 0x176   : > { %722 = vrot.lane.b32.xlu0 %v650_v0, %s5431_s10  ;;  %724 = vrot.lane.b32.xlu1 %v696_v4, %s5431_s10  ;;  %v661_v20 = vrot.slane %v627_v17, 5  ;;  %v664_v27 = vrot.slane %v628_v21, 5 }
 0x177   : > { %v668_v34 = vsel %vm647_vm1, %v666_v51, %v667_v24  ;;  %v702_v37 = vsel %vm647_vm1, %v667_v24, 0.0 }
 0x178   : > { %v662_v26 = vsel %vm647_vm1, %v5575_v38, %v661_v20  ;;  %v700_v29 = vsel %vm647_vm1, %v661_v20, 0.0  ;;  %v701_v30 = vsel %vm647_vm1, %v664_v27, 0.0  ;;  %v665_v33 = vsel %vm647_vm1, %v5571_v35, %v664_v27 }
 0x179   : > { %v703_v38 = vsel %vm647_vm1, %v670_v36, 0.0  ;;  %vm1232_vm1 = vcmask 146432  }
 0x17a   : > { %730 = vrot.lane.b32.xlu0 %v697_v6, %s5431_s10  ;;  %728 = vrot.lane.b32.xlu1 %v653_v12, %s5431_s10 }
 0x17e   : > { %734 = vrot.lane.b32.xlu0 %v656_v14, %s5431_s10  ;;  %736 = vrot.lane.b32.xlu1 %v698_v18, %s5431_s10 }
 0x182   : > { %742 = vrot.lane.b32.xlu0 %v699_v9, %s5431_s10  ;;  %740 = vrot.lane.b32.xlu1 %v659_v23, %s5431_s10 }
 0x186   : > { %746 = vrot.lane.b32.xlu0 %v662_v26, %s5431_s10  ;;  %748 = vrot.lane.b32.xlu1 %v700_v29, %s5431_s10 }
 0x18a   : > { %754 = vrot.lane.b32.xlu0 %v701_v30, %s5431_s10  ;;  %752 = vrot.lane.b32.xlu1 %v665_v33, %s5431_s10 }
 0x18e   : > { %758 = vrot.lane.b32.xlu0 %v668_v34, %s5431_s10  ;;  %760 = vrot.lane.b32.xlu1 %v702_v37, %s5431_s10 }
 0x192   : > { %766 = vrot.lane.b32.xlu0 %v703_v38, %s5431_s10  ;;  %764 = vrot.lane.b32.xlu1 %v671_v40, %s5431_s10  ;;  %s224_s10 = scalar_lea.vmem %s8575_s5, %s5368_s7 }
 0x1d8   : > { %v727_v35 = vpop.permute.xlu0 %726  ;;  %v721_v41 = vpop.permute.xlu1 %720 }
 0x1d9   : > { %v796_v42 = vsel %vm792_vm2, 0.0, %v727_v35  ;;  %v793_v43 = vsel %vm792_vm2, 0.0, %v721_v41 }
 0x1da   : > { %v5647_v45 = vsel %vm817_vm3, %v796_v42, 0.0  ;;  %v5650_v46 = vsel %vm817_vm3, %v793_v43, 0.0 }
 0x1db   : > { %1295 = vrot.lane.b32.xlu1 %v5647_v45, %s5432_s11  ;;  %1289 = vrot.lane.b32.xlu0 %v5650_v46, %s5432_s11  ;;  %v2248_v20 = vrot.slane %v5650_v46, 2  ;;  %v3678_v30 = vrot.slane %v5650_v46, 4 }
 0x1dc   : > { %v739_v47 = vpop.permute.xlu0 %738  ;;  %v733_v48 = vpop.permute.xlu1 %732 }
 0x1dd   : > { %v802_v49 = vsel %vm792_vm2, 0.0, %v739_v47  ;;  %v799_v50 = vsel %vm792_vm2, 0.0, %v733_v48 }
 0x1de   : > { %v5659_v51 = vsel %vm817_vm3, %v802_v49, 0.0  ;;  %v5662_v54 = vsel %vm817_vm3, %v799_v50, 0.0  ;;  %v3683_v49 = vrot.slane %v5647_v45, 4 }
 0x1df   : > { %v858_v55 = vcombine.low %v5647_v45, %v5659_v51  ;;  %v859_v56 = vcombine.high %v5647_v45, %v5659_v51  ;;  %1307 = vrot.lane.b32.xlu1 %v5659_v51, %s5432_s11  ;;  %v842_v57 = vcombine.low %v5650_v46, %v5662_v54  ;;  %v843_v58 = vcombine.high %v5650_v46, %v5662_v54 }
 0x1e0   : > { %1301 = vrot.lane.b32.xlu0 %v5662_v54, %s5432_s11  ;;  %v751_v59 = vpop.permute.xlu0 %750  ;;  %v745_v60 = vpop.permute.xlu1 %744 }
 0x1e1   : > { %v808_v61 = vsel %vm792_vm2, 0.0, %v751_v59  ;;  %v5678_v62 = vrot.slane %v858_v55, %v5524_v31  ;;  %v5681_v16 = vrot.slane %v859_v56, %v5524_v31  ;;  %v805_v39 = vsel %vm792_vm2, 0.0, %v745_v60 }
 0x1e2   : > { %v5685_v52 = vsel %vm817_vm3, %v808_v61, 0.0  ;;  %v5688_v53 = vrot.slane %v842_v57, %v5524_v31  ;;  %v5691_v63 = vrot.slane %v843_v58, %v5524_v31  ;;  %v5694_v0 = vsel %vm817_vm3, %v805_v39, 0.0 }
 0x1e3   : > { %8776 = vst [vmem:[#allocation2_spill] sm:$0xff] %v5678_v62  ;;  %1319 = vrot.lane.b32.xlu1 %v5685_v52, %s5432_s11  ;;  %v2253_v59 = vrot.slane %v5647_v45, 2  ;;  %v3698_v1 = vrot.slane %v5694_v0, 4 }
 0x1e4   : > { %8777 = vst [vmem:[#allocation3_spill] sm:$0xff] %v5688_v53  ;;  %1313 = vrot.lane.b32.xlu0 %v5694_v0, %s5432_s11  ;;  %v763_v2 = vpop.permute.xlu0 %762  ;;  %v757_v5 = vpop.permute.xlu1 %756 }
 0x1e5   : > { %v814_v6 = vsel %vm792_vm2, 0.0, %v763_v2  ;;  %v811_v11 = vsel %vm792_vm2, 0.0, %v757_v5  ;;  %v3688_v5 = vrot.slane %v5662_v54, 4 }
 0x1e6   : > { %v5711_v12 = vsel %vm817_vm3, %v814_v6, 0.0  ;;  %v5714_v10 = vsel %vm817_vm3, %v811_v11, 0.0 }
 0x1e7   : > { %v890_v13 = vcombine.low %v5685_v52, %v5711_v12  ;;  %v891_v14 = vcombine.high %v5685_v52, %v5711_v12  ;;  %1331 = vrot.lane.b32.xlu1 %v5711_v12, %s5432_s11  ;;  %v874_v15 = vcombine.low %v5694_v0, %v5714_v10  ;;  %v875_v17 = vcombine.high %v5694_v0, %v5714_v10 }
 0x1e8   : > { %1325 = vrot.lane.b32.xlu0 %v5714_v10, %s5432_s11  ;;  %v723_v18 = vpop.permute.xlu0 %722  ;;  %v725_v19 = vpop.permute.xlu1 %724 }
 0x1e9   : > { %v794_v9 = vsel %vm792_vm2, 0.0, %v723_v18  ;;  %v5731_v21 = vrot.slane %v890_v13, %v5524_v31  ;;  %v5734_v22 = vrot.slane %v891_v14, %v5524_v31  ;;  %v795_v23 = vsel %vm792_vm2, 0.0, %v725_v19 }
 0x1ea   : > { %v5738_v25 = vsel %vm817_vm3, %v794_v9, 0.0  ;;  %v5741_v26 = vrot.slane %v874_v15, %v5524_v31  ;;  %v5744_v27 = vrot.slane %v875_v17, %v5524_v31  ;;  %v5747_v28 = vsel %vm817_vm3, %v795_v23, 0.0 }
 0x1eb   : > { %8778 = vst [vmem:[#allocation4_spill] sm:$0xff] %v5731_v21  ;;  %8779 = vst [vmem:[#allocation5_spill] sm:$0xff] %v5738_v25  ;;  %1768 = vrot.lane.b32.xlu1 %v5650_v46, %s5433_s12  ;;  %v2249_v29 = vrot.slane %v5738_v25, 2  ;;  %v8581_v24 = vrot.slane %v5738_v25, 4  ;;  %v5757_v33 = vrot.slane %v5747_v28, 2 }
 0x1ec   : > { %8780 = vst [vmem:[#allocation6_spill] sm:$0xff] %v5741_v26  ;;  %1774 = vrot.lane.b32.xlu0 %v5647_v45, %s5433_s12  ;;  %v731_v32 = vpop.permute.xlu0 %730  ;;  %v939_v36 = vcombine.high %v5741_v26, %v5731_v21  ;;  %v729_v37 = vpop.permute.xlu1 %728  ;;  %v954_v41 = vcombine.low %v5744_v27, %v5734_v22  ;;  %v8788_v21 = vcombine.high %v5688_v53, %v5678_v62 }
 0x1ed   : > { %v798_v38 = vsel %vm792_vm2, 0.0, %v731_v32  ;;  %v5765_v40 = vsel %vm2247_vm4, %v2248_v20, %v2249_v29  ;;  %v5770_v35 = vsel %vm3677_vm5, %v3678_v30, %v8581_v24  ;;  %v797_v42 = vsel %vm792_vm2, 0.0, %v729_v37 }
 0x1ee   : > { %v5776_v43 = vsel %vm817_vm3, %v798_v38, 0.0  ;;  %v5780_v46 = vsel %vm2247_vm4, %v2249_v29, %v5757_v33  ;;  %v5783_v47 = vsel %vm817_vm3, %v797_v42, 0.0  ;;  %v5997_v8 = vrot.slane %v939_v36, %v5532_v44 }
 0x1ef   : > { %8781 = vst [vmem:[#allocation7_spill] sm:$0xff] %v5780_v46  ;;  %1780 = vrot.lane.b32.xlu1 %v5662_v54, %s5433_s12  ;;  %v8580_v50 = vrot.slane %v5783_v47, 4  ;;  %v2254_v55 = vrot.slane %v5783_v47, 2  ;;  %v5794_v58 = vrot.slane %v5776_v43, 2  ;;  %v6003_v7 = vrot.slane %v954_v41, %v5532_v44 }
 0x1f0   : > { %1786 = vrot.lane.b32.xlu0 %v5659_v51, %s5433_s12  ;;  %v735_v48 = vpop.permute.xlu0 %734  ;;  %v737_v56 = vpop.permute.xlu1 %736  ;;  %8785 = vst [vmem:[#allocation11_spill] sm:$0xff] %v5997_v8  ;;  %v6021_v41 = vrot.slane %v8788_v21, %v5532_v44 }
 0x1f1   : > { %v800_v57 = vsel %vm792_vm2, 0.0, %v735_v48  ;;  %v801_v61 = vsel %vm792_vm2, 0.0, %v737_v56  ;;  %v5806_v2 = vsel %vm3677_vm5, %v3683_v49, %v8580_v50  ;;  %v5824_v17 = vsel %vm2247_vm4, %v2253_v59, %v2254_v55  ;;  %8786 = vst [vmem:[#allocation12_spill] sm:$0xff] %v6003_v7 }
 0x1f2   : > { %v5801_v39 = vsel %vm817_vm3, %v800_v57, 0.0  ;;  %v5810_v6 = vsel %vm817_vm3, %v801_v61, 0.0  ;;  %v5834_v20 = vsel %vm2247_vm4, %v2254_v55, %v5794_v58  ;;  %v3693_v49 = vrot.slane %v5659_v51, 4  ;;  %8789 = vst [vmem:[#allocation14_spill] sm:$0xff] %v6021_v41 }
 0x1f3   : > { %1792 = vrot.lane.b32.xlu1 %v5694_v0, %s5433_s12  ;;  %v8579_v13 = vrot.slane %v5801_v39, 4  ;;  %8782 = vst [vmem:[#allocation8_spill] sm:$0xff] %v5834_v20 }
 0x1f4   : > { %1798 = vrot.lane.b32.xlu0 %v5685_v52, %s5433_s12  ;;  %v743_v15 = vpop.permute.xlu0 %742  ;;  %v741_v18 = vpop.permute.xlu1 %740 }
 0x1f5   : > { %v804_v19 = vsel %vm792_vm2, 0.0, %v743_v15  ;;  %v5830_v9 = vsel %vm3677_vm5, %v3688_v5, %v8579_v13  ;;  %v803_v23 = vsel %vm792_vm2, 0.0, %v741_v18  ;;  %v5869_v15 = vrot.slane %v5810_v6, 2 }
 0x1f6   : > { %v5838_v29 = vsel %vm817_vm3, %v804_v19, 0.0  ;;  %v5841_v30 = vsel %vm817_vm3, %v803_v23, 0.0  ;;  %v2259_v18 = vrot.slane %v5801_v39, 2 }
 0x1f7   : > { %1804 = vrot.lane.b32.xlu1 %v5714_v10, %s5433_s12  ;;  %v8578_v55 = vrot.slane %v5841_v30, 4  ;;  %v2264_v14 = vrot.slane %v5841_v30, 2 }
 0x1f8   : > { %1810 = vrot.lane.b32.xlu0 %v5711_v12, %s5433_s12  ;;  %v747_v42 = vpop.permute.xlu0 %746  ;;  %v749_v48 = vpop.permute.xlu1 %748  ;;  %v5895_v13 = vsel %vm2247_vm4, %v2259_v18, %v5869_v15 }
 0x1f9   : > { %v806_v56 = vsel %vm792_vm2, 0.0, %v747_v42  ;;  %v5861_v57 = vsel %vm3677_vm5, %v3693_v49, %v8578_v55  ;;  %v807_v19 = vsel %vm792_vm2, 0.0, %v749_v48  ;;  %v2258_v49 = vrot.slane %v5662_v54, 2  ;;  %8783 = vst [vmem:[#allocation9_spill] sm:$0xff] %v5895_v13 }
 0x1fa   : > { %v5866_v61 = vsel %vm817_vm3, %v806_v56, 0.0  ;;  %v3703_v48 = vrot.slane %v5685_v52, 4 }
 0x1fb   : > { %1291 = vrot.lane.b32.xlu1 %v5738_v25, %s5432_s11  ;;  %v8582_v3 = vrot.slane %v5866_v61, 4  ;;  %v5891_v54 = vsel %vm2247_vm4, %v2258_v49, %v2259_v18  ;;  %v2269_v60 = vrot.slane %v5866_v61, 2 }
 0x1fc   : > { %1293 = vrot.lane.b32.xlu0 %v5747_v28, %s5432_s11  ;;  %v755_v59 = vpop.permute.xlu0 %754  ;;  %v753_v5 = vpop.permute.xlu1 %752 }
 0x1fd   : > { %v809_v23 = vsel %vm792_vm2, 0.0, %v753_v5  ;;  %v810_v50 = vsel %vm792_vm2, 0.0, %v755_v59 }
 0x1fe   : > { %v5875_v42 = vsel %vm817_vm3, %v809_v23, 0.0  ;;  %v5887_v23 = vsel %vm817_vm3, %v807_v19, 0.0  ;;  %v5905_v19 = vsel %vm3677_vm5, %v3698_v1, %v8582_v3  ;;  %v5928_v18 = vsel %vm817_vm3, %v810_v50, 0.0 }
 0x1ff   : > { %1299 = vrot.lane.b32.xlu1 %v5776_v43, %s5432_s11  ;;  %v8583_v5 = vrot.slane %v5875_v42, 4 }
 0x200   : > { %1297 = vrot.lane.b32.xlu0 %v5783_v47, %s5432_s11  ;;  %v759_v56 = vpop.permute.xlu0 %758  ;;  %v761_v34 = vpop.permute.xlu1 %760 }
 0x201   : > { %v812_v55 = vsel %vm792_vm2, 0.0, %v759_v56  ;;  %v813_v24 = vsel %vm792_vm2, 0.0, %v761_v34  ;;  %v5919_v34 = vsel %vm3677_vm5, %v3703_v48, %v8583_v5  ;;  %v3708_v5 = vrot.slane %v5714_v10, 4 }
 0x202   : > { %v5900_v38 = vsel %vm817_vm3, %v812_v55, 0.0  ;;  %v5908_v56 = vsel %vm817_vm3, %v813_v24, 0.0 }
 0x203   : > { %1303 = vrot.lane.b32.xlu1 %v5801_v39, %s5432_s11  ;;  %v8584_v3 = vrot.slane %v5900_v38, 4  ;;  %v2279_v4 = vrot.slane %v5900_v38, 2 }
 0x204   : > { %1305 = vrot.lane.b32.xlu0 %v5810_v6, %s5432_s11  ;;  %v767_v24 = vpop.permute.xlu0 %766  ;;  %v765_v55 = vpop.permute.xlu1 %764 }
 0x205   : > { %v816_v59 = vsel %vm792_vm2, 0.0, %v767_v24  ;;  %v815_v11 = vsel %vm792_vm2, 0.0, %v765_v55  ;;  %v5954_v55 = vrot.slane %v5838_v29, 2  ;;  %v5970_v24 = vrot.slane %v5887_v23, 2 }
 0x206   : > { %v5932_v48 = vsel %vm817_vm3, %v816_v59, 0.0  ;;  %v5936_v49 = vsel %vm817_vm3, %v815_v11, 0.0  ;;  %v5951_v11 = vsel %vm3677_vm5, %v3708_v5, %v8584_v3  ;;  %v3713_v59 = vrot.slane %v5711_v12, 4 }
 0x207   : > { %v1138_v1 = vcombine.low %v5928_v18, %v5932_v48  ;;  %1311 = vrot.lane.b32.xlu1 %v5838_v29, %s5432_s11  ;;  %v1026_v50 = vcombine.low %v5875_v42, %v5936_v49  ;;  %v8585_v32 = vrot.slane %v5936_v49, 4  ;;  %v2263_v3 = vrot.slane %v5659_v51, 2 }
 0x208   : > { %1309 = vrot.lane.b32.xlu0 %v5841_v30, %s5432_s11  ;;  %v5977_v45 = vsel %vm2247_vm4, %v2264_v14, %v5954_v55  ;;  %v5986_v51 = vrot.slane %v5908_v56, 2  ;;  %v6015_v36 = vrot.slane %v5932_v48, 2  ;;  %v2284_v53 = vrot.slane %v5936_v49, 2 }
 0x209   : > { %v5966_v5 = vsel %vm3677_vm5, %v3713_v59, %v8585_v32  ;;  %v5973_v37 = vsel %vm2247_vm4, %v2263_v3, %v2264_v14  ;;  %8784 = vst [vmem:[#allocation10_spill] sm:$0xff] %v5977_v45  ;;  %v5983_v59 = vrot.slane %v5928_v18, 2  ;;  %v2268_v32 = vrot.slane %v5694_v0, 2 }
 0x20a   : > { %v2273_v3 = vrot.slane %v5685_v52, 2  ;;  %v2278_v14 = vrot.slane %v5714_v10, 2  ;;  %v6010_v52 = vsel %vm2247_vm4, %v2269_v60, %v5970_v24  ;;  %v2274_v10 = vrot.slane %v5875_v42, 2 }
 0x20b   : > { %1315 = vrot.lane.b32.xlu1 %v5866_v61, %s5432_s11  ;;  %v6006_v0 = vsel %vm2247_vm4, %v2268_v32, %v2269_v60  ;;  %8787 = vst [vmem:[#allocation13_spill] sm:$0xff] %v6010_v52  ;;  %v8790_v32 = vcombine.low %v5691_v63, %v5681_v16  ;;  %v6043_v21 = vsel %vm2247_vm4, %v2279_v4, %v5986_v51  ;;  %vm1234_vm2 = vcmask 293888  }
 0x20c   : > { %1317 = vrot.lane.b32.xlu0 %v5887_v23, %s5432_s11  ;;  %v6032_v60 = vsel %vm2247_vm4, %v2273_v3, %v2274_v10  ;;  %v6036_v52 = vsel %vm2247_vm4, %v2274_v10, %v5983_v59  ;;  %v6039_v62 = vsel %vm2247_vm4, %v2278_v14, %v2279_v4  ;;  %8793 = vst [vmem:[#allocation17_spill] sm:$0xff] %v6043_v21  ;;  %vm1236_vm3 = vcmask 441344  }
 0x20d   : > { %v6027_v26 = vrot.slane %v8790_v32, %v5532_v44  ;;  %8792 = vst [vmem:[#allocation16_spill] sm:$0xff] %v6036_v52  ;;  %v2283_v32 = vrot.slane %v5711_v12, 2  ;;  %v8794_v4 = vcombine.high %v5691_v63, %v5681_v16  ;;  %v6068_v3 = vsel %vm2247_vm4, %v2284_v53, %v6015_v36 }
 0x20e   : > { %8796 = vst [vmem:[#allocation19_spill] sm:$0xff] %v6068_v3  ;;  %v8797_v14 = vcombine.high %v5744_v27, %v5734_v22  ;;  %v8800_v22 = vcombine.low %v5783_v47, %v5841_v30  ;;  %v8802_v63 = vcombine.low %v5776_v43, %v5838_v29  ;;  %v1034_v7 = vrot.slane %v1026_v50, %v5524_v31 }
 0x20f   : > { %1323 = vrot.lane.b32.xlu1 %v5928_v18, %s5432_s11  ;;  %8791 = vst [vmem:[#allocation15_spill] sm:$0xff] %v6027_v26  ;;  %v6059_v21 = vrot.slane %v8794_v4, %v5532_v44  ;;  %v6064_v12 = vsel %vm2247_vm4, %v2283_v32, %v2284_v53  ;;  %v8799_v53 = vcombine.low %v5738_v25, %v5801_v39  ;;  %vm1238_vm4 = vcmask 588800  }
 0x210   : > { %1321 = vrot.lane.b32.xlu0 %v5875_v42, %s5432_s11  ;;  %v6076_v16 = vrot.slane %v8797_v14, %v5532_v44  ;;  %v1002_v27 = vrot.slane %v8800_v22, %v5524_v31  ;;  %v8801_v14 = vcombine.low %v5747_v28, %v5810_v6  ;;  %v1129_v32 = vrot.slane %v8802_v63, %v5524_v31 }
 0x211   : > { %8795 = vst [vmem:[#allocation18_spill] sm:$0xff] %v6059_v21  ;;  %v986_v4 = vrot.slane %v8799_v53, %v5524_v31  ;;  %v1145_v21 = vrot.slane %v1138_v1, %v5524_v31  ;;  %v8804_v22 = vcombine.low %v5866_v61, %v5900_v38  ;;  %v8806_v63 = vcombine.high %v5783_v47, %v5841_v30 }
 0x212   : > { %8798 = vst [vmem:[#allocation20_spill] sm:$0xff] %v6076_v16  ;;  %v1121_v10 = vrot.slane %v8801_v14, %v5524_v31  ;;  %v8803_v16 = vcombine.low %v5887_v23, %v5908_v56 }
 0x213   : > { %1327 = vrot.lane.b32.xlu1 %v5900_v38, %s5432_s11  ;;  %v1018_v14 = vrot.slane %v8804_v22, %v5524_v31  ;;  %v1042_v26 = vcombine.low %v986_v4, %v1002_v27  ;;  %v1043_v8 = vcombine.high %v986_v4, %v1002_v27  ;;  %v1009_v41 = vrot.slane %v8806_v63, %v5524_v31 }
 0x214   : > { %1329 = vrot.lane.b32.xlu0 %v5908_v56, %s5432_s11  ;;  %v1137_v53 = vrot.slane %v8803_v16, %v5524_v31  ;;  %v8805_v16 = vcombine.high %v5738_v25, %v5801_v39  ;;  %v8807_v22 = vcombine.high %v5866_v61, %v5900_v38  ;;  %v8808_v4 = vcombine.high %v5875_v42, %v5936_v49 }
 0x215   : > { %v6131_v3 = vrot.slane %v1042_v26, %v5532_v44  ;;  %v1074_v52 = vcombine.low %v1018_v14, %v1034_v7  ;;  %v1075_v45 = vcombine.high %v1018_v14, %v1034_v7  ;;  %v1146_v26 = vcombine.low %v1121_v10, %v1129_v32 }
 0x216   : > { %v993_v1 = vrot.slane %v8805_v16, %v5524_v31  ;;  %v1025_v50 = vrot.slane %v8807_v22, %v5524_v31  ;;  %v1041_v27 = vrot.slane %v8808_v4, %v5524_v31  ;;  %v6134_v16 = vrot.slane %v1043_v8, %v5532_v44 }
 0x217   : > { %1335 = vrot.lane.b32.xlu1 %v5932_v48, %s5432_s11  ;;  %v6139_v22 = vrot.slane %v1074_v52, %v5532_v44  ;;  %v6142_v4 = vrot.slane %v1075_v45, %v5532_v44  ;;  %v6177_v14 = vrot.slane %v1146_v26, %v5532_v44  ;;  %v2344_v26 = vcombine.low %v6006_v0, %v6039_v62 }
 0x218   : > { %1333 = vrot.lane.b32.xlu0 %v5936_v49, %s5432_s11  ;;  %v1058_v13 = vcombine.low %v993_v1, %v1009_v41  ;;  %v1090_v63 = vcombine.low %v1025_v50, %v1041_v27  ;;  %v1059_v20 = vcombine.high %v993_v1, %v1009_v41  ;;  %v1091_v46 = vcombine.high %v1025_v50, %v1041_v27 }
 0x219   : > { %8812 = vst [vmem:[#allocation24_spill] sm:$0xff] %v6177_v14  ;;  %v3758_v27 = vcombine.low %v5806_v2, %v5861_v57  ;;  %v3790_v50 = vcombine.low %v5919_v34, %v5966_v5  ;;  %v3742_v32 = vcombine.low %v5770_v35, %v5830_v9  ;;  %v3775_v45 = vcombine.high %v5905_v19, %v5951_v11 }
 0x21a   : > { %v6147_v7 = vrot.slane %v1058_v13, %v5532_v44  ;;  %v6150_v8 = vrot.slane %v1090_v63, %v5532_v44  ;;  %v6153_v41 = vrot.slane %v1059_v20, %v5532_v44  ;;  %v6156_v52 = vrot.slane %v1091_v46, %v5532_v44 }
 0x21b   : > { %1772 = vrot.lane.b32.xlu1 %v5747_v28, %s5433_s12  ;;  %v2360_v63 = vcombine.low %v6032_v60, %v6064_v12  ;;  %v3791_v20 = vcombine.high %v5919_v34, %v5966_v5  ;;  %v3774_v13 = vcombine.low %v5905_v19, %v5951_v11 }
 0x21c   : > { %1770 = vrot.lane.b32.xlu0 %v5738_v25, %s5433_s12  ;;  %v1154_v25 = vcombine.low %v1137_v53, %v1145_v21  ;;  %8809 = vst [vmem:[#allocation21_spill] sm:$0xff] %v6150_v8  ;;  %8810 = vst [vmem:[#allocation22_spill] sm:$0xff] %v6153_v41  ;;  %v2312_v53 = vcombine.low %v5765_v40, %v5891_v54  ;;  %v6221_v21 = vrot.slane %v2344_v26, %v5524_v31 }
 0x21d   : > { %8811 = vst [vmem:[#allocation23_spill] sm:$0xff] %v6156_v52  ;;  %v6209_v46 = vrot.slane %v2360_v63, %v5524_v31  ;;  %v3759_v63 = vcombine.high %v5806_v2, %v5861_v57  ;;  %v3743_v52 = vcombine.high %v5770_v35, %v5830_v9  ;;  %v3805_v41 = vrot.slane %v3791_v20, %v5524_v31 }
 0x21e   : > { %v6180_v1 = vrot.slane %v1154_v25, %v5532_v44  ;;  %v2328_v25 = vcombine.low %v5824_v17, %v5973_v37  ;;  %8816 = vst [vmem:[#allocation28_spill] sm:$0xff] %v6221_v21  ;;  %v6238_v26 = vrot.slane %v2312_v53, %v5524_v31  ;;  %v6246_v8 = vrot.slane %v3742_v32, %v5524_v31 }
 0x21f   : > { %1776 = vrot.lane.b32.xlu1 %v5783_v47, %s5433_s12  ;;  %8814 = vst [vmem:[#allocation26_spill] sm:$0xff] %v6209_v46  ;;  %v2408_v14 = vcombine.low %v6221_v21, %v6209_v46  ;;  %v3773_v53 = vrot.slane %v3759_v63, %v5524_v31  ;;  %v3789_v21 = vrot.slane %v3775_v45, %v5524_v31 }
 0x220   : > { %1778 = vrot.lane.b32.xlu0 %v5776_v43, %s5433_s12  ;;  %8813 = vst [vmem:[#allocation25_spill] sm:$0xff] %v6180_v1  ;;  %v6218_v10 = vrot.slane %v2328_v25, %v5524_v31  ;;  %v6232_v1 = vrot.slane %v3758_v27, %v5524_v31  ;;  %v6235_v25 = vrot.slane %v3790_v50, %v5524_v31  ;;  %8819 = vst [vmem:[#allocation31_spill] sm:$0xff] %v6238_v26 }
 0x221   : > { %8820 = vst [vmem:[#allocation32_spill] sm:$0xff] %v6246_v8  ;;  %v6249_v27 = vrot.slane %v3774_v13, %v5524_v31  ;;  %v6260_v20 = vrot.slane %v2408_v14, %v5532_v44 }
 0x222   : > { %8815 = vst [vmem:[#allocation27_spill] sm:$0xff] %v6218_v10  ;;  %8817 = vst [vmem:[#allocation29_spill] sm:$0xff] %v6232_v1  ;;  %v2376_v50 = vcombine.low %v6238_v26, %v6218_v10  ;;  %v3806_v13 = vcombine.low %v6246_v8, %v6232_v1  ;;  %v3757_v26 = vrot.slane %v3743_v52, %v5524_v31  ;;  %v6283_v8 = vrot.slane %v5747_v28, 4 }
 0x223   : > { %1784 = vrot.lane.b32.xlu1 %v5810_v6, %s5433_s12  ;;  %8818 = vst [vmem:[#allocation30_spill] sm:$0xff] %v6235_v25  ;;  %8821 = vst [vmem:[#allocation33_spill] sm:$0xff] %v6249_v27  ;;  %v3838_v32 = vcombine.low %v6249_v27, %v6235_v25  ;;  %v3855_v10 = vcombine.high %v3789_v21, %v3805_v41  ;;  %v6291_v1 = vrot.slane %v5776_v43, 4  ;;  %v6307_v43 = vrot.slane %v5810_v6, 4 }
 0x224   : > { %1782 = vrot.lane.b32.xlu0 %v5801_v39, %s5433_s12  ;;  %8822 = vst [vmem:[#allocation34_spill] sm:$0xff] %v6260_v20  ;;  %v6268_v46 = vrot.slane %v2376_v50, %v5532_v44  ;;  %v3823_v14 = vcombine.high %v3757_v26, %v3773_v53  ;;  %v6276_v63 = vrot.slane %v3806_v13, %v5532_v44  ;;  %8826 = vst [vmem:[#allocation38_spill] sm:$0xff] %v6283_v8 }
 0x225   : > { %v6271_v45 = vrot.slane %v3838_v32, %v5532_v44  ;;  %v6286_v50 = vrot.slane %v3855_v10, %v5532_v44  ;;  %8828 = vst [vmem:[#allocation40_spill] sm:$0xff] %v6291_v1  ;;  %v3822_v13 = vcombine.low %v3757_v26, %v3773_v53  ;;  %v3854_v27 = vcombine.low %v3789_v21, %v3805_v41 }
 0x226   : > { %8823 = vst [vmem:[#allocation35_spill] sm:$0xff] %v6268_v46  ;;  %8825 = vst [vmem:[#allocation37_spill] sm:$0xff] %v6276_v63  ;;  %v6296_v25 = vrot.slane %v3823_v14, %v5532_v44  ;;  %v6312_v21 = vrot.slane %v5838_v29, 4  ;;  %v6323_v6 = vrot.slane %v5887_v23, 4  ;;  %v6336_v14 = vrot.slane %v5932_v48, 4 }
 0x227   : > { %1788 = vrot.lane.b32.xlu1 %v5841_v30, %s5433_s12  ;;  %8824 = vst [vmem:[#allocation36_spill] sm:$0xff] %v6271_v45  ;;  %8827 = vst [vmem:[#allocation39_spill] sm:$0xff] %v6286_v50  ;;  %v6301_v28 = vrot.slane %v3822_v13, %v5532_v44  ;;  %v6304_v10 = vrot.slane %v3854_v27, %v5532_v44  ;;  %v6326_v27 = vrot.slane %v5928_v18, 4 }
 0x228   : > { %1790 = vrot.lane.b32.xlu0 %v5838_v29, %s5433_s12  ;;  %8829 = vst [vmem:[#allocation41_spill] sm:$0xff] %v6296_v25  ;;  %8832 = vst [vmem:[#allocation44_spill] sm:$0xff] %v6307_v43  ;;  %v6333_v29 = vrot.slane %v5908_v56, 4 }
 0x229   : > { %8830 = vst [vmem:[#allocation42_spill] sm:$0xff] %v6301_v28  ;;  %8831 = vst [vmem:[#allocation43_spill] sm:$0xff] %v6304_v10 }
 0x22a   : > { %8833 = vst [vmem:[#allocation45_spill] sm:$0xff] %v6312_v21  ;;  %8834 = vst [vmem:[#allocation46_spill] sm:$0xff] %v6323_v6 }
 0x22b   : > { %1796 = vrot.lane.b32.xlu1 %v5887_v23, %s5433_s12  ;;  %8835 = vst [vmem:[#allocation47_spill] sm:$0xff] %v6326_v27  ;;  %8836 = vst [vmem:[#allocation48_spill] sm:$0xff] %v6333_v29 }
 0x22c   : > { %1794 = vrot.lane.b32.xlu0 %v5866_v61, %s5433_s12  ;;  %8837 = vst [vmem:[#allocation49_spill] sm:$0xff] %v6336_v14 }
 0x22f   : > { %1800 = vrot.lane.b32.xlu1 %v5875_v42, %s5433_s12 }
 0x230   : > { %1802 = vrot.lane.b32.xlu0 %v5928_v18, %s5433_s12 }
 0x233   : > { %1808 = vrot.lane.b32.xlu1 %v5908_v56, %s5433_s12 }
 0x234   : > { %1806 = vrot.lane.b32.xlu0 %v5900_v38, %s5433_s12 }
 0x237   : > { %1812 = vrot.lane.b32.xlu1 %v5936_v49, %s5433_s12 }
 0x238   : > { %1814 = vrot.lane.b32.xlu0 %v5932_v48, %s5433_s12 }
 0x23b   : > { %4632 = vrot.lane.b32.xlu1 %v6283_v8, %s5433_s12 }
 0x23c   : > { %4638 = vrot.lane.b32.xlu0 %v6291_v1, %s5433_s12 }
 0x23f   : > { %4644 = vrot.lane.b32.xlu1 %v6307_v43, %s5433_s12 }
 0x240   : > { %4650 = vrot.lane.b32.xlu0 %v6312_v21, %s5433_s12 }
 0x243   : > { %4656 = vrot.lane.b32.xlu1 %v6323_v6, %s5433_s12 }
 0x244   : > { %4662 = vrot.lane.b32.xlu0 %v6326_v27, %s5433_s12 }
 0x247   : > { %4668 = vrot.lane.b32.xlu1 %v6333_v29, %s5433_s12 }
 0x248   : > { %4674 = vrot.lane.b32.xlu0 %v6336_v14, %s5433_s12 }
 0x24b   : > { %4153 = vrot.lane.b32.xlu1 %v6283_v8, %s5432_s11 }
 0x24c   : > { %4159 = vrot.lane.b32.xlu0 %v6291_v1, %s5432_s11 }
 0x24d   : > { %v6346_v23 = vpop.permute.xlu1 %1295  ;;  %v6348_v18 = vpop.permute.xlu0 %1289 }
 0x24e   : > { %8838 = vst [vmem:[#allocation50_spill] sm:$0xff] %v6346_v23  ;;  %8839 = vst [vmem:[#allocation51_spill] sm:$0xff] %v6348_v18 }
 0x24f   : > { %4165 = vrot.lane.b32.xlu1 %v6307_v43, %s5432_s11 }
 0x250   : > { %4171 = vrot.lane.b32.xlu0 %v6312_v21, %s5432_s11 }
 0x251   : > { %v6354_v56 = vpop.permute.xlu1 %1307 }
 0x252   : > { %8840 = vst [vmem:[#allocation52_spill] sm:$0xff] %v6354_v56  ;;  %v6356_v48 = vpop.permute.xlu0 %1301  ;;  %v1377_v32 = vcombine.low %v6346_v23, %v6354_v56 }
 0x253   : > { %8841 = vst [vmem:[#allocation53_spill] sm:$0xff] %v6356_v48  ;;  %4177 = vrot.lane.b32.xlu1 %v6323_v6, %s5432_s11  ;;  %v1361_v41 = vcombine.low %v6348_v18, %v6356_v48 }
 0x254   : > { %4183 = vrot.lane.b32.xlu0 %v6326_v27, %s5432_s11  ;;  %v6385_v23 = vrot.slane %v1377_v32, %v5524_v31 }
 0x255   : > { %v6362_v13 = vpop.permute.xlu1 %1319  ;;  %v6388_v18 = vrot.slane %v1361_v41, %v5524_v31 }
 0x256   : > { %8842 = vst [vmem:[#allocation54_spill] sm:$0xff] %v6362_v13  ;;  %v6364_v52 = vpop.permute.xlu0 %1313  ;;  %8845 = vst [vmem:[#allocation57_spill] sm:$0xff] %v6385_v23 }
 0x257   : > { %8843 = vst [vmem:[#allocation55_spill] sm:$0xff] %v6364_v52  ;;  %4189 = vrot.lane.b32.xlu1 %v6333_v29, %s5432_s11  ;;  %8846 = vst [vmem:[#allocation58_spill] sm:$0xff] %v6388_v18  ;;  %v1425_v41 = vcombine.low %v6388_v18, %v6385_v23 }
 0x258   : > { %4195 = vrot.lane.b32.xlu0 %v6336_v14, %s5432_s11 }
 0x259   : > { %v6374_v53 = vpop.permute.xlu1 %1331 }
 0x25a   : > { %v1409_v26 = vcombine.low %v6362_v13, %v6374_v53  ;;  %v6378_v10 = vpop.permute.xlu0 %1325 }
 0x25b   : > { %8844 = vst [vmem:[#allocation56_spill] sm:$0xff] %v6378_v10  ;;  %v1393_v28 = vcombine.low %v6364_v52, %v6378_v10  ;;  %3202 = vrot.lane.b32.xlu1 %v5757_v33, %s5433_s12 }
 0x25c   : > { %v6391_v48 = vrot.slane %v1409_v26, %v5524_v31  ;;  %3208 = vrot.lane.b32.xlu0 %v5794_v58, %s5433_s12 }
 0x25d   : > { %v6396_v56 = vrot.slane %v1393_v28, %v5524_v31  ;;  %v6398_v63 = vpop.permute.xlu1 %1768 }
 0x25e   : > { %8847 = vst [vmem:[#allocation59_spill] sm:$0xff] %v6391_v48  ;;  %8849 = vst [vmem:[#allocation61_spill] sm:$0xff] %v6398_v63  ;;  %v6400_v45 = vpop.permute.xlu0 %1774 }
 0x25f   : > { %8848 = vst [vmem:[#allocation60_spill] sm:$0xff] %v6396_v56  ;;  %8850 = vst [vmem:[#allocation62_spill] sm:$0xff] %v6400_v45  ;;  %v1457_v32 = vcombine.low %v6396_v56, %v6391_v48  ;;  %3214 = vrot.lane.b32.xlu1 %v5869_v15, %s5433_s12  ;;  %v6422_v56 = vrot.slane %v1425_v41, %v5532_v44 }
 0x260   : > { %3220 = vrot.lane.b32.xlu0 %v5954_v55, %s5433_s12 }
 0x261   : > { %v6410_v26 = vpop.permute.xlu1 %1780  ;;  %v6415_v52 = vrot.slane %v1457_v32, %v5532_v44  ;;  %8854 = vst [vmem:[#allocation66_spill] sm:$0xff] %v6422_v56 }
 0x262   : > { %8851 = vst [vmem:[#allocation63_spill] sm:$0xff] %v6410_v26  ;;  %v6412_v28 = vpop.permute.xlu0 %1786  ;;  %v1840_v23 = vcombine.low %v6398_v63, %v6410_v26 }
 0x263   : > { %8852 = vst [vmem:[#allocation64_spill] sm:$0xff] %v6412_v28  ;;  %8853 = vst [vmem:[#allocation65_spill] sm:$0xff] %v6415_v52  ;;  %3226 = vrot.lane.b32.xlu1 %v5970_v24, %s5433_s12  ;;  %v1856_v48 = vcombine.low %v6400_v45, %v6412_v28 }
 0x264   : > { %3232 = vrot.lane.b32.xlu0 %v5983_v59, %s5433_s12  ;;  %v6441_v13 = vrot.slane %v1840_v23, %v5524_v31 }
 0x265   : > { %v6424_v18 = vpop.permute.xlu1 %1792  ;;  %v6444_v63 = vrot.slane %v1856_v48, %v5524_v31 }
 0x266   : > { %8855 = vst [vmem:[#allocation67_spill] sm:$0xff] %v6424_v18  ;;  %v6430_v10 = vpop.permute.xlu0 %1798  ;;  %8858 = vst [vmem:[#allocation70_spill] sm:$0xff] %v6441_v13 }
 0x267   : > { %8856 = vst [vmem:[#allocation68_spill] sm:$0xff] %v6430_v10  ;;  %3238 = vrot.lane.b32.xlu1 %v5986_v51, %s5433_s12  ;;  %8859 = vst [vmem:[#allocation71_spill] sm:$0xff] %v6444_v63 }
 0x268   : > { %3244 = vrot.lane.b32.xlu0 %v6015_v36, %s5433_s12 }
 0x269   : > { %v6438_v41 = vpop.permute.xlu1 %1804 }
 0x26a   : > { %8857 = vst [vmem:[#allocation69_spill] sm:$0xff] %v6438_v41  ;;  %v1872_v45 = vcombine.low %v6424_v18, %v6438_v41  ;;  %v6448_v28 = vpop.permute.xlu0 %1810  ;;  %v1904_v18 = vcombine.low %v6441_v13, %v6444_v63 }
 0x26b   : > { %v1888_v32 = vcombine.low %v6430_v10, %v6448_v28  ;;  %2723 = vrot.lane.b32.xlu1 %v5757_v33, %s5432_s11 }
 0x26c   : > { %v6455_v26 = vrot.slane %v1872_v45, %v5524_v31  ;;  %2729 = vrot.lane.b32.xlu0 %v5794_v58, %s5432_s11  ;;  %v6482_v13 = vrot.slane %v1904_v18, %v5532_v44 }
 0x26d   : > { %v6460_v23 = vrot.slane %v1888_v32, %v5524_v31  ;;  %v6462_v48 = vpop.permute.xlu1 %1291 }
 0x26e   : > { %8860 = vst [vmem:[#allocation72_spill] sm:$0xff] %v6455_v26  ;;  %8861 = vst [vmem:[#allocation73_spill] sm:$0xff] %v6462_v48  ;;  %v6466_v41 = vpop.permute.xlu0 %1293 }
 0x26f   : > { %8862 = vst [vmem:[#allocation74_spill] sm:$0xff] %v6466_v41  ;;  %v1936_v10 = vcombine.low %v6455_v26, %v6460_v23  ;;  %2735 = vrot.lane.b32.xlu1 %v5869_v15, %s5432_s11  ;;  %8866 = vst [vmem:[#allocation78_spill] sm:$0xff] %v6482_v13 }
 0x270   : > { %2741 = vrot.lane.b32.xlu0 %v5954_v55, %s5432_s11 }
 0x271   : > { %v6474_v45 = vpop.permute.xlu1 %1299  ;;  %v6477_v32 = vrot.slane %v1936_v10, %v5532_v44 }
 0x272   : > { %8863 = vst [vmem:[#allocation75_spill] sm:$0xff] %v6474_v45  ;;  %v6479_v48 = vpop.permute.xlu0 %1297 }
 0x273   : > { %8864 = vst [vmem:[#allocation76_spill] sm:$0xff] %v6477_v32  ;;  %8865 = vst [vmem:[#allocation77_spill] sm:$0xff] %v6479_v48  ;;  %2747 = vrot.lane.b32.xlu1 %v5970_v24, %s5432_s11  ;;  %v8967_v32 = vld [vmem:[#allocation11_spill] sm:$0xff] }
 0x274   : > { %2753 = vrot.lane.b32.xlu0 %v5983_v59, %s5432_s11 }
 0x275   : > { %v6490_v63 = vpop.permute.xlu1 %1303 }
 0x276   : > { %8867 = vst [vmem:[#allocation79_spill] sm:$0xff] %v6490_v63  ;;  %v6492_v45 = vpop.permute.xlu0 %1305 }
 0x277   : > { %8868 = vst [vmem:[#allocation80_spill] sm:$0xff] %v6492_v45  ;;  %2759 = vrot.lane.b32.xlu1 %v5986_v51, %s5432_s11  ;;  %v8873_v45 = vld [vmem:[#allocation5_spill] sm:$0xff] }
 0x278   : > { %2765 = vrot.lane.b32.xlu0 %v6015_v36, %s5432_s11  ;;  %v8874_v48 = vrot.slane %v8873_v45, 4 }
 0x279   : > { %v6498_v10 = vpop.permute.xlu1 %1311 }
 0x27a   : > { %8869 = vst [vmem:[#allocation81_spill] sm:$0xff] %v6498_v10  ;;  %v6500_v18 = vpop.permute.xlu0 %1309  ;;  %v6514_v13 = vsel %vm3677_vm5, %v8874_v48, %v6283_v8  ;;  %v8882_v8 = vrot.slane %v5801_v39, 4 }
 0x27b   : > { %8870 = vst [vmem:[#allocation82_spill] sm:$0xff] %v6500_v18  ;;  %2719 = vrot.lane.b32.xlu1 %v5765_v40, %s5432_s11  ;;  %8875 = vst [vmem:[#allocation5_spill] sm:$0xff] %v6514_v13 }
 0x27c   : > { %4628 = vrot.lane.b32.xlu0 %v5770_v35, %s5433_s12 }
 0x27d   : > { %v6506_v41 = vpop.permute.xlu1 %1315 }
 0x27e   : > { %8871 = vst [vmem:[#allocation83_spill] sm:$0xff] %v6506_v41  ;;  %v6508_v63 = vpop.permute.xlu0 %1317  ;;  %v8878_v41 = vrot.slane %v5783_v47, 4 }
 0x27f   : > { %8872 = vst [vmem:[#allocation84_spill] sm:$0xff] %v6508_v63  ;;  %4630 = vrot.lane.b32.xlu1 %v6514_v13, %s5433_s12 }
 0x280   : > { %4634 = vrot.lane.b32.xlu0 %v5806_v2, %s5433_s12  ;;  %v6528_v63 = vsel %vm3677_vm5, %v8878_v41, %v6291_v1  ;;  %v8886_v1 = vrot.slane %v5841_v30, 4 }
 0x281   : > { %v6520_v10 = vpop.permute.xlu1 %1323  ;;  %8879 = vst [vmem:[#allocation87_spill] sm:$0xff] %v6528_v63 }
 0x282   : > { %8876 = vst [vmem:[#allocation85_spill] sm:$0xff] %v6520_v10  ;;  %v6522_v18 = vpop.permute.xlu0 %1321  ;;  %v6542_v10 = vsel %vm3677_vm5, %v8882_v8, %v6307_v43  ;;  %v8890_v43 = vrot.slane %v5866_v61, 4 }
 0x283   : > { %8877 = vst [vmem:[#allocation86_spill] sm:$0xff] %v6522_v18  ;;  %4636 = vrot.lane.b32.xlu1 %v6528_v63, %s5433_s12  ;;  %8883 = vst [vmem:[#allocation90_spill] sm:$0xff] %v6542_v10 }
 0x284   : > { %4640 = vrot.lane.b32.xlu0 %v5830_v9, %s5433_s12 }
 0x285   : > { %v6534_v48 = vpop.permute.xlu1 %1327 }
 0x286   : > { %8880 = vst [vmem:[#allocation88_spill] sm:$0xff] %v6534_v48  ;;  %v6536_v45 = vpop.permute.xlu0 %1329 }
 0x287   : > { %8881 = vst [vmem:[#allocation89_spill] sm:$0xff] %v6536_v45  ;;  %4642 = vrot.lane.b32.xlu1 %v6542_v10, %s5433_s12  ;;  %v6556_v45 = vsel %vm3677_vm5, %v8886_v1, %v6312_v21  ;;  %v8894_v21 = vrot.slane %v5875_v42, 4 }
 0x288   : > { %4646 = vrot.lane.b32.xlu0 %v5861_v57, %s5433_s12  ;;  %8887 = vst [vmem:[#allocation93_spill] sm:$0xff] %v6556_v45 }
 0x289   : > { %v6548_v47 = vpop.permute.xlu1 %1335 }
 0x28a   : > { %8884 = vst [vmem:[#allocation91_spill] sm:$0xff] %v6548_v47  ;;  %v6550_v41 = vpop.permute.xlu0 %1333  ;;  %v6570_v47 = vsel %vm3677_vm5, %v8890_v43, %v6323_v6  ;;  %v8898_v6 = vrot.slane %v5900_v38, 4 }
 0x28b   : > { %8885 = vst [vmem:[#allocation92_spill] sm:$0xff] %v6550_v41  ;;  %4648 = vrot.lane.b32.xlu1 %v6556_v45, %s5433_s12  ;;  %8891 = vst [vmem:[#allocation96_spill] sm:$0xff] %v6570_v47 }
 0x28c   : > { %4652 = vrot.lane.b32.xlu0 %v5905_v19, %s5433_s12 }
 0x28d   : > { %v6562_v39 = vpop.permute.xlu1 %1772 }
 0x28e   : > { %8888 = vst [vmem:[#allocation94_spill] sm:$0xff] %v6562_v39  ;;  %v6564_v8 = vpop.permute.xlu0 %1770  ;;  %v6584_v39 = vsel %vm3677_vm5, %v8894_v21, %v6326_v27  ;;  %v8902_v27 = vrot.slane %v5936_v49, 4 }
 0x28f   : > { %8889 = vst [vmem:[#allocation95_spill] sm:$0xff] %v6564_v8  ;;  %4654 = vrot.lane.b32.xlu1 %v6570_v47, %s5433_s12  ;;  %8895 = vst [vmem:[#allocation99_spill] sm:$0xff] %v6584_v39 }
 0x290   : > { %4658 = vrot.lane.b32.xlu0 %v5919_v34, %s5433_s12 }
 0x291   : > { %v6576_v30 = vpop.permute.xlu1 %1776 }
 0x292   : > { %8892 = vst [vmem:[#allocation97_spill] sm:$0xff] %v6576_v30  ;;  %v6578_v1 = vpop.permute.xlu0 %1778 }
 0x293   : > { %8893 = vst [vmem:[#allocation98_spill] sm:$0xff] %v6578_v1  ;;  %4660 = vrot.lane.b32.xlu1 %v6584_v39, %s5433_s12  ;;  %v6598_v1 = vsel %vm3677_vm5, %v8898_v6, %v6333_v29 }
 0x294   : > { %4664 = vrot.lane.b32.xlu0 %v5951_v11, %s5433_s12  ;;  %8899 = vst [vmem:[#allocation102_spill] sm:$0xff] %v6598_v1 }
 0x295   : > { %v6590_v61 = vpop.permute.xlu1 %1784 }
 0x296   : > { %8896 = vst [vmem:[#allocation100_spill] sm:$0xff] %v6590_v61  ;;  %v6592_v43 = vpop.permute.xlu0 %1782  ;;  %v6612_v61 = vsel %vm3677_vm5, %v8902_v27, %v6336_v14  ;;  %vm1240_vm5 = vcmask 736256  }
 0x297   : > { %8897 = vst [vmem:[#allocation101_spill] sm:$0xff] %v6592_v43  ;;  %4666 = vrot.lane.b32.xlu1 %v6598_v1, %s5433_s12  ;;  %8903 = vst [vmem:[#allocation105_spill] sm:$0xff] %v6612_v61 }
 0x298   : > { %4670 = vrot.lane.b32.xlu0 %v5966_v5, %s5433_s12 }
 0x299   : > { %v6604_v42 = vpop.permute.xlu1 %1788 }
 0x29a   : > { %8900 = vst [vmem:[#allocation103_spill] sm:$0xff] %v6604_v42  ;;  %v6606_v21 = vpop.permute.xlu0 %1790 }
 0x29b   : > { %8901 = vst [vmem:[#allocation104_spill] sm:$0xff] %v6606_v21  ;;  %4672 = vrot.lane.b32.xlu1 %v6612_v61, %s5433_s12 }
 0x29c   : > { %4149 = vrot.lane.b32.xlu0 %v5770_v35, %s5432_s11 }
 0x29d   : > { %v6618_v38 = vpop.permute.xlu1 %1796 }
 0x29e   : > { %8904 = vst [vmem:[#allocation106_spill] sm:$0xff] %v6618_v38  ;;  %v6620_v6 = vpop.permute.xlu0 %1794 }
 0x29f   : > { %8905 = vst [vmem:[#allocation107_spill] sm:$0xff] %v6620_v6  ;;  %4151 = vrot.lane.b32.xlu1 %v6514_v13, %s5432_s11  ;;  %v8957_v6 = vld [vmem:[#allocation6_spill] sm:$0xff] }
 0x2a0   : > { %4155 = vrot.lane.b32.xlu0 %v5806_v2, %s5432_s11 }
 0x2a1   : > { %v6626_v49 = vpop.permute.xlu1 %1800 }
 0x2a2   : > { %8906 = vst [vmem:[#allocation108_spill] sm:$0xff] %v6626_v49  ;;  %v6628_v27 = vpop.permute.xlu0 %1802 }
 0x2a3   : > { %8907 = vst [vmem:[#allocation109_spill] sm:$0xff] %v6628_v27  ;;  %4157 = vrot.lane.b32.xlu1 %v6528_v63, %s5432_s11 }
 0x2a4   : > { %4161 = vrot.lane.b32.xlu0 %v5830_v9, %s5432_s11 }
 0x2a5   : > { %v6634_v35 = vpop.permute.xlu1 %1808 }
 0x2a6   : > { %8908 = vst [vmem:[#allocation110_spill] sm:$0xff] %v6634_v35  ;;  %v6636_v29 = vpop.permute.xlu0 %1806 }
 0x2a7   : > { %8909 = vst [vmem:[#allocation111_spill] sm:$0xff] %v6636_v29  ;;  %4163 = vrot.lane.b32.xlu1 %v6542_v10, %s5432_s11  ;;  %v8958_v29 = vld [vmem:[#allocation4_spill] sm:$0xff] }
 0x2a8   : > { %4167 = vrot.lane.b32.xlu0 %v5861_v57, %s5432_s11  ;;  %v8959_v30 = vcombine.low %v8957_v6, %v8958_v29  ;;  %v8966_v6 = vld [vmem:[#allocation14_spill] sm:$0xff] }
 0x2a9   : > { %v6642_v2 = vpop.permute.xlu1 %1812 }
 0x2aa   : > { %8910 = vst [vmem:[#allocation112_spill] sm:$0xff] %v6642_v2  ;;  %v6644_v14 = vpop.permute.xlu0 %1814  ;;  %v6800_v42 = vrot.slane %v8959_v30, %v5532_v44  ;;  %v8962_v2 = vld [vmem:[#allocation2_spill] sm:$0xff] }
 0x2ab   : > { %8911 = vst [vmem:[#allocation113_spill] sm:$0xff] %v6644_v14  ;;  %4169 = vrot.lane.b32.xlu1 %v6556_v45, %s5432_s11 }
 0x2ac   : > { %4173 = vrot.lane.b32.xlu0 %v5905_v19, %s5432_s11  ;;  %8960 = vst [vmem:[#allocation6_spill] sm:$0xff] %v6800_v42 }
 0x2ad   : > { %v6650_v9 = vpop.permute.xlu1 %4632 }
 0x2ae   : > { %8912 = vst [vmem:[#allocation114_spill] sm:$0xff] %v6650_v9  ;;  %v6652_v38 = vpop.permute.xlu0 %4638 }
 0x2af   : > { %8913 = vst [vmem:[#allocation115_spill] sm:$0xff] %v6652_v38  ;;  %4175 = vrot.lane.b32.xlu1 %v6570_v47, %s5432_s11 }
 0x2b0   : > { %4179 = vrot.lane.b32.xlu0 %v5919_v34, %s5432_s11 }
 0x2b1   : > { %v6658_v57 = vpop.permute.xlu1 %4644 }
 0x2b2   : > { %8914 = vst [vmem:[#allocation116_spill] sm:$0xff] %v6658_v57  ;;  %v6660_v35 = vpop.permute.xlu0 %4650  ;;  %v8922_v57 = vld [vmem:[#allocation7_spill] sm:$0xff] }
 0x2b3   : > { %8915 = vst [vmem:[#allocation117_spill] sm:$0xff] %v6660_v35  ;;  %4181 = vrot.lane.b32.xlu1 %v6584_v39, %s5432_s11 }
 0x2b4   : > { %4185 = vrot.lane.b32.xlu0 %v5951_v11, %s5432_s11 }
 0x2b5   : > { %v6666_v19 = vpop.permute.xlu1 %4656 }
 0x2b6   : > { %8916 = vst [vmem:[#allocation118_spill] sm:$0xff] %v6666_v19  ;;  %v6668_v9 = vpop.permute.xlu0 %4662 }
 0x2b7   : > { %8917 = vst [vmem:[#allocation119_spill] sm:$0xff] %v6668_v9  ;;  %4187 = vrot.lane.b32.xlu1 %v6598_v1, %s5432_s11 }
 0x2b8   : > { %4191 = vrot.lane.b32.xlu0 %v5966_v5, %s5432_s11 }
 0x2b9   : > { %v6674_v34 = vpop.permute.xlu1 %4668 }
 0x2ba   : > { %8918 = vst [vmem:[#allocation120_spill] sm:$0xff] %v6674_v34  ;;  %v6676_v38 = vpop.permute.xlu0 %4674 }
 0x2bb   : > { %8919 = vst [vmem:[#allocation121_spill] sm:$0xff] %v6676_v38  ;;  %4193 = vrot.lane.b32.xlu1 %v6612_v61, %s5432_s11  ;;  %v8925_v38 = vld [vmem:[#allocation8_spill] sm:$0xff] }
 0x2bc   : > { %3198 = vrot.lane.b32.xlu0 %v5765_v40, %s5433_s12 }
 0x2bd   : > { %v6682_v11 = vpop.permute.xlu1 %4153 }
 0x2be   : > { %8920 = vst [vmem:[#allocation122_spill] sm:$0xff] %v6682_v11  ;;  %v6684_v35 = vpop.permute.xlu0 %4159 }
 0x2bf   : > { %8921 = vst [vmem:[#allocation123_spill] sm:$0xff] %v6684_v35  ;;  %3200 = vrot.lane.b32.xlu1 %v8922_v57, %s5433_s12  ;;  %v8928_v35 = vld [vmem:[#allocation9_spill] sm:$0xff] }
 0x2c0   : > { %3204 = vrot.lane.b32.xlu0 %v5824_v17, %s5433_s12 }
 0x2c1   : > { %v6690_v5 = vpop.permute.xlu1 %4165 }
 0x2c2   : > { %8923 = vst [vmem:[#allocation7_spill] sm:$0xff] %v6690_v5  ;;  %v6692_v9 = vpop.permute.xlu0 %4171 }
 0x2c3   : > { %8924 = vst [vmem:[#allocation124_spill] sm:$0xff] %v6692_v9  ;;  %3206 = vrot.lane.b32.xlu1 %v8925_v38, %s5433_s12  ;;  %v8931_v9 = vld [vmem:[#allocation10_spill] sm:$0xff] }
 0x2c4   : > { %3210 = vrot.lane.b32.xlu0 %v5891_v54, %s5433_s12 }
 0x2c5   : > { %v6698_v19 = vpop.permute.xlu1 %4177 }
 0x2c6   : > { %8926 = vst [vmem:[#allocation8_spill] sm:$0xff] %v6698_v19  ;;  %v6700_v11 = vpop.permute.xlu0 %4183 }
 0x2c7   : > { %8927 = vst [vmem:[#allocation125_spill] sm:$0xff] %v6700_v11  ;;  %3212 = vrot.lane.b32.xlu1 %v8928_v35, %s5433_s12  ;;  %v8934_v11 = vld [vmem:[#allocation13_spill] sm:$0xff] }
 0x2c8   : > { %3216 = vrot.lane.b32.xlu0 %v5973_v37, %s5433_s12 }
 0x2c9   : > { %v6706_v34 = vpop.permute.xlu1 %4189 }
 0x2ca   : > { %8929 = vst [vmem:[#allocation9_spill] sm:$0xff] %v6706_v34  ;;  %v6708_v5 = vpop.permute.xlu0 %4195 }
 0x2cb   : > { %8930 = vst [vmem:[#allocation126_spill] sm:$0xff] %v6708_v5  ;;  %3218 = vrot.lane.b32.xlu1 %v8931_v9, %s5433_s12  ;;  %v8937_v5 = vld [vmem:[#allocation16_spill] sm:$0xff] }
 0x2cc   : > { %3222 = vrot.lane.b32.xlu0 %v6006_v0, %s5433_s12 }
 0x2cd   : > { %v6714_v21 = vpop.permute.xlu1 %3202 }
 0x2ce   : > { %8932 = vst [vmem:[#allocation10_spill] sm:$0xff] %v6714_v21  ;;  %v6716_v19 = vpop.permute.xlu0 %3208 }
 0x2cf   : > { %8933 = vst [vmem:[#allocation127_spill] sm:$0xff] %v6716_v19  ;;  %3224 = vrot.lane.b32.xlu1 %v8934_v11, %s5433_s12  ;;  %v8940_v19 = vld [vmem:[#allocation17_spill] sm:$0xff] }
 0x2d0   : > { %3228 = vrot.lane.b32.xlu0 %v6032_v60, %s5433_s12 }
 0x2d1   : > { %v6722_v27 = vpop.permute.xlu1 %3214 }
 0x2d2   : > { %8935 = vst [vmem:[#allocation13_spill] sm:$0xff] %v6722_v27  ;;  %v6724_v34 = vpop.permute.xlu0 %3220 }
 0x2d3   : > { %8936 = vst [vmem:[#allocation128_spill] sm:$0xff] %v6724_v34  ;;  %3230 = vrot.lane.b32.xlu1 %v8937_v5, %s5433_s12  ;;  %v8943_v34 = vld [vmem:[#allocation19_spill] sm:$0xff] }
 0x2d4   : > { %3234 = vrot.lane.b32.xlu0 %v6039_v62, %s5433_s12 }
 0x2d5   : > { %v6730_v14 = vpop.permute.xlu1 %3226 }
 0x2d6   : > { %8938 = vst [vmem:[#allocation16_spill] sm:$0xff] %v6730_v14  ;;  %v6732_v21 = vpop.permute.xlu0 %3232 }
 0x2d7   : > { %8939 = vst [vmem:[#allocation129_spill] sm:$0xff] %v6732_v21  ;;  %3236 = vrot.lane.b32.xlu1 %v8940_v19, %s5433_s12 }
 0x2d8   : > { %3240 = vrot.lane.b32.xlu0 %v6064_v12, %s5433_s12 }
 0x2d9   : > { %v6738_v8 = vpop.permute.xlu1 %3238 }
 0x2da   : > { %8941 = vst [vmem:[#allocation17_spill] sm:$0xff] %v6738_v8  ;;  %v6740_v27 = vpop.permute.xlu0 %3244 }
 0x2db   : > { %8942 = vst [vmem:[#allocation130_spill] sm:$0xff] %v6740_v27  ;;  %3242 = vrot.lane.b32.xlu1 %v8943_v34, %s5433_s12 }
 0x2dc   : > { %2721 = vrot.lane.b32.xlu0 %v8922_v57, %s5432_s11 }
 0x2dd   : > { %v6746_v43 = vpop.permute.xlu1 %2723 }
 0x2de   : > { %8944 = vst [vmem:[#allocation19_spill] sm:$0xff] %v6746_v43  ;;  %v6748_v14 = vpop.permute.xlu0 %2729 }
 0x2df   : > { %8945 = vst [vmem:[#allocation131_spill] sm:$0xff] %v6748_v14  ;;  %2725 = vrot.lane.b32.xlu1 %v5824_v17, %s5432_s11 }
 0x2e0   : > { %2727 = vrot.lane.b32.xlu0 %v8925_v38, %s5432_s11 }
 0x2e1   : > { %v6754_v21 = vpop.permute.xlu1 %2735 }
 0x2e2   : > { %8946 = vst [vmem:[#allocation132_spill] sm:$0xff] %v6754_v21  ;;  %v6756_v8 = vpop.permute.xlu0 %2741 }
 0x2e3   : > { %8947 = vst [vmem:[#allocation133_spill] sm:$0xff] %v6756_v8  ;;  %2731 = vrot.lane.b32.xlu1 %v5891_v54, %s5432_s11 }
 0x2e4   : > { %2733 = vrot.lane.b32.xlu0 %v8928_v35, %s5432_s11 }
 0x2e5   : > { %v6762_v27 = vpop.permute.xlu1 %2747 }
 0x2e6   : > { %8948 = vst [vmem:[#allocation134_spill] sm:$0xff] %v6762_v27  ;;  %v6764_v43 = vpop.permute.xlu0 %2753 }
 0x2e7   : > { %8949 = vst [vmem:[#allocation135_spill] sm:$0xff] %v6764_v43  ;;  %2737 = vrot.lane.b32.xlu1 %v5973_v37, %s5432_s11 }
 0x2e8   : > { %2739 = vrot.lane.b32.xlu0 %v8931_v9, %s5432_s11 }
 0x2e9   : > { %v6770_v14 = vpop.permute.xlu1 %2759 }
 0x2ea   : > { %8950 = vst [vmem:[#allocation136_spill] sm:$0xff] %v6770_v14  ;;  %v6772_v21 = vpop.permute.xlu0 %2765 }
 0x2eb   : > { %8951 = vst [vmem:[#allocation137_spill] sm:$0xff] %v6772_v21  ;;  %2743 = vrot.lane.b32.xlu1 %v6006_v0, %s5432_s11 }
 0x2ec   : > { %2745 = vrot.lane.b32.xlu0 %v8934_v11, %s5432_s11 }
 0x2ed   : > { %v6778_v8 = vpop.permute.xlu1 %2719 }
 0x2ee   : > { %8952 = vst [vmem:[#allocation138_spill] sm:$0xff] %v6778_v8  ;;  %v6780_v27 = vpop.permute.xlu0 %4628 }
 0x2ef   : > { %8953 = vst [vmem:[#allocation139_spill] sm:$0xff] %v6780_v27  ;;  %2749 = vrot.lane.b32.xlu1 %v6032_v60, %s5432_s11 }
 0x2f0   : > { %2751 = vrot.lane.b32.xlu0 %v8937_v5, %s5432_s11 }
 0x2f1   : > { %v6786_v43 = vpop.permute.xlu1 %4630 }
 0x2f2   : > { %8954 = vst [vmem:[#allocation140_spill] sm:$0xff] %v6786_v43  ;;  %v6788_v14 = vpop.permute.xlu0 %4634  ;;  %v8961_v43 = vld [vmem:[#allocation3_spill] sm:$0xff] }
 0x2f3   : > { %8955 = vst [vmem:[#allocation141_spill] sm:$0xff] %v6788_v14  ;;  %2755 = vrot.lane.b32.xlu1 %v6039_v62, %s5432_s11  ;;  %v8963_v8 = vcombine.low %v8961_v43, %v8962_v2  ;;  %v8968_v43 = vcombine.low %v8966_v6, %v8967_v32 }
 0x2f4   : > { %2757 = vrot.lane.b32.xlu0 %v8940_v19, %s5432_s11 }
 0x2f5   : > { %v6794_v21 = vpop.permute.xlu1 %4636  ;;  %v6810_v48 = vrot.slane %v8963_v8, %v5532_v44 }
 0x2f6   : > { %8956 = vst [vmem:[#allocation142_spill] sm:$0xff] %v6794_v21  ;;  %v6802_v49 = vpop.permute.xlu0 %4640 }
 0x2f7   : > { %2761 = vrot.lane.b32.xlu1 %v6064_v12, %s5432_s11  ;;  %8964 = vst [vmem:[#allocation4_spill] sm:$0xff] %v6810_v48  ;;  %v971_v29 = vcombine.high %v6810_v48, %v6800_v42  ;;  %v8970_v48 = vcombine.high %v8966_v6, %v8967_v32  ;;  %v8971_v42 = vld [vmem:[#allocation15_spill] sm:$0xff]  ;;  %v8976_v32 = vld [vmem:[#allocation18_spill] sm:$0xff] }
 0x2f8   : > { %2763 = vrot.lane.b32.xlu0 %v8943_v34, %s5432_s11 }
 0x2f9   : > { %v6814_v21 = vpop.permute.xlu1 %4642 }
 0x2fa   : > { %8965 = vst [vmem:[#allocation3_spill] sm:$0xff] %v6814_v21  ;;  %v6818_v30 = vpop.permute.xlu0 %4646 }
 0x2fb   : > { %1165 = vrot.lane.b32.xlu1 %v971_v29, %s5434_s13  ;;  %v8972_v29 = vld [vmem:[#allocation12_spill] sm:$0xff] }
 0x2fc   : > { %1169 = vrot.lane.b32.xlu0 %v8968_v43, %s5435_s14  ;;  %v8973_v21 = vcombine.low %v8971_v42, %v8972_v29  ;;  %v8975_v43 = vcombine.high %v8971_v42, %v8972_v29  ;;  %v8981_v42 = vcombine.low %v6131_v3, %v6139_v22  ;;  %v4700_v29 = vcombine.low %v6780_v27, %v6802_v49 }
 0x2fd   : > { %v6825_v8 = vpop.permute.xlu1 %4648 }
 0x2fe   : > { %8969 = vst [vmem:[#allocation2_spill] sm:$0xff] %v6825_v8  ;;  %v6827_v2 = vpop.permute.xlu0 %4652 }
 0x2ff   : > { %1173 = vrot.lane.b32.xlu1 %v8970_v48, %s5436_s15  ;;  %v8977_v48 = vld [vmem:[#allocation20_spill] sm:$0xff] }
 0x300   : > { %1177 = vrot.lane.b32.xlu0 %v8973_v21, %s5437_s16  ;;  %v8978_v6 = vcombine.low %v8976_v32, %v8977_v48  ;;  %v4716_v21 = vcombine.low %v6788_v14, %v6818_v30  ;;  %v2608_v14 = vcombine.low %v5983_v59, %v6015_v36  ;;  %v2592_v59 = vcombine.low %v5794_v58, %v5954_v55 }
 0x301   : > { %v6837_v18 = vpop.permute.xlu1 %4654  ;;  %v2600_v36 = vcombine.low %v5970_v24, %v5986_v51  ;;  %v8988_v51 = vcombine.high %v6134_v16, %v6142_v4 }
 0x302   : > { %8974 = vst [vmem:[#allocation14_spill] sm:$0xff] %v6837_v18  ;;  %v6839_v41 = vpop.permute.xlu0 %4658  ;;  %v8980_v18 = vcombine.high %v8976_v32, %v8977_v48  ;;  %v8983_v48 = vcombine.high %v6131_v3, %v6139_v22  ;;  %v2615_v58 = vrot.slane %v2608_v14, %v5524_v31 }
 0x303   : > { %1181 = vrot.lane.b32.xlu1 %v8975_v43, %s5438_s17 }
 0x304   : > { %1185 = vrot.lane.b32.xlu0 %v8978_v6, %s5439_s20 }
 0x305   : > { %v6849_v8 = vpop.permute.xlu1 %4660 }
 0x306   : > { %8979 = vst [vmem:[#allocation11_spill] sm:$0xff] %v6849_v8  ;;  %v6851_v26 = vpop.permute.xlu0 %4664 }
 0x307   : > { %1189 = vrot.lane.b32.xlu1 %v8980_v18, %s5432_s11  ;;  %v4732_v43 = vcombine.low %v6827_v2, %v6851_v26  ;;  %v6874_v18 = vrot.slane %v4716_v21, %v5524_v31  ;;  %v6891_v21 = vrot.slane %v4700_v29, %v5524_v31  ;;  %v8989_v29 = vld [vmem:[#allocation21_spill] sm:$0xff] }
 0x308   : > { %1193 = vrot.lane.b32.xlu0 %v8981_v42, %s5428_s9  ;;  %v8984_v42 = vcombine.low %v6134_v16, %v6142_v4 }
 0x309   : > { %v6867_v6 = vpop.permute.xlu1 %4666  ;;  %8982 = vst [vmem:[#allocation15_spill] sm:$0xff] %v6874_v18  ;;  %8985 = vst [vmem:[#allocation12_spill] sm:$0xff] %v6891_v21  ;;  %v6894_v27 = vrot.slane %v4732_v43, %v5524_v31  ;;  %v4764_v24 = vcombine.low %v6891_v21, %v6874_v18  ;;  %v8990_v43 = vcombine.low %v6147_v7, %v8989_v29 }
 0x30a   : > { %v6869_v8 = vpop.permute.xlu0 %4670 }
 0x30b   : > { %v4748_v32 = vcombine.low %v6839_v41, %v6869_v8  ;;  %1197 = vrot.lane.b32.xlu1 %v8983_v48, %s5440_s21  ;;  %8986 = vst [vmem:[#allocation18_spill] sm:$0xff] %v6894_v27 }
 0x30c   : > { %1201 = vrot.lane.b32.xlu0 %v8984_v42, %s5441_s22  ;;  %v2584_v42 = vcombine.low %v5757_v33, %v5869_v15  ;;  %v2599_v33 = vrot.slane %v2592_v59, %v5524_v31  ;;  %v2607_v15 = vrot.slane %v2600_v36, %v5524_v31  ;;  %v6933_v59 = vrot.slane %v4764_v24, %v5532_v44  ;;  %v8995_v36 = vld [vmem:[#allocation22_spill] sm:$0xff] }
 0x30d   : > { %v6897_v3 = vrot.slane %v4748_v32, %v5524_v31  ;;  %v6899_v22 = vpop.permute.xlu1 %4672  ;;  %v2329_v24 = vcombine.high %v5824_v17, %v5973_v37 }
 0x30e   : > { %v6901_v48 = vpop.permute.xlu0 %4149  ;;  %v2591_v16 = vrot.slane %v2584_v42, %v5524_v31  ;;  %v2624_v4 = vcombine.low %v2607_v15, %v2615_v58  ;;  %8994 = vst [vmem:[#allocation144_spill] sm:$0xff] %v6933_v59 }
 0x30f   : > { %8987 = vst [vmem:[#allocation20_spill] sm:$0xff] %v6897_v3  ;;  %v4796_v55 = vcombine.low %v6894_v27, %v6897_v3  ;;  %1205 = vrot.lane.b32.xlu1 %v8988_v51, %s5442_s23  ;;  %v8993_v51 = vcombine.high %v6147_v7, %v8989_v29  ;;  %v2361_v27 = vcombine.high %v6032_v60, %v6064_v12  ;;  %v8999_v12 = vld [vmem:[#allocation24_spill] sm:$0xff] }
 0x310   : > { %1209 = vrot.lane.b32.xlu0 %v8990_v43, %s5443_s24  ;;  %v8996_v43 = vld [vmem:[#allocation23_spill] sm:$0xff]  ;;  %v2631_v7 = vrot.slane %v2624_v4, %v5532_v44  ;;  %v2345_v29 = vcombine.high %v6006_v0, %v6039_v62  ;;  %v2313_v4 = vcombine.high %v5765_v40, %v5891_v54  ;;  %v9002_v62 = vld [vmem:[#allocation26_spill] sm:$0xff]  ;;  %v9003_v0 = vld [vmem:[#allocation28_spill] sm:$0xff]  ;;  %v2497_v3 = vcombine.high %v8937_v5, %v8943_v34 }
 0x311   : > { %v6920_v14 = vpop.permute.xlu1 %4151  ;;  %v6923_v32 = vrot.slane %v4796_v55, %v5532_v44  ;;  %v8997_v18 = vcombine.low %v8995_v36, %v8996_v43  ;;  %v2616_v55 = vcombine.low %v2591_v16, %v2599_v33  ;;  %v8998_v60 = vcombine.high %v8995_v36, %v8996_v43  ;;  %v9005_v40 = vld [vmem:[#allocation27_spill] sm:$0xff] }
 0x312   : > { %8991 = vst [vmem:[#allocation21_spill] sm:$0xff] %v6920_v14  ;;  %v6925_v21 = vpop.permute.xlu0 %4155  ;;  %v2375_v17 = vrot.slane %v2361_v27, %v5524_v31  ;;  %v2343_v43 = vrot.slane %v2329_v24, %v5524_v31  ;;  %v9006_v54 = vld [vmem:[#allocation31_spill] sm:$0xff] }
 0x313   : > { %8992 = vst [vmem:[#allocation143_spill] sm:$0xff] %v6923_v32  ;;  %1213 = vrot.lane.b32.xlu1 %v8993_v51, %s5444_s25  ;;  %v2623_v16 = vrot.slane %v2616_v55, %v5532_v44  ;;  %v2409_v51 = vcombine.high %v9003_v0, %v9002_v62  ;;  %v2377_v27 = vcombine.high %v9006_v54, %v9005_v40 }
 0x314   : > { %1217 = vrot.lane.b32.xlu0 %v8997_v18, %s5433_s12  ;;  %v9000_v18 = vld [vmem:[#allocation25_spill] sm:$0xff]  ;;  %v2327_v62 = vrot.slane %v2313_v4, %v5524_v31  ;;  %v2441_v40 = vcombine.high %v6268_v46, %v6260_v20 }
 0x315   : > { %v6941_v42 = vpop.permute.xlu1 %4157  ;;  %v9001_v33 = vcombine.low %v8999_v12, %v9000_v18  ;;  %v2633_v36 = vcombine.high %v2623_v16, %v2631_v7  ;;  %v9004_v55 = vcombine.high %v8999_v12, %v9000_v18  ;;  %v2632_v24 = vcombine.low %v2623_v16, %v2631_v7 }
 0x316   : > { %v6945_v15 = vpop.permute.xlu0 %4161  ;;  %v2464_v12 = vcombine.low %v8925_v38, %v8931_v9  ;;  %v2480_v18 = vcombine.low %v8934_v11, %v8940_v19  ;;  %v2391_v4 = vrot.slane %v2377_v27, %v5532_v44  ;;  %v2448_v7 = vcombine.low %v8922_v57, %v8928_v35 }
 0x317   : > { %1221 = vrot.lane.b32.xlu1 %v8998_v60, %s5445_s26  ;;  %v2359_v60 = vrot.slane %v2345_v29, %v5524_v31  ;;  %v2423_v29 = vrot.slane %v2409_v51, %v5532_v44  ;;  %v2449_v51 = vcombine.high %v8922_v57, %v8928_v35  ;;  %v2393_v57 = vcombine.high %v2327_v62, %v2343_v43 }
 0x318   : > { %1225 = vrot.lane.b32.xlu0 %v9001_v33, %s5427_s8  ;;  %v2496_v33 = vcombine.low %v8937_v5, %v8943_v34  ;;  %v2488_v27 = vrot.slane %v2480_v18, %v5524_v31 }
 0x319   : > { %v6964_v37 = vpop.permute.xlu1 %4163  ;;  %v2424_v59 = vcombine.low %v2359_v60, %v2375_v17  ;;  %v2442_v32 = vcombine.low %v2391_v4, %v2423_v29  ;;  %v2425_v46 = vcombine.high %v2359_v60, %v2375_v17  ;;  %v2465_v60 = vcombine.high %v8925_v38, %v8931_v9 }
 0x31a   : > { %v6968_v58 = vpop.permute.xlu0 %4167  ;;  %v2504_v16 = vrot.slane %v2496_v33, %v5524_v31  ;;  %v2443_v33 = vcombine.high %v2391_v4, %v2423_v29 }
 0x31b   : > { %1229 = vrot.lane.b32.xlu1 %v9004_v55, %s5446_s27  ;;  %v2432_v20 = vrot.slane %v2424_v59, %v5532_v44  ;;  %v2456_v59 = vrot.slane %v2448_v7, %v5524_v31  ;;  %v2439_v5 = vrot.slane %v2425_v46, %v5532_v44  ;;  %v4237_v38 = vcombine.low %v6925_v21, %v6968_v58 }
 0x31c   : > { %2699 = vrot.lane.b32.xlu0 %v2633_v36, %s5446_s27  ;;  %v2392_v36 = vcombine.low %v2327_v62, %v2343_v43  ;;  %v2544_v17 = vcombine.low %v2488_v27, %v2504_v16  ;;  %v4238_v9 = vcombine.high %v6925_v21, %v6968_v58  ;;  %v2407_v46 = vrot.slane %v2393_v57, %v5532_v44 }
 0x31d   : > { %v6982_v0 = vpop.permute.xlu1 %4169  ;;  %v2545_v4 = vcombine.high %v2488_v27, %v2504_v16  ;;  %v7051_v16 = vrot.slane %v4237_v38, %v5524_v31 }
 0x31e   : > { %v6989_v55 = vpop.permute.xlu0 %4173  ;;  %v2400_v35 = vrot.slane %v2392_v36, %v5532_v44  ;;  %v2552_v18 = vrot.slane %v2544_v17, %v5532_v44  ;;  %v7041_v36 = vrot.slane %v2465_v60, %v5524_v31  ;;  %v7054_v27 = vrot.slane %v4238_v9, %v5524_v31 }
 0x31f   : > { %2695 = vrot.lane.b32.xlu1 %v2632_v24, %s5427_s8  ;;  %v2472_v24 = vrot.slane %v2464_v12, %v5524_v31 }
 0x320   : > { %2635 = vrot.lane.b32.xlu0 %v2441_v40, %s5434_s13  ;;  %v2481_v40 = vcombine.high %v8934_v11, %v8940_v19  ;;  %v2444_v34 = vcombine.low %v2400_v35, %v2432_v20  ;;  %v7020_v19 = vrot.slane %v2449_v51, %v5524_v31  ;;  %v7023_v11 = vrot.slane %v2497_v3, %v5524_v31 }
 0x321   : > { %v7001_v54 = vpop.permute.xlu1 %4175  ;;  %v2445_v43 = vcombine.high %v2400_v35, %v2432_v20  ;;  %v2512_v62 = vcombine.low %v2456_v59, %v2472_v24  ;;  %v4221_v3 = vcombine.low %v6901_v48, %v6945_v15  ;;  %v4222_v20 = vcombine.high %v6901_v48, %v6945_v15  ;;  %9007 = vst [vmem:[#allocation22_spill] sm:$0xff] %v7054_v27 }
 0x322   : > { %v4180_v14 = vpop.permute.xlu0 %4179  ;;  %v7026_v29 = vrot.slane %v2481_v40, %v5524_v31  ;;  %v2446_v51 = vcombine.low %v2407_v46, %v2439_v5  ;;  %v2447_v40 = vcombine.high %v2407_v46, %v2439_v5  ;;  %v2513_v48 = vcombine.high %v2456_v59, %v2472_v24 }
 0x323   : > { %2639 = vrot.lane.b32.xlu1 %v2442_v32, %s5435_s14  ;;  %v2520_v35 = vrot.slane %v2512_v62, %v5532_v44  ;;  %v7061_v60 = vrot.slane %v4222_v20, %v5524_v31  ;;  %v2559_v59 = vrot.slane %v2545_v4, %v5532_v44  ;;  %v3926_v62 = vcombine.low %v6584_v39, %v6612_v61  ;;  %v9020_v61 = vld [vmem:[#allocation55_spill] sm:$0xff] }
 0x324   : > { %2643 = vrot.lane.b32.xlu0 %v2443_v33, %s5436_s15  ;;  %v2560_v15 = vcombine.low %v7026_v29, %v7023_v11  ;;  %v2527_v46 = vrot.slane %v2513_v48, %v5532_v44  ;;  %v2561_v48 = vcombine.high %v7026_v29, %v7023_v11  ;;  %v2529_v11 = vcombine.high %v7020_v19, %v7041_v36 }
 0x325   : > { %v7016_v12 = vpop.permute.xlu1 %4181  ;;  %9008 = vst [vmem:[#allocation23_spill] sm:$0xff] %v7061_v60  ;;  %v2576_v24 = vcombine.low %v2520_v35, %v2552_v18  ;;  %v2577_v9 = vcombine.high %v2520_v35, %v2552_v18  ;;  %v4302_v4 = vcombine.high %v7061_v60, %v7054_v27  ;;  %v3894_v18 = vcombine.low %v6528_v63, %v6556_v45 }
 0x326   : > { %v4186_v32 = vpop.permute.xlu0 %4185  ;;  %v2578_v35 = vcombine.low %v2527_v46, %v2559_v59 }
 0x327   : > { %2647 = vrot.lane.b32.xlu1 %v2444_v34, %s5437_s16  ;;  %v4253_v21 = vcombine.low %v6989_v55, %v4186_v32  ;;  %v4254_v58 = vcombine.high %v6989_v55, %v4186_v32  ;;  %v7058_v55 = vrot.slane %v4221_v3, %v5524_v31  ;;  %v2528_v3 = vcombine.low %v7020_v19, %v7041_v36 }
 0x328   : > { %2651 = vrot.lane.b32.xlu0 %v2445_v43, %s5438_s17  ;;  %v7121_v29 = vrot.slane %v4302_v4, %v5532_v44 }
 0x329   : > { %v7045_v7 = vpop.permute.xlu1 %4187  ;;  %v7066_v34 = vrot.slane %v4253_v21, %v5524_v31  ;;  %v7069_v5 = vrot.slane %v4254_v58, %v5524_v31  ;;  %v4285_v20 = vcombine.low %v7058_v55, %v7051_v16 }
 0x32a   : > { %v4192_v33 = vpop.permute.xlu0 %4191 }
 0x32b   : > { %v4269_v57 = vcombine.low %v4180_v14, %v4192_v33  ;;  %v4270_v17 = vcombine.high %v4180_v14, %v4192_v33  ;;  %2655 = vrot.lane.b32.xlu1 %v2446_v51, %s5439_s20  ;;  %9009 = vst [vmem:[#allocation24_spill] sm:$0xff] %v7069_v5  ;;  %v3910_v51 = vcombine.low %v6570_v47, %v6598_v1 }
 0x32c   : > { %2659 = vrot.lane.b32.xlu0 %v2447_v40, %s5432_s11  ;;  %v2568_v33 = vrot.slane %v2560_v15, %v5532_v44  ;;  %v3934_v47 = vrot.slane %v3926_v62, %v5524_v31  ;;  %v2579_v15 = vcombine.high %v2527_v46, %v2559_v59  ;;  %v2536_v1 = vrot.slane %v2528_v3, %v5532_v44 }
 0x32d   : > { %v7072_v14 = vrot.slane %v4269_v57, %v5524_v31  ;;  %v7075_v32 = vrot.slane %v4270_v17, %v5524_v31  ;;  %v7077_v43 = vpop.permute.xlu1 %4193  ;;  %v3918_v62 = vrot.slane %v3910_v51, %v5524_v31  ;;  %v2575_v3 = vrot.slane %v2561_v48, %v5532_v44 }
 0x32e   : > { %v7081_v38 = vpop.permute.xlu0 %3198  ;;  %v2580_v46 = vcombine.low %v2536_v1, %v2568_v33  ;;  %v2543_v51 = vrot.slane %v2529_v11, %v5532_v44  ;;  %v9014_v11 = vld [vmem:[#allocation30_spill] sm:$0xff] }
 0x32f   : > { %9010 = vst [vmem:[#allocation25_spill] sm:$0xff] %v7075_v32  ;;  %v4317_v21 = vcombine.low %v7066_v34, %v7072_v14  ;;  %v4334_v58 = vcombine.high %v7069_v5, %v7075_v32  ;;  %2663 = vrot.lane.b32.xlu1 %v2576_v24, %s5428_s9  ;;  %v3878_v24 = vcombine.low %v6514_v13, %v6542_v10 }
 0x330   : > { %2667 = vrot.lane.b32.xlu0 %v2577_v9, %s5440_s21  ;;  %v2582_v13 = vcombine.low %v2543_v51, %v2575_v3  ;;  %v2583_v10 = vcombine.high %v2543_v51, %v2575_v3  ;;  %v3975_v39 = vcombine.high %v3918_v62, %v3934_v47  ;;  %v9016_v3 = vld [vmem:[#allocation29_spill] sm:$0xff] }
 0x331   : > { %v7101_v40 = vpop.permute.xlu1 %3200  ;;  %v7106_v57 = vrot.slane %v4334_v58, %v5532_v44  ;;  %v7109_v17 = vrot.slane %v4317_v21, %v5532_v44  ;;  %v7124_v21 = vrot.slane %v4285_v20, %v5532_v44  ;;  %v3902_v58 = vrot.slane %v3894_v18, %v5524_v31 }
 0x332   : > { %9011 = vst [vmem:[#allocation26_spill] sm:$0xff] %v7101_v40  ;;  %v7114_v9 = vpop.permute.xlu0 %3204  ;;  %v3886_v20 = vrot.slane %v3878_v24, %v5524_v31  ;;  %v2581_v18 = vcombine.high %v2536_v1, %v2568_v33  ;;  %v3877_v24 = vcombine.high %v6296_v25, %v6286_v50 }
 0x333   : > { %9012 = vst [vmem:[#allocation28_spill] sm:$0xff] %v7109_v17  ;;  %2671 = vrot.lane.b32.xlu1 %v2578_v35, %s5441_s22  ;;  %v3974_v35 = vcombine.low %v3918_v62, %v3934_v47  ;;  %v9024_v62 = vld [vmem:[#allocation52_spill] sm:$0xff] }
 0x334   : > { %2675 = vrot.lane.b32.xlu0 %v2579_v15, %s5442_s23  ;;  %v3942_v15 = vcombine.low %v3886_v20, %v3902_v58  ;;  %v3943_v50 = vcombine.high %v3886_v20, %v3902_v58 }
 0x335   : > { %v7129_v59 = vpop.permute.xlu1 %3206  ;;  %v3982_v36 = vrot.slane %v3974_v35, %v5532_v44  ;;  %v9017_v35 = vld [vmem:[#allocation32_spill] sm:$0xff] }
 0x336   : > { %v7137_v4 = vpop.permute.xlu0 %3210  ;;  %v3950_v1 = vrot.slane %v3942_v15, %v5532_v44  ;;  %v9019_v15 = vld [vmem:[#allocation56_spill] sm:$0xff] }
 0x337   : > { %2679 = vrot.lane.b32.xlu1 %v2580_v46, %s5443_s24  ;;  %v9015_v46 = vld [vmem:[#allocation33_spill] sm:$0xff]  ;;  %v1394_v60 = vcombine.high %v9020_v61, %v9019_v15  ;;  %v3989_v61 = vrot.slane %v3975_v39, %v5532_v44  ;;  %v9028_v15 = vld [vmem:[#allocation59_spill] sm:$0xff] }
 0x338   : > { %2683 = vrot.lane.b32.xlu0 %v2581_v18, %s5444_s25  ;;  %v3839_v18 = vcombine.high %v9015_v46, %v9014_v11  ;;  %v4006_v45 = vcombine.low %v3950_v1, %v3982_v36  ;;  %v9022_v11 = vld [vmem:[#allocation36_spill] sm:$0xff]  ;;  %v9023_v46 = vld [vmem:[#allocation37_spill] sm:$0xff] }
 0x339   : > { %v7142_v48 = vpop.permute.xlu1 %3212  ;;  %v3871_v27 = vcombine.high %v9023_v46, %v9022_v11  ;;  %v1408_v20 = vrot.slane %v1394_v60, %v5524_v31 }
 0x33a   : > { %9013 = vst [vmem:[#allocation27_spill] sm:$0xff] %v7142_v48  ;;  %v3217_v19 = vpop.permute.xlu0 %3216  ;;  %v3853_v47 = vrot.slane %v3839_v18, %v5532_v44  ;;  %v9029_v18 = vld [vmem:[#allocation60_spill] sm:$0xff] }
 0x33b   : > { %2687 = vrot.lane.b32.xlu1 %v2582_v13, %s5433_s12  ;;  %v3807_v13 = vcombine.high %v9017_v35, %v9016_v3  ;;  %v9026_v3 = vld [vmem:[#allocation53_spill] sm:$0xff]  ;;  %v9027_v35 = vld [vmem:[#allocation51_spill] sm:$0xff]  ;;  %v1458_v11 = vcombine.high %v9029_v18, %v9028_v15  ;;  %v3286_v60 = vcombine.low %v7114_v9, %v3217_v19  ;;  %v3287_v15 = vcombine.high %v7114_v9, %v3217_v19 }
 0x33c   : > { %2691 = vrot.lane.b32.xlu0 %v2583_v10, %s5445_s26  ;;  %v9018_v10 = vld [vmem:[#allocation54_spill] sm:$0xff]  ;;  %v1362_v32 = vcombine.high %v9027_v35, %v9026_v3 }
 0x33d   : > { %v7148_v33 = vpop.permute.xlu1 %3218  ;;  %v1410_v51 = vcombine.high %v9018_v10, %v6374_v53  ;;  %v4007_v10 = vcombine.high %v3950_v1, %v3982_v36  ;;  %v9030_v1 = vld [vmem:[#allocation57_spill] sm:$0xff] }
 0x33e   : > { %v3223_v63 = vpop.permute.xlu0 %3222 }
 0x33f   : > { %4089 = vrot.lane.b32.xlu1 %v3877_v24, %s5432_s11  ;;  %v9025_v24 = vld [vmem:[#allocation50_spill] sm:$0xff]  ;;  %v1424_v58 = vrot.slane %v1410_v51, %v5524_v31 }
 0x340   : > { %4093 = vrot.lane.b32.xlu0 %v4006_v45, %s5428_s9  ;;  %v1378_v5 = vcombine.high %v9025_v24, %v9024_v62  ;;  %v3821_v45 = vrot.slane %v3807_v13, %v5532_v44  ;;  %v3957_v62 = vrot.slane %v3943_v50, %v5532_v44  ;;  %v9031_v13 = vld [vmem:[#allocation58_spill] sm:$0xff]  ;;  %v3270_v50 = vcombine.low %v7081_v38, %v7137_v4 }
 0x341   : > { %v7162_v25 = vpop.permute.xlu1 %3224  ;;  %v1426_v3 = vcombine.high %v9031_v13, %v9030_v1  ;;  %v1474_v9 = vcombine.high %v1408_v20, %v1424_v58 }
 0x342   : > { %9021 = vst [vmem:[#allocation31_spill] sm:$0xff] %v7162_v25  ;;  %v3229_v53 = vpop.permute.xlu0 %3228  ;;  %v3872_v36 = vcombine.low %v3821_v45, %v3853_v47  ;;  %v1392_v39 = vrot.slane %v1378_v5, %v5524_v31  ;;  %v4008_v35 = vcombine.low %v3957_v62, %v3989_v61  ;;  %v3271_v5 = vcombine.high %v7081_v38, %v7137_v4 }
 0x343   : > { %4065 = vrot.lane.b32.xlu1 %v3871_v27, %s5434_s13  ;;  %v1376_v27 = vrot.slane %v1362_v32, %v5524_v31  ;;  %v1472_v32 = vrot.slane %v1458_v11, %v5532_v44  ;;  %v3873_v46 = vcombine.high %v3821_v45, %v3853_v47  ;;  %v1440_v48 = vrot.slane %v1426_v3, %v5532_v44 }
 0x344   : > { %4097 = vrot.lane.b32.xlu0 %v4007_v10, %s5440_s21  ;;  %v1473_v10 = vcombine.low %v1408_v20, %v1424_v58  ;;  %v7199_v25 = vrot.slane %v3286_v60, %v5524_v31  ;;  %v7202_v38 = vrot.slane %v3287_v15, %v5524_v31  ;;  %v7209_v11 = vrot.slane %v3271_v5, %v5524_v31 }
 0x345   : > { %v7180_v24 = vpop.permute.xlu1 %3230  ;;  %v1441_v40 = vcombine.low %v1376_v27, %v1392_v39  ;;  %v1491_v47 = vcombine.low %v1440_v48, %v1472_v32 }
 0x346   : > { %v3235_v51 = vpop.permute.xlu0 %3234  ;;  %9033 = vst [vmem:[#allocation33_spill] sm:$0xff] %v7199_v25  ;;  %9034 = vst [vmem:[#allocation29_spill] sm:$0xff] %v7202_v38 }
 0x347   : > { %4069 = vrot.lane.b32.xlu1 %v3872_v36, %s5435_s14  ;;  %v3302_v18 = vcombine.low %v3223_v63, %v3235_v51  ;;  %v3303_v1 = vcombine.high %v3223_v63, %v3235_v51  ;;  %v4009_v36 = vcombine.high %v3957_v62, %v3989_v61  ;;  %v7206_v63 = vrot.slane %v3270_v50, %v5524_v31 }
 0x348   : > { %4101 = vrot.lane.b32.xlu0 %v4008_v35, %s5441_s22  ;;  %9036 = vst [vmem:[#allocation54_spill] sm:$0xff] %v7209_v11  ;;  %v1481_v61 = vrot.slane %v1473_v10, %v5532_v44  ;;  %v1442_v62 = vcombine.high %v1376_v27, %v1392_v39  ;;  %v1490_v51 = vcombine.high %v6422_v56, %v6415_v52  ;;  %v9042_v39 = vld [vmem:[#allocation69_spill] sm:$0xff]  ;;  %v9043_v27 = vld [vmem:[#allocation67_spill] sm:$0xff] }
 0x349   : > { %v7195_v13 = vpop.permute.xlu1 %3236  ;;  %9035 = vst [vmem:[#allocation32_spill] sm:$0xff] %v7206_v63  ;;  %v7214_v45 = vrot.slane %v3302_v18, %v5524_v31  ;;  %v7217_v58 = vrot.slane %v3303_v1, %v5524_v31  ;;  %v1449_v60 = vrot.slane %v1441_v40, %v5532_v44  ;;  %v3334_v15 = vcombine.low %v7206_v63, %v7199_v25  ;;  %v9044_v1 = vld [vmem:[#allocation68_spill] sm:$0xff]  ;;  %v9061_v25 = vld [vmem:[#allocation78_spill] sm:$0xff] }
 0x34a   : > { %9032 = vst [vmem:[#allocation30_spill] sm:$0xff] %v7195_v13  ;;  %v3241_v19 = vpop.permute.xlu0 %3240  ;;  %v3351_v10 = vcombine.high %v7209_v11, %v7202_v38  ;;  %v1873_v18 = vcombine.high %v9043_v27, %v9042_v39  ;;  %v1488_v40 = vrot.slane %v1474_v9, %v5532_v44  ;;  %v1492_v56 = vcombine.high %v1440_v48, %v1472_v32  ;;  %v9049_v27 = vld [vmem:[#allocation61_spill] sm:$0xff]  ;;  %v9050_v11 = vld [vmem:[#allocation64_spill] sm:$0xff]  ;;  %v9051_v38 = vld [vmem:[#allocation62_spill] sm:$0xff] }
 0x34b   : > { %v3318_v4 = vcombine.low %v3229_v53, %v3241_v19  ;;  %v3319_v35 = vcombine.high %v3229_v53, %v3241_v19  ;;  %4073 = vrot.lane.b32.xlu1 %v3873_v46, %s5436_s15  ;;  %9037 = vst [vmem:[#allocation56_spill] sm:$0xff] %v7214_v45  ;;  %9038 = vst [vmem:[#allocation55_spill] sm:$0xff] %v7217_v58  ;;  %v1889_v19 = vcombine.high %v9044_v1, %v6448_v28 }
 0x34c   : > { %4105 = vrot.lane.b32.xlu0 %v4009_v36, %s5442_s23  ;;  %v1456_v39 = vrot.slane %v1442_v62, %v5532_v44  ;;  %v1857_v28 = vcombine.high %v9051_v38, %v9050_v11  ;;  %v7264_v1 = vrot.slane %v3351_v10, %v5532_v44  ;;  %v9054_v62 = vld [vmem:[#allocation72_spill] sm:$0xff]  ;;  %v1494_v10 = vcombine.high %v1449_v60, %v1481_v61  ;;  %v9059_v38 = vld [vmem:[#allocation86_spill] sm:$0xff] }
 0x34d   : > { %v7220_v53 = vrot.slane %v3318_v4, %v5524_v31  ;;  %v7223_v46 = vrot.slane %v3319_v35, %v5524_v31  ;;  %v7225_v20 = vpop.permute.xlu1 %3242  ;;  %v1493_v4 = vcombine.low %v1449_v60, %v1481_v61  ;;  %v1903_v32 = vrot.slane %v1889_v19, %v5524_v31  ;;  %v9057_v19 = vld [vmem:[#allocation70_spill] sm:$0xff]  ;;  %v9060_v11 = vld [vmem:[#allocation76_spill] sm:$0xff] }
 0x34e   : > { %v7227_v3 = vpop.permute.xlu0 %2721  ;;  %9052 = vst [vmem:[#allocation57_spill] sm:$0xff] %v7264_v1  ;;  %v1495_v48 = vcombine.low %v1456_v39, %v1488_v40  ;;  %v1969_v61 = vcombine.high %v9061_v25, %v9060_v11 }
 0x34f   : > { %9039 = vst [vmem:[#allocation52_spill] sm:$0xff] %v7220_v53  ;;  %9040 = vst [vmem:[#allocation50_spill] sm:$0xff] %v7223_v46  ;;  %v3366_v50 = vcombine.low %v7214_v45, %v7220_v53  ;;  %v3383_v5 = vcombine.high %v7217_v58, %v7223_v46  ;;  %1688 = vrot.lane.b32.xlu1 %v1491_v47, %s5435_s14 }
 0x350   : > { %9041 = vst [vmem:[#allocation53_spill] sm:$0xff] %v7227_v3  ;;  %1684 = vrot.lane.b32.xlu0 %v1490_v51, %s5434_s13  ;;  %v9048_v51 = vld [vmem:[#allocation63_spill] sm:$0xff] }
 0x351   : > { %v7247_v36 = vpop.permute.xlu1 %2725  ;;  %v7250_v35 = vrot.slane %v3383_v5, %v5532_v44  ;;  %v7253_v52 = vrot.slane %v3366_v50, %v5532_v44  ;;  %v1841_v9 = vcombine.high %v9049_v27, %v9048_v51  ;;  %v7267_v5 = vrot.slane %v3334_v15, %v5532_v44 }
 0x352   : > { %v7255_v47 = vpop.permute.xlu0 %2727  ;;  %v1887_v50 = vrot.slane %v1873_v18, %v5524_v31  ;;  %v1937_v51 = vcombine.high %v9054_v62, %v6460_v23  ;;  %v9058_v62 = vld [vmem:[#allocation92_spill] sm:$0xff] }
 0x353   : > { %9045 = vst [vmem:[#allocation51_spill] sm:$0xff] %v7250_v35  ;;  %9046 = vst [vmem:[#allocation59_spill] sm:$0xff] %v7253_v52  ;;  %1696 = vrot.lane.b32.xlu1 %v1493_v4, %s5437_s16  ;;  %v1855_v18 = vrot.slane %v1841_v9, %v5524_v31  ;;  %v9056_v4 = vld [vmem:[#allocation71_spill] sm:$0xff]  ;;  %v1545_v46 = vcombine.low %v9059_v38, %v9058_v62  ;;  %v9062_v9 = vld [vmem:[#allocation82_spill] sm:$0xff] }
 0x354   : > { %9047 = vst [vmem:[#allocation60_spill] sm:$0xff] %v7255_v47  ;;  %9053 = vst [vmem:[#allocation58_spill] sm:$0xff] %v7267_v5  ;;  %1692 = vrot.lane.b32.xlu0 %v1492_v56, %s5436_s15  ;;  %v1871_v56 = vrot.slane %v1857_v28, %v5524_v31  ;;  %v1905_v58 = vcombine.high %v9057_v19, %v9056_v4  ;;  %v1952_v23 = vcombine.low %v1887_v50, %v1903_v32  ;;  %v9063_v28 = vld [vmem:[#allocation77_spill] sm:$0xff]  ;;  %v9065_v19 = vld [vmem:[#allocation88_spill] sm:$0xff] }
 0x355   : > { %v7274_v27 = vpop.permute.xlu1 %2731  ;;  %v1951_v60 = vrot.slane %v1937_v51, %v5532_v44  ;;  %v1513_v45 = vcombine.low %v9063_v28, %v9062_v9  ;;  %v1496_v4 = vcombine.high %v1456_v39, %v1488_v40  ;;  %v1953_v3 = vcombine.high %v1887_v50, %v1903_v32  ;;  %v9068_v47 = vld [vmem:[#allocation73_spill] sm:$0xff] }
 0x356   : > { %v7280_v15 = vpop.permute.xlu0 %2733  ;;  %v1919_v52 = vrot.slane %v1905_v58, %v5532_v44  ;;  %v1514_v51 = vcombine.high %v9063_v28, %v9062_v9  ;;  %v1921_v25 = vcombine.high %v1855_v18, %v1871_v56  ;;  %v1553_v40 = vrot.slane %v1545_v46, %v5524_v31 }
 0x357   : > { %9055 = vst [vmem:[#allocation69_spill] sm:$0xff] %v7280_v15  ;;  %1704 = vrot.lane.b32.xlu1 %v1495_v48, %s5439_s20  ;;  %v1920_v48 = vcombine.low %v1855_v18, %v1871_v56  ;;  %v9067_v15 = vld [vmem:[#allocation79_spill] sm:$0xff]  ;;  %v1960_v1 = vrot.slane %v1952_v23, %v5532_v44  ;;  %v1521_v50 = vrot.slane %v1513_v45, %v5524_v31 }
 0x358   : > { %1700 = vrot.lane.b32.xlu0 %v1494_v10, %s5438_s17  ;;  %v9066_v10 = vld [vmem:[#allocation83_spill] sm:$0xff]  ;;  %v1497_v11 = vcombine.low %v9068_v47, %v9067_v15  ;;  %v1498_v58 = vcombine.high %v9068_v47, %v9067_v15  ;;  %v1546_v18 = vcombine.high %v9059_v38, %v9058_v62  ;;  %v7324_v23 = vrot.slane %v1514_v51, %v5524_v31  ;;  %v9070_v62 = vld [vmem:[#allocation81_spill] sm:$0xff] }
 0x359   : > { %v7290_v63 = vpop.permute.xlu1 %2737  ;;  %v1529_v5 = vcombine.low %v9066_v10, %v9065_v19  ;;  %v1928_v46 = vrot.slane %v1920_v48, %v5532_v44  ;;  %v1967_v45 = vrot.slane %v1953_v3, %v5532_v44  ;;  %v1935_v38 = vrot.slane %v1921_v25, %v5532_v44 }
 0x35a   : > { %v7297_v53 = vpop.permute.xlu0 %2739  ;;  %v1505_v56 = vrot.slane %v1497_v11, %v5524_v31  ;;  %v9071_v11 = vld [vmem:[#allocation75_spill] sm:$0xff]  ;;  %v7339_v3 = vrot.slane %v1546_v18, %v5524_v31 }
 0x35b   : > { %9064 = vst [vmem:[#allocation67_spill] sm:$0xff] %v7297_v53  ;;  %2163 = vrot.lane.b32.xlu1 %v1969_v61, %s5434_s13  ;;  %v1971_v53 = vcombine.high %v1919_v52, %v1951_v60  ;;  %v1970_v61 = vcombine.low %v1919_v52, %v1951_v60  ;;  %v1537_v9 = vrot.slane %v1529_v5, %v5524_v31 }
 0x35c   : > { %1708 = vrot.lane.b32.xlu0 %v1496_v4, %s5432_s11  ;;  %v1530_v52 = vcombine.high %v9066_v10, %v9065_v19  ;;  %v1973_v15 = vcombine.high %v1928_v46, %v1960_v1  ;;  %v1641_v60 = vcombine.low %v9071_v11, %v9070_v62  ;;  %v1561_v28 = vcombine.low %v1505_v56, %v1521_v50 }
 0x35d   : > { %v7309_v39 = vpop.permute.xlu1 %2743  ;;  %v1593_v47 = vcombine.low %v1537_v9, %v1553_v40  ;;  %v1972_v48 = vcombine.low %v1928_v46, %v1960_v1  ;;  %v1562_v51 = vcombine.high %v1505_v56, %v1521_v50  ;;  %v1975_v25 = vcombine.high %v1935_v38, %v1967_v45  ;;  %v9075_v56 = vld [vmem:[#allocation91_spill] sm:$0xff] }
 0x35e   : > { %v7315_v32 = vpop.permute.xlu0 %2745  ;;  %v1974_v10 = vcombine.low %v1935_v38, %v1967_v45  ;;  %v1544_v11 = vrot.slane %v1530_v52, %v5524_v31  ;;  %v7350_v18 = vrot.slane %v1641_v60, %v5524_v31  ;;  %v1569_v45 = vrot.slane %v1561_v28, %v5532_v44 }
 0x35f   : > { %9069 = vst [vmem:[#allocation68_spill] sm:$0xff] %v7315_v32  ;;  %2171 = vrot.lane.b32.xlu1 %v1971_v53, %s5436_s15  ;;  %v7332_v53 = vrot.slane %v1498_v58, %v5524_v31  ;;  %v9073_v58 = vld [vmem:[#allocation80_spill] sm:$0xff]  ;;  %v1594_v32 = vcombine.high %v1537_v9, %v1553_v40  ;;  %v1601_v50 = vrot.slane %v1593_v47, %v5532_v44 }
 0x360   : > { %2167 = vrot.lane.b32.xlu0 %v1970_v61, %s5435_s14  ;;  %v9074_v61 = vld [vmem:[#allocation74_spill] sm:$0xff]  ;;  %v1609_v38 = vcombine.low %v1544_v11, %v7339_v3  ;;  %v2807_v40 = vcombine.low %v7247_v36, %v7290_v63  ;;  %v2808_v9 = vcombine.high %v7247_v36, %v7290_v63  ;;  %v1576_v52 = vrot.slane %v1562_v51, %v5532_v44  ;;  %v9079_v47 = vld [vmem:[#allocation84_spill] sm:$0xff] }
 0x361   : > { %v2750_v5 = vpop.permute.xlu1 %2749  ;;  %v1577_v19 = vcombine.low %v7332_v53, %v7324_v23  ;;  %v1633_v62 = vcombine.low %v9074_v61, %v9073_v58  ;;  %v1578_v46 = vcombine.high %v7332_v53, %v7324_v23  ;;  %v9078_v23 = vld [vmem:[#allocation89_spill] sm:$0xff]  ;;  %v9080_v61 = vld [vmem:[#allocation138_spill] sm:$0xff]  ;;  %v1608_v51 = vrot.slane %v1594_v32, %v5532_v44 }
 0x362   : > { %v7336_v4 = vpop.permute.xlu0 %2751  ;;  %v1649_v53 = vcombine.low %v9079_v47, %v9078_v23  ;;  %v2792_v63 = vcombine.high %v9080_v61, %v7274_v27 }
 0x363   : > { %9072 = vst [vmem:[#allocation63_spill] sm:$0xff] %v7336_v4  ;;  %2179 = vrot.lane.b32.xlu1 %v1973_v15, %s5438_s17  ;;  %v9076_v15 = vld [vmem:[#allocation85_spill] sm:$0xff]  ;;  %v1585_v28 = vrot.slane %v1577_v19, %v5532_v44  ;;  %v7382_v19 = vrot.slane %v2807_v40, %v5524_v31 }
 0x364   : > { %2175 = vrot.lane.b32.xlu0 %v1972_v48, %s5437_s16  ;;  %v1657_v48 = vcombine.low %v9076_v15, %v9075_v56  ;;  %v2791_v56 = vcombine.low %v9080_v61, %v7274_v27  ;;  %v1617_v27 = vrot.slane %v1609_v38, %v5532_v44  ;;  %v7408_v38 = vrot.slane %v2792_v63, %v5524_v31  ;;  %v9097_v63 = vld [vmem:[#allocation107_spill] sm:$0xff] }
 0x365   : > { %v2756_v1 = vpop.permute.xlu1 %2755  ;;  %9082 = vst [vmem:[#allocation62_spill] sm:$0xff] %v7382_v19 }
 0x366   : > { %v7356_v4 = vpop.permute.xlu0 %2757  ;;  %v2823_v60 = vcombine.low %v7309_v39, %v2756_v1  ;;  %v2824_v58 = vcombine.high %v7309_v39, %v2756_v1  ;;  %v1664_v15 = vrot.slane %v1657_v48, %v5524_v31  ;;  %v1626_v39 = vcombine.high %v1569_v45, %v1601_v50  ;;  %v9089_v48 = vld [vmem:[#allocation108_spill] sm:$0xff]  ;;  %9091 = vst [vmem:[#allocation77_spill] sm:$0xff] %v7408_v38 }
 0x367   : > { %9077 = vst [vmem:[#allocation61_spill] sm:$0xff] %v7356_v4  ;;  %2187 = vrot.lane.b32.xlu1 %v1975_v25, %s5432_s11  ;;  %v1625_v25 = vcombine.low %v1569_v45, %v1601_v50  ;;  %v7385_v1 = vrot.slane %v2808_v9, %v5524_v31  ;;  %v7405_v40 = vrot.slane %v2791_v56, %v5524_v31  ;;  %v9095_v56 = vld [vmem:[#allocation97_spill] sm:$0xff] }
 0x368   : > { %2183 = vrot.lane.b32.xlu0 %v1974_v10, %s5439_s20  ;;  %v1610_v10 = vcombine.high %v1544_v11, %v7339_v3  ;;  %v7390_v32 = vrot.slane %v2823_v60, %v5524_v31  ;;  %v9088_v11 = vld [vmem:[#allocation112_spill] sm:$0xff]  ;;  %v1627_v60 = vcombine.low %v1576_v52, %v1608_v51 }
 0x369   : > { %v2762_v36 = vpop.permute.xlu1 %2761  ;;  %9083 = vst [vmem:[#allocation72_spill] sm:$0xff] %v7385_v1  ;;  %v2024_v45 = vcombine.low %v9089_v48, %v9088_v11  ;;  %9090 = vst [vmem:[#allocation82_spill] sm:$0xff] %v7405_v40 }
 0x36a   : > { %v2839_v23 = vcombine.low %v2750_v5, %v2762_v36  ;;  %v2840_v47 = vcombine.high %v2750_v5, %v2762_v36  ;;  %v7378_v4 = vpop.permute.xlu0 %2763  ;;  %9084 = vst [vmem:[#allocation71_spill] sm:$0xff] %v7390_v32  ;;  %v7393_v5 = vrot.slane %v2824_v58, %v5524_v31  ;;  %v1656_v58 = vrot.slane %v1649_v53, %v5524_v31 }
 0x36b   : > { %9081 = vst [vmem:[#allocation64_spill] sm:$0xff] %v7378_v4  ;;  %1712 = vrot.lane.b32.xlu1 %v1625_v25, %s5428_s9  ;;  %v9096_v4 = vld [vmem:[#allocation111_spill] sm:$0xff]  ;;  %v2872_v53 = vcombine.high %v7408_v38, %v7385_v1 }
 0x36c   : > { %9085 = vst [vmem:[#allocation70_spill] sm:$0xff] %v7393_v5  ;;  %v7396_v50 = vrot.slane %v2839_v23, %v5524_v31  ;;  %v7399_v3 = vrot.slane %v2840_v47, %v5524_v31  ;;  %1716 = vrot.lane.b32.xlu0 %v1626_v39, %s5440_s21  ;;  %v1628_v23 = vcombine.high %v1576_v52, %v1608_v51  ;;  %v9094_v47 = vld [vmem:[#allocation103_spill] sm:$0xff] }
 0x36d   : > { %v7410_v9 = vpop.permute.xlu1 %1165  ;;  %v1992_v39 = vcombine.low %v9095_v56, %v9094_v47  ;;  %v2008_v35 = vcombine.low %v9097_v63, %v9096_v4  ;;  %v1624_v51 = vrot.slane %v1610_v10, %v5532_v44 }
 0x36e   : > { %9086 = vst [vmem:[#allocation92_spill] sm:$0xff] %v7396_v50  ;;  %9087 = vst [vmem:[#allocation86_spill] sm:$0xff] %v7399_v3  ;;  %v2887_v61 = vcombine.low %v7390_v32, %v7396_v50  ;;  %v2904_v36 = vcombine.high %v7393_v5, %v7399_v3  ;;  %v7417_v25 = vpop.permute.xlu0 %1169  ;;  %v1640_v32 = vrot.slane %v1633_v62, %v5524_v31  ;;  %v9098_v3 = vld [vmem:[#allocation101_spill] sm:$0xff] }
 0x36f   : > { %9092 = vst [vmem:[#allocation88_spill] sm:$0xff] %v7410_v9  ;;  %9093 = vst [vmem:[#allocation83_spill] sm:$0xff] %v7417_v25  ;;  %v2855_v9 = vcombine.low %v7405_v40, %v7382_v19  ;;  %1720 = vrot.lane.b32.xlu1 %v1627_v60, %s5441_s22  ;;  %v1673_v5 = vcombine.low %v1656_v58, %v1664_v15  ;;  %v9099_v25 = vld [vmem:[#allocation95_spill] sm:$0xff]  ;;  %v2032_v50 = vrot.slane %v2024_v45, %v5524_v31 }
 0x370   : > { %v1976_v52 = vcombine.low %v9099_v25, %v9098_v3  ;;  %1724 = vrot.lane.b32.xlu0 %v1628_v23, %s5442_s23  ;;  %v1629_v40 = vcombine.low %v1585_v28, %v1617_v27  ;;  %v7437_v19 = vrot.slane %v2904_v36, %v5532_v44  ;;  %v7440_v60 = vrot.slane %v2887_v61, %v5532_v44 }
 0x371   : > { %v7434_v13 = vpop.permute.xlu1 %1173  ;;  %v1665_v62 = vcombine.low %v1640_v32, %v7350_v18  ;;  %v1630_v58 = vcombine.high %v1585_v28, %v1617_v27  ;;  %v1592_v23 = vrot.slane %v1578_v46, %v5532_v44  ;;  %v2000_v10 = vrot.slane %v1992_v39, %v5524_v31 }
 0x372   : > { %9100 = vst [vmem:[#allocation79_spill] sm:$0xff] %v7434_v13  ;;  %9101 = vst [vmem:[#allocation73_spill] sm:$0xff] %v7440_v60  ;;  %v7443_v15 = vpop.permute.xlu0 %1177  ;;  %v2016_v45 = vrot.slane %v2008_v35, %v5524_v31  ;;  %v7450_v13 = vrot.slane %v2872_v53, %v5532_v44  ;;  %v7453_v36 = vrot.slane %v2855_v9, %v5532_v44  ;;  %v9145_v60 = vld [vmem:[#allocation12_spill] sm:$0xff] }
 0x373   : > { %9102 = vst [vmem:[#allocation81_spill] sm:$0xff] %v7443_v15  ;;  %1728 = vrot.lane.b32.xlu1 %v1629_v40, %s5443_s24  ;;  %v1680_v61 = vrot.slane %v1673_v5, %v5532_v44  ;;  %v1984_v18 = vrot.slane %v1976_v52, %v5524_v31  ;;  %v1631_v28 = vcombine.low %v1592_v23, %v1624_v51 }
 0x374   : > { %9103 = vst [vmem:[#allocation75_spill] sm:$0xff] %v7450_v13  ;;  %9104 = vst [vmem:[#allocation80_spill] sm:$0xff] %v7453_v36  ;;  %1732 = vrot.lane.b32.xlu0 %v1630_v58, %s5444_s25  ;;  %v2025_v46 = vcombine.high %v9089_v48, %v9088_v11  ;;  %v2072_v27 = vcombine.low %v2016_v45, %v2032_v50  ;;  %v1672_v9 = vrot.slane %v1665_v62, %v5532_v44  ;;  %v9144_v36 = vld [vmem:[#allocation15_spill] sm:$0xff] }
 0x375   : > { %v7460_v35 = vpop.permute.xlu1 %1181  ;;  %v1632_v39 = vcombine.high %v1592_v23, %v1624_v51  ;;  %v1993_v53 = vcombine.high %v9095_v56, %v9094_v47  ;;  %v2040_v52 = vcombine.low %v1984_v18, %v2000_v10  ;;  %v2009_v11 = vcombine.high %v9097_v63, %v9096_v4 }
 0x376   : > { %9105 = vst [vmem:[#allocation74_spill] sm:$0xff] %v7460_v35  ;;  %v7467_v5 = vpop.permute.xlu0 %1185  ;;  %v1681_v48 = vcombine.low %v1672_v9, %v1680_v61  ;;  %v1977_v58 = vcombine.high %v9099_v25, %v9098_v3  ;;  %v2039_v62 = vrot.slane %v2025_v46, %v5524_v31  ;;  %v2073_v40 = vcombine.high %v2016_v45, %v2032_v50  ;;  %v9109_v3 = vld [vmem:[#allocation113_spill] sm:$0xff] }
 0x377   : > { %9106 = vst [vmem:[#allocation91_spill] sm:$0xff] %v7467_v5  ;;  %1736 = vrot.lane.b32.xlu1 %v1631_v28, %s5433_s12  ;;  %v2080_v51 = vrot.slane %v2072_v27, %v5532_v44  ;;  %v1682_v56 = vcombine.high %v1672_v9, %v1680_v61  ;;  %v2007_v4 = vrot.slane %v1993_v53, %v5524_v31  ;;  %v9110_v25 = vld [vmem:[#allocation109_spill] sm:$0xff]  ;;  %v9114_v53 = vld [vmem:[#allocation110_spill] sm:$0xff] }
 0x378   : > { %1740 = vrot.lane.b32.xlu0 %v1632_v39, %s5445_s26  ;;  %v2041_v63 = vcombine.high %v1984_v18, %v2000_v10  ;;  %v2023_v23 = vrot.slane %v2009_v11, %v5524_v31  ;;  %v2048_v28 = vrot.slane %v2040_v52, %v5532_v44  ;;  %v2136_v46 = vcombine.low %v9110_v25, %v9109_v3  ;;  %v9112_v10 = vld [vmem:[#allocation104_spill] sm:$0xff]  ;;  %v9113_v18 = vld [vmem:[#allocation98_spill] sm:$0xff] }
 0x379   : > { %v7478_v32 = vpop.permute.xlu1 %1189  ;;  %v1991_v50 = vrot.slane %v1977_v58, %v5524_v31  ;;  %v2087_v9 = vrot.slane %v2073_v40, %v5532_v44  ;;  %v2120_v39 = vcombine.low %v9113_v18, %v9112_v10  ;;  %v9115_v11 = vld [vmem:[#allocation106_spill] sm:$0xff]  ;;  %v4749_v10 = vcombine.high %v6839_v41, %v6869_v8 }
 0x37a   : > { %9107 = vst [vmem:[#allocation85_spill] sm:$0xff] %v7478_v32  ;;  %v7481_v47 = vpop.permute.xlu0 %1193  ;;  %v2088_v45 = vcombine.low %v2023_v23, %v2039_v62  ;;  %v2105_v61 = vcombine.high %v2048_v28, %v2080_v51  ;;  %v2104_v5 = vcombine.low %v2048_v28, %v2080_v51  ;;  %v2055_v58 = vrot.slane %v2041_v63, %v5532_v44  ;;  %v9118_v25 = vld [vmem:[#allocation94_spill] sm:$0xff] }
 0x37b   : > { %9108 = vst [vmem:[#allocation89_spill] sm:$0xff] %v7481_v47  ;;  %1744 = vrot.lane.b32.xlu1 %v1681_v48, %s5427_s8  ;;  %v2128_v48 = vcombine.low %v9115_v11, %v9114_v53  ;;  %v2056_v3 = vcombine.low %v1991_v50, %v2007_v4  ;;  %v2143_v15 = vrot.slane %v2136_v46, %v5524_v31 }
 0x37c   : > { %1748 = vrot.lane.b32.xlu0 %v1682_v56, %s5446_s27  ;;  %v9117_v56 = vld [vmem:[#allocation100_spill] sm:$0xff]  ;;  %v2089_v40 = vcombine.high %v2023_v23, %v2039_v62  ;;  %v2107_v53 = vcombine.high %v2055_v58, %v2087_v9  ;;  %v2096_v51 = vrot.slane %v2088_v45, %v5532_v44  ;;  %v2127_v28 = vrot.slane %v2120_v39, %v5524_v31  ;;  %v9122_v62 = vld [vmem:[#allocation141_spill] sm:$0xff] }
 0x37d   : > { %v7491_v27 = vpop.permute.xlu1 %1197  ;;  %v2112_v35 = vcombine.low %v9118_v25, %v9117_v56  ;;  %v2135_v63 = vrot.slane %v2128_v48, %v5524_v31  ;;  %v2106_v46 = vcombine.low %v2055_v58, %v2087_v9  ;;  %v4717_v23 = vcombine.high %v9122_v62, %v6818_v30  ;;  %v9123_v48 = vld [vmem:[#allocation2_spill] sm:$0xff]  ;;  %v9126_v30 = vld [vmem:[#allocation139_spill] sm:$0xff] }
 0x37e   : > { %9111 = vst [vmem:[#allocation84_spill] sm:$0xff] %v7491_v27  ;;  %v7498_v52 = vpop.permute.xlu0 %1201  ;;  %v4733_v41 = vcombine.high %v6827_v2, %v6851_v26  ;;  %v2064_v8 = vrot.slane %v2056_v3, %v5532_v44  ;;  %v9124_v25 = vld [vmem:[#allocation142_spill] sm:$0xff]  ;;  %v7532_v26 = vrot.slane %v4749_v10, %v5524_v31  ;;  %v9129_v3 = vld [vmem:[#allocation140_spill] sm:$0xff]  ;;  %v4765_v13 = vcombine.high %v9145_v60, %v9144_v36 }
 0x37f   : > { %9116 = vst [vmem:[#allocation138_spill] sm:$0xff] %v7498_v52  ;;  %2195 = vrot.lane.b32.xlu1 %v2105_v61, %s5440_s21  ;;  %v9120_v61 = vld [vmem:[#allocation11_spill] sm:$0xff]  ;;  %v2119_v45 = vrot.slane %v2112_v35, %v5524_v31  ;;  %v2152_v39 = vcombine.low %v2135_v63, %v2143_v15  ;;  %v2103_v35 = vrot.slane %v2089_v40, %v5532_v44 }
 0x380   : > { %2191 = vrot.lane.b32.xlu0 %v2104_v5, %s5428_s9  ;;  %v4884_v11 = vcombine.low %v9120_v61, %v6899_v22  ;;  %v2057_v5 = vcombine.high %v1991_v50, %v2007_v4  ;;  %v4701_v4 = vcombine.high %v9126_v30, %v6802_v49  ;;  %v2109_v50 = vcombine.high %v2064_v8, %v2096_v51  ;;  %v9128_v15 = vld [vmem:[#allocation3_spill] sm:$0xff] }
 0x381   : > { %v7508_v18 = vpop.permute.xlu1 %1205  ;;  %v4836_v58 = vcombine.low %v9129_v3, %v9128_v15  ;;  %v2144_v62 = vcombine.low %v2119_v45, %v2127_v28  ;;  %v7545_v49 = vrot.slane %v4717_v23, %v5524_v31  ;;  %v7548_v10 = vrot.slane %v4733_v41, %v5524_v31 }
 0x382   : > { %9119 = vst [vmem:[#allocation112_spill] sm:$0xff] %v7508_v18  ;;  %v7515_v56 = vpop.permute.xlu0 %1209  ;;  %v4852_v18 = vcombine.low %v9124_v25, %v9123_v48  ;;  %v2071_v40 = vrot.slane %v2057_v5, %v5532_v44  ;;  %v7559_v28 = vrot.slane %v4701_v4, %v5524_v31  ;;  %v4405_v45 = vcombine.low %v7016_v12, %v7077_v43 }
 0x383   : > { %9121 = vst [vmem:[#allocation108_spill] sm:$0xff] %v7515_v56  ;;  %2203 = vrot.lane.b32.xlu1 %v2107_v53, %s5442_s23  ;;  %v9125_v56 = vld [vmem:[#allocation14_spill] sm:$0xff]  ;;  %v7540_v53 = vrot.slane %v4884_v11, %v5524_v31  ;;  %v4813_v23 = vcombine.high %v7548_v10, %v7532_v26  ;;  %v4844_v5 = vrot.slane %v4836_v58, %v5524_v31 }
 0x384   : > { %v4868_v9 = vcombine.low %v9125_v56, %v6867_v6  ;;  %2199 = vrot.lane.b32.xlu0 %v2106_v46, %s5441_s22  ;;  %v2108_v46 = vcombine.low %v2064_v8, %v2096_v51  ;;  %v7553_v30 = vrot.slane %v4852_v18, %v5524_v31  ;;  %v2159_v51 = vrot.slane %v2152_v39, %v5532_v44 }
 0x385   : > { %v7534_v2 = vpop.permute.xlu1 %1213  ;;  %v2111_v8 = vcombine.high %v2071_v40, %v2103_v35  ;;  %v2151_v39 = vrot.slane %v2144_v62, %v5532_v44  ;;  %v4781_v4 = vcombine.high %v7559_v28, %v7545_v49  ;;  %v4373_v58 = vcombine.low %v6941_v42, %v6982_v0 }
 0x386   : > { %9127 = vst [vmem:[#allocation103_spill] sm:$0xff] %v7534_v2  ;;  %v7542_v63 = vpop.permute.xlu0 %1217  ;;  %v4876_v11 = vrot.slane %v4868_v9, %v5524_v31  ;;  %v7584_v62 = vrot.slane %v4813_v23, %v5532_v44  ;;  %v4779_v36 = vrot.slane %v4765_v13, %v5532_v44  ;;  %v4869_v13 = vcombine.high %v9125_v56, %v6867_v6 }
 0x387   : > { %9130 = vst [vmem:[#allocation97_spill] sm:$0xff] %v7542_v63  ;;  %2211 = vrot.lane.b32.xlu1 %v2109_v50, %s5444_s25  ;;  %v2110_v50 = vcombine.low %v2071_v40, %v2103_v35  ;;  %v2161_v35 = vcombine.high %v2151_v39, %v2159_v51  ;;  %v9134_v40 = vld [vmem:[#allocation21_spill] sm:$0xff]  ;;  %v2160_v52 = vcombine.low %v2151_v39, %v2159_v51 }
 0x388   : > { %2207 = vrot.lane.b32.xlu0 %v2108_v46, %s5443_s24  ;;  %v4932_v18 = vcombine.low %v4876_v11, %v7540_v53  ;;  %v4900_v46 = vcombine.low %v4844_v5, %v7553_v30  ;;  %v4933_v38 = vcombine.high %v4876_v11, %v7540_v53  ;;  %v4356_v53 = vcombine.high %v7121_v29, %v7106_v57 }
 0x389   : > { %v7563_v41 = vpop.permute.xlu1 %1221 }
 0x38a   : > { %9131 = vst [vmem:[#allocation111_spill] sm:$0xff] %v7563_v41  ;;  %v7569_v9 = vpop.permute.xlu0 %1225  ;;  %v4389_v41 = vcombine.low %v7001_v54, %v7045_v7  ;;  %v4940_v27 = vrot.slane %v4932_v18, %v5532_v44  ;;  %v4947_v60 = vrot.slane %v4933_v38, %v5532_v44  ;;  %v4853_v38 = vcombine.high %v9124_v25, %v9123_v48 }
 0x38b   : > { %9132 = vst [vmem:[#allocation107_spill] sm:$0xff] %v7569_v9  ;;  %2219 = vrot.lane.b32.xlu1 %v2111_v8, %s5445_s26  ;;  %v4357_v9 = vcombine.low %v9134_v40, %v6964_v37  ;;  %v7589_v8 = vrot.slane %v4405_v45, %v5524_v31  ;;  %v4908_v45 = vrot.slane %v4900_v46, %v5532_v44  ;;  %v9139_v46 = vld [vmem:[#allocation18_spill] sm:$0xff] }
 0x38c   : > { %2215 = vrot.lane.b32.xlu0 %v2110_v50, %s5433_s12  ;;  %v7596_v50 = vrot.slane %v4781_v4, %v5532_v44  ;;  %v7602_v23 = vrot.slane %v4389_v41, %v5524_v31  ;;  %v9138_v41 = vld [vmem:[#allocation20_spill] sm:$0xff]  ;;  %v7683_v25 = vrot.slane %v4869_v13, %v5524_v31  ;;  %v9156_v13 = vld [vmem:[#allocation30_spill] sm:$0xff] }
 0x38d   : > { %v7581_v63 = vpop.permute.xlu1 %1229  ;;  %v7611_v18 = vrot.slane %v4357_v9, %v5524_v31  ;;  %v9141_v9 = vld [vmem:[#allocation143_spill] sm:$0xff] }
 0x38e   : > { %9133 = vst [vmem:[#allocation101_spill] sm:$0xff] %v7581_v63  ;;  %v7591_v2 = vpop.permute.xlu0 %2699  ;;  %v7599_v63 = vrot.slane %v4373_v58, %v5524_v31  ;;  %v4835_v51 = vcombine.high %v7596_v50, %v7584_v62  ;;  %v4453_v39 = vcombine.low %v7602_v23, %v7589_v8  ;;  %v4964_v58 = vcombine.low %v4908_v45, %v4940_v27 }
 0x38f   : > { %9135 = vst [vmem:[#allocation95_spill] sm:$0xff] %v7591_v2  ;;  %2227 = vrot.lane.b32.xlu1 %v2161_v35, %s5446_s27  ;;  %v4797_v35 = vcombine.high %v9139_v46, %v9138_v41  ;;  %v4454_v48 = vcombine.high %v7602_v23, %v7589_v8 }
 0x390   : > { %2223 = vrot.lane.b32.xlu0 %v2160_v52, %s5427_s8  ;;  %v4421_v52 = vcombine.low %v7611_v18, %v7599_v63 }
 0x391   : > { %v7606_v32 = vpop.permute.xlu1 %2695 }
 0x392   : > { %9136 = vst [vmem:[#allocation113_spill] sm:$0xff] %v7606_v32  ;;  %v7615_v4 = vpop.permute.xlu0 %2635  ;;  %v9142_v32 = vld [vmem:[#allocation144_spill] sm:$0xff]  ;;  %v4429_v41 = vrot.slane %v4421_v52, %v5532_v44 }
 0x393   : > { %9137 = vst [vmem:[#allocation109_spill] sm:$0xff] %v7615_v4  ;;  %5047 = vrot.lane.b32.xlu1 %v4835_v51, %s5432_s11  ;;  %v4829_v47 = vcombine.high %v9142_v32, %v9141_v9  ;;  %v4965_v4 = vcombine.high %v4908_v45, %v4940_v27  ;;  %v4461_v51 = vrot.slane %v4453_v39, %v5532_v44 }
 0x394   : > { %5051 = vrot.lane.b32.xlu0 %v4964_v58, %s5428_s9  ;;  %v4901_v58 = vcombine.high %v4844_v5, %v7553_v30  ;;  %v4811_v27 = vrot.slane %v4797_v35, %v5532_v44  ;;  %v4885_v39 = vcombine.high %v9120_v61, %v6899_v22  ;;  %v4318_v35 = vcombine.high %v7066_v34, %v7072_v14 }
 0x395   : > { %v7623_v2 = vpop.permute.xlu1 %2639  ;;  %v4485_v45 = vcombine.low %v4429_v41, %v4461_v51  ;;  %v4350_v22 = vcombine.high %v7124_v21, %v7109_v17  ;;  %v4837_v61 = vcombine.high %v9129_v3, %v9128_v15  ;;  %v4486_v56 = vcombine.high %v4429_v41, %v4461_v51  ;;  %v9203_v17 = vld [vmem:[#allocation32_spill] sm:$0xff] }
 0x396   : > { %9140 = vst [vmem:[#allocation104_spill] sm:$0xff] %v7623_v2  ;;  %v7628_v1 = vpop.permute.xlu0 %2643  ;;  %v4830_v5 = vcombine.low %v4779_v36, %v4811_v27  ;;  %v4286_v34 = vcombine.high %v7058_v55, %v7051_v16  ;;  %v7680_v14 = vrot.slane %v4853_v38, %v5524_v31  ;;  %v4422_v15 = vcombine.high %v7611_v18, %v7599_v63 }
 0x397   : > { %9143 = vst [vmem:[#allocation98_spill] sm:$0xff] %v7628_v1  ;;  %5023 = vrot.lane.b32.xlu1 %v4829_v47, %s5434_s13  ;;  %v4915_v47 = vrot.slane %v4901_v58, %v5532_v44  ;;  %v4812_v3 = vcombine.low %v7548_v10, %v7532_v26  ;;  %v4831_v23 = vcombine.high %v4779_v36, %v4811_v27 }
 0x398   : > { %5055 = vrot.lane.b32.xlu0 %v4965_v4, %s5440_s21  ;;  %v4332_v16 = vrot.slane %v4318_v35, %v5532_v44  ;;  %v7694_v55 = vrot.slane %v4837_v61, %v5524_v31  ;;  %v4468_v63 = vrot.slane %v4454_v48, %v5532_v44  ;;  %v4780_v18 = vcombine.low %v7559_v28, %v7545_v49  ;;  %v9157_v35 = vld [vmem:[#allocation31_spill] sm:$0xff] }
 0x399   : > { %v7637_v46 = vpop.permute.xlu1 %2647  ;;  %v4966_v52 = vcombine.low %v4915_v47, %v4947_v60  ;;  %v4300_v26 = vrot.slane %v4286_v34, %v5532_v44  ;;  %v4436_v27 = vrot.slane %v4422_v15, %v5532_v44  ;;  %v3422_v38 = vcombine.low %v7129_v59, %v7148_v33  ;;  %v9159_v15 = vld [vmem:[#allocation27_spill] sm:$0xff] }
 0x39a   : > { %9146 = vst [vmem:[#allocation110_spill] sm:$0xff] %v7637_v46  ;;  %v7642_v11 = vpop.permute.xlu0 %2651  ;;  %v4916_v10 = vcombine.low %v7694_v55, %v7680_v14  ;;  %v4406_v34 = vcombine.high %v7016_v12, %v7077_v43  ;;  %v4358_v43 = vcombine.high %v9134_v40, %v6964_v37  ;;  %v9182_v46 = vld [vmem:[#allocation61_spill] sm:$0xff] }
 0x39b   : > { %9147 = vst [vmem:[#allocation106_spill] sm:$0xff] %v7642_v11  ;;  %4568 = vrot.lane.b32.xlu1 %v4356_v53, %s5432_s11  ;;  %v7670_v53 = vrot.slane %v4885_v39, %v5524_v31  ;;  %v4487_v28 = vcombine.low %v4436_v27, %v4468_v63 }
 0x39c   : > { %4572 = vrot.lane.b32.xlu0 %v4485_v45, %s5428_s9  ;;  %v4967_v45 = vcombine.high %v4915_v47, %v4947_v60  ;;  %v4820_v60 = vrot.slane %v4812_v3, %v5532_v44  ;;  %v3454_v47 = vcombine.low %v7180_v24, %v7225_v20  ;;  %v4924_v61 = vrot.slane %v4916_v10, %v5532_v44  ;;  %v9160_v3 = vld [vmem:[#allocation26_spill] sm:$0xff] }
 0x39d   : > { %v7649_v30 = vpop.permute.xlu1 %2655  ;;  %v4948_v51 = vcombine.low %v7683_v25, %v7670_v53  ;;  %v4374_v10 = vcombine.high %v6941_v42, %v6982_v0 }
 0x39e   : > { %9148 = vst [vmem:[#allocation100_spill] sm:$0xff] %v7649_v30  ;;  %v7653_v4 = vpop.permute.xlu0 %2659 }
 0x39f   : > { %9149 = vst [vmem:[#allocation94_spill] sm:$0xff] %v7653_v4  ;;  %5027 = vrot.lane.b32.xlu1 %v4830_v5, %s5435_s14  ;;  %v4351_v5 = vcombine.low %v4300_v26, %v4332_v16  ;;  %v4956_v39 = vrot.slane %v4948_v51, %v5532_v44  ;;  %v7732_v51 = vrot.slane %v3454_v47, %v5524_v31 }
 0x3a0   : > { %5059 = vrot.lane.b32.xlu0 %v4966_v52, %s5441_s22  ;;  %v4788_v52 = vrot.slane %v4780_v18, %v5532_v44 }
 0x3a1   : > { %v7663_v58 = vpop.permute.xlu1 %2663  ;;  %v4968_v18 = vcombine.low %v4924_v61, %v4956_v39 }
 0x3a2   : > { %9150 = vst [vmem:[#allocation11_spill] sm:$0xff] %v7663_v58  ;;  %v7674_v6 = vpop.permute.xlu0 %2667 }
 0x3a3   : > { %9151 = vst [vmem:[#allocation141_spill] sm:$0xff] %v7674_v6  ;;  %4544 = vrot.lane.b32.xlu1 %v4350_v22, %s5434_s13  ;;  %v3438_v22 = vcombine.low %v9157_v35, %v9156_v13 }
 0x3a4   : > { %4576 = vrot.lane.b32.xlu0 %v4486_v56, %s5440_s21  ;;  %v4832_v56 = vcombine.low %v4788_v52, %v4820_v60 }
 0x3a5   : > { %v7690_v8 = vpop.permute.xlu1 %2671  ;;  %v7745_v12 = vrot.slane %v3438_v22, %v5524_v31 }
 0x3a6   : > { %9152 = vst [vmem:[#allocation2_spill] sm:$0xff] %v7690_v8  ;;  %v7698_v41 = vpop.permute.xlu0 %2675  ;;  %v9181_v8 = vld [vmem:[#allocation60_spill] sm:$0xff] }
 0x3a7   : > { %9153 = vst [vmem:[#allocation142_spill] sm:$0xff] %v7698_v41  ;;  %5031 = vrot.lane.b32.xlu1 %v4831_v23, %s5436_s15  ;;  %v3406_v23 = vcombine.low %v9160_v3, %v9159_v15  ;;  %v3502_v0 = vcombine.low %v7745_v12, %v7732_v51  ;;  %v9180_v41 = vld [vmem:[#allocation67_spill] sm:$0xff] }
 0x3a8   : > { %5063 = vrot.lane.b32.xlu0 %v4967_v45, %s5442_s23 }
 0x3a9   : > { %v7709_v36 = vpop.permute.xlu1 %2679  ;;  %v7756_v42 = vrot.slane %v3406_v23, %v5524_v31  ;;  %v4833_v23 = vcombine.high %v4788_v52, %v4820_v60 }
 0x3aa   : > { %9154 = vst [vmem:[#allocation14_spill] sm:$0xff] %v7709_v36  ;;  %v7714_v49 = vpop.permute.xlu0 %2683 }
 0x3ab   : > { %9155 = vst [vmem:[#allocation139_spill] sm:$0xff] %v7714_v49  ;;  %4548 = vrot.lane.b32.xlu1 %v4351_v5, %s5435_s14  ;;  %v4390_v5 = vcombine.high %v7001_v54, %v7045_v7  ;;  %v4488_v7 = vcombine.high %v4436_v27, %v4468_v63  ;;  %v7777_v63 = vrot.slane %v4358_v43, %v5524_v31  ;;  %v9171_v43 = vld [vmem:[#allocation51_spill] sm:$0xff] }
 0x3ac   : > { %4580 = vrot.lane.b32.xlu0 %v4487_v28, %s5441_s22  ;;  %v7742_v28 = vrot.slane %v3422_v38, %v5524_v31  ;;  %v7764_v38 = vrot.slane %v4374_v10, %v5524_v31  ;;  %v4969_v10 = vcombine.high %v4924_v61, %v4956_v39  ;;  %v4949_v61 = vcombine.high %v7683_v25, %v7670_v53 }
 0x3ad   : > { %v7725_v48 = vpop.permute.xlu1 %2687  ;;  %v7767_v37 = vrot.slane %v4390_v5, %v5524_v31  ;;  %v3510_v5 = vrot.slane %v3502_v0, %v5532_v44 }
 0x3ae   : > { %9158 = vst [vmem:[#allocation3_spill] sm:$0xff] %v7725_v48  ;;  %v7734_v45 = vpop.permute.xlu0 %2691  ;;  %v3470_v40 = vcombine.low %v7756_v42, %v7742_v28  ;;  %v9169_v48 = vld [vmem:[#allocation23_spill] sm:$0xff]  ;;  %v4963_v11 = vrot.slane %v4949_v61, %v5532_v44  ;;  %v2943_v61 = vcombine.low %v9181_v8, %v9180_v41 }
 0x3af   : > { %9161 = vst [vmem:[#allocation140_spill] sm:$0xff] %v7734_v45  ;;  %5035 = vrot.lane.b32.xlu1 %v4832_v56, %s5437_s16  ;;  %v4352_v56 = vcombine.high %v4300_v26, %v4332_v16  ;;  %v7753_v45 = vrot.slane %v4406_v34, %v5524_v31  ;;  %v9164_v16 = vld [vmem:[#allocation25_spill] sm:$0xff]  ;;  %v9165_v26 = vld [vmem:[#allocation24_spill] sm:$0xff] }
 0x3b0   : > { %5067 = vrot.lane.b32.xlu0 %v4968_v18, %s5443_s24  ;;  %v4333_v22 = vcombine.low %v9165_v26, %v9164_v16  ;;  %v4437_v16 = vcombine.low %v7777_v63, %v7764_v38  ;;  %v3478_v60 = vrot.slane %v3470_v40, %v5532_v44  ;;  %v9172_v26 = vld [vmem:[#allocation57_spill] sm:$0xff]  ;;  %v4917_v40 = vcombine.high %v7694_v55, %v7680_v14  ;;  %v9177_v14 = vld [vmem:[#allocation63_spill] sm:$0xff] }
 0x3b1   : > { %v7750_v47 = vpop.permute.xlu1 %4089  ;;  %v4469_v27 = vcombine.low %v7767_v37, %v7753_v45  ;;  %v3405_v49 = vcombine.high %v9172_v26, %v9171_v43 }
 0x3b2   : > { %9162 = vst [vmem:[#allocation21_spill] sm:$0xff] %v7750_v47  ;;  %v7760_v54 = vpop.permute.xlu0 %4093  ;;  %v4341_v39 = vrot.slane %v4333_v22, %v5532_v44  ;;  %v3534_v0 = vcombine.low %v3478_v60, %v3510_v5  ;;  %v3535_v2 = vcombine.high %v3478_v60, %v3510_v5  ;;  %v9198_v47 = vld [vmem:[#allocation102_spill] sm:$0xff] }
 0x3b3   : > { %9163 = vst [vmem:[#allocation20_spill] sm:$0xff] %v7760_v54  ;;  %4552 = vrot.lane.b32.xlu1 %v4352_v56, %s5436_s15  ;;  %v9168_v56 = vld [vmem:[#allocation22_spill] sm:$0xff] }
 0x3b4   : > { %4584 = vrot.lane.b32.xlu0 %v4488_v7, %s5442_s23  ;;  %v4301_v7 = vcombine.low %v9169_v48, %v9168_v56  ;;  %v4445_v56 = vrot.slane %v4437_v16, %v5532_v44  ;;  %v4834_v16 = vcombine.low %v7596_v50, %v7584_v62  ;;  %v9187_v50 = vld [vmem:[#allocation59_spill] sm:$0xff]  ;;  %v9200_v54 = vld [vmem:[#allocation90_spill] sm:$0xff] }
 0x3b5   : > { %v7774_v34 = vpop.permute.xlu1 %4065 }
 0x3b6   : > { %9166 = vst [vmem:[#allocation18_spill] sm:$0xff] %v7774_v34  ;;  %v7781_v18 = vpop.permute.xlu0 %4097 }
 0x3b7   : > { %9167 = vst [vmem:[#allocation143_spill] sm:$0xff] %v7781_v18  ;;  %5039 = vrot.lane.b32.xlu1 %v4833_v23, %s5438_s17  ;;  %v4477_v23 = vrot.slane %v4469_v27, %v5532_v44  ;;  %v9176_v27 = vld [vmem:[#allocation64_spill] sm:$0xff]  ;;  %v9196_v18 = vld [vmem:[#allocation93_spill] sm:$0xff] }
 0x3b8   : > { %5071 = vrot.lane.b32.xlu0 %v4969_v10, %s5444_s25  ;;  %v4309_v10 = vrot.slane %v4301_v7, %v5532_v44  ;;  %v2975_v55 = vcombine.low %v9177_v14, %v9176_v27 }
 0x3b9   : > { %v7791_v52 = vpop.permute.xlu1 %4069  ;;  %v4489_v25 = vcombine.low %v4445_v56, %v4477_v23 }
 0x3ba   : > { %9170 = vst [vmem:[#allocation144_spill] sm:$0xff] %v7791_v52  ;;  %v7798_v48 = vpop.permute.xlu0 %4101  ;;  %v4353_v30 = vcombine.low %v4309_v10, %v4341_v39  ;;  %v4354_v60 = vcombine.high %v4309_v10, %v4341_v39  ;;  %v9202_v10 = vld [vmem:[#allocation33_spill] sm:$0xff] }
 0x3bb   : > { %9173 = vst [vmem:[#allocation15_spill] sm:$0xff] %v7798_v48  ;;  %3617 = vrot.lane.b32.xlu1 %v3405_v49, %s5432_s11  ;;  %v4931_v49 = vrot.slane %v4917_v40, %v5532_v44  ;;  %v9184_v40 = vld [vmem:[#allocation69_spill] sm:$0xff]  ;;  %v9194_v48 = vld [vmem:[#allocation56_spill] sm:$0xff] }
 0x3bc   : > { %3621 = vrot.lane.b32.xlu0 %v3534_v0, %s5428_s9 }
 0x3bd   : > { %v7807_v22 = vpop.permute.xlu1 %4073  ;;  %v4970_v36 = vcombine.low %v4931_v49, %v4963_v11 }
 0x3be   : > { %9174 = vst [vmem:[#allocation12_spill] sm:$0xff] %v7807_v22  ;;  %v7809_v53 = vpop.permute.xlu0 %4105 }
 0x3bf   : > { %9175 = vst [vmem:[#allocation30_spill] sm:$0xff] %v7809_v53  ;;  %4556 = vrot.lane.b32.xlu1 %v4353_v30, %s5437_s16  ;;  %v9183_v30 = vld [vmem:[#allocation68_spill] sm:$0xff]  ;;  %v7841_v53 = vrot.slane %v2943_v61, %v5524_v31 }
 0x3c0   : > { %4588 = vrot.lane.b32.xlu0 %v4489_v25, %s5443_s24  ;;  %v2959_v6 = vcombine.low %v9183_v30, %v9182_v46  ;;  %v9185_v25 = vld [vmem:[#allocation53_spill] sm:$0xff]  ;;  %v9193_v61 = vld [vmem:[#allocation52_spill] sm:$0xff] }
 0x3c1   : > { %v7817_v7 = vpop.permute.xlu1 %1688  ;;  %v2927_v1 = vcombine.low %v9185_v25, %v9184_v40 }
 0x3c2   : > { %9178 = vst [vmem:[#allocation31_spill] sm:$0xff] %v7817_v7  ;;  %v7821_v0 = vpop.permute.xlu0 %1684  ;;  %v7832_v7 = vrot.slane %v2975_v55, %v5524_v31  ;;  %v9191_v55 = vld [vmem:[#allocation99_spill] sm:$0xff] }
 0x3c3   : > { %9179 = vst [vmem:[#allocation27_spill] sm:$0xff] %v7821_v0  ;;  %5043 = vrot.lane.b32.xlu1 %v4834_v16, %s5439_s20  ;;  %v9188_v0 = vld [vmem:[#allocation58_spill] sm:$0xff]  ;;  %v7844_v16 = vrot.slane %v2959_v6, %v5524_v31  ;;  %v3367_v6 = vcombine.high %v9194_v48, %v9193_v61  ;;  %v3335_v48 = vcombine.high %v9203_v17, %v9202_v10 }
 0x3c4   : > { %5075 = vrot.lane.b32.xlu0 %v4970_v36, %s5433_s12  ;;  %v3399_v4 = vcombine.high %v9188_v0, %v9187_v50  ;;  %v9190_v36 = vld [vmem:[#allocation105_spill] sm:$0xff] }
 0x3c5   : > { %v7834_v62 = vpop.permute.xlu1 %1696  ;;  %v3927_v22 = vcombine.high %v9191_v55, %v9190_v36  ;;  %v9199_v36 = vld [vmem:[#allocation96_spill] sm:$0xff] }
 0x3c6   : > { %9186 = vst [vmem:[#allocation26_spill] sm:$0xff] %v7834_v62  ;;  %v7838_v58 = vpop.permute.xlu0 %1692  ;;  %v7851_v62 = vrot.slane %v2927_v1, %v5524_v31  ;;  %v3911_v55 = vcombine.high %v9199_v36, %v9198_v47  ;;  %v9208_v36 = vld [vmem:[#allocation119_spill] sm:$0xff] }
 0x3c7   : > { %9189 = vst [vmem:[#allocation25_spill] sm:$0xff] %v7838_v58  ;;  %3593 = vrot.lane.b32.xlu1 %v3399_v4, %s5434_s13  ;;  %v3023_v58 = vcombine.low %v7844_v16, %v7832_v7  ;;  %v4490_v4 = vcombine.high %v4445_v56, %v4477_v23  ;;  %v7874_v23 = vrot.slane %v3927_v22, %v5524_v31  ;;  %v9210_v22 = vld [vmem:[#allocation75_spill] sm:$0xff] }
 0x3c8   : > { %3625 = vrot.lane.b32.xlu0 %v3535_v2, %s5440_s21  ;;  %v9197_v2 = vld [vmem:[#allocation87_spill] sm:$0xff]  ;;  %v2991_v1 = vcombine.low %v7851_v62, %v7841_v53  ;;  %v4971_v56 = vcombine.high %v4931_v49, %v4963_v11  ;;  %v7898_v11 = vrot.slane %v3911_v55, %v5524_v31  ;;  %v9211_v49 = vld [vmem:[#allocation116_spill] sm:$0xff] }
 0x3c9   : > { %v7855_v5 = vpop.permute.xlu1 %1704  ;;  %v3895_v34 = vcombine.high %v9197_v2, %v9196_v18  ;;  %v3503_v18 = vcombine.high %v7745_v12, %v7732_v51  ;;  %v7881_v61 = vrot.slane %v3023_v58, %v5532_v44  ;;  %v9206_v2 = vld [vmem:[#allocation118_spill] sm:$0xff]  ;;  %v3471_v58 = vcombine.high %v7756_v42, %v7742_v28 }
 0x3ca   : > { %9192 = vst [vmem:[#allocation24_spill] sm:$0xff] %v7855_v5  ;;  %v7859_v52 = vpop.permute.xlu0 %1700  ;;  %v9201_v5 = vld [vmem:[#allocation5_spill] sm:$0xff]  ;;  %v2999_v12 = vrot.slane %v2991_v1, %v5532_v44  ;;  %v3990_v1 = vcombine.low %v7898_v11, %v7874_v23 }
 0x3cb   : > { %9195 = vst [vmem:[#allocation22_spill] sm:$0xff] %v7859_v52  ;;  %4560 = vrot.lane.b32.xlu1 %v4354_v60, %s5438_s17  ;;  %v3879_v39 = vcombine.high %v9201_v5, %v9200_v54  ;;  %v9205_v60 = vld [vmem:[#allocation120_spill] sm:$0xff]  ;;  %v9207_v5 = vld [vmem:[#allocation121_spill] sm:$0xff]  ;;  %v7892_v52 = vrot.slane %v3367_v6, %v5532_v44  ;;  %v7895_v51 = vrot.slane %v3895_v34, %v5524_v31 }
 0x3cc   : > { %4592 = vrot.lane.b32.xlu0 %v4490_v4, %s5444_s25  ;;  %v4988_v54 = vcombine.low %v9206_v2, %v9205_v60  ;;  %v4996_v17 = vcombine.low %v9208_v36, %v9207_v5  ;;  %v2926_v4 = vcombine.high %v9210_v22, %v7437_v19  ;;  %v9212_v60 = vld [vmem:[#allocation114_spill] sm:$0xff]  ;;  %v9213_v5 = vld [vmem:[#allocation117_spill] sm:$0xff]  ;;  %v9214_v36 = vld [vmem:[#allocation115_spill] sm:$0xff]  ;;  %v7910_v34 = vrot.slane %v3335_v48, %v5532_v44 }
 0x3cd   : > { %v7878_v47 = vpop.permute.xlu1 %2163  ;;  %v4972_v2 = vcombine.low %v9212_v60, %v9211_v49  ;;  %v4980_v6 = vcombine.low %v9214_v36, %v9213_v5  ;;  %v7913_v55 = vrot.slane %v3879_v39, %v5524_v31  ;;  %v3055_v28 = vcombine.low %v2999_v12, %v7881_v61 }
 0x3ce   : > { %9204 = vst [vmem:[#allocation23_spill] sm:$0xff] %v7878_v47  ;;  %v7887_v10 = vpop.permute.xlu0 %1708  ;;  %v7919_v42 = vrot.slane %v3503_v18, %v5532_v44  ;;  %v3400_v39 = vcombine.low %v7910_v34, %v7892_v52  ;;  %v3485_v48 = vrot.slane %v3471_v58, %v5532_v44 }
 0x3cf   : > { %9209 = vst [vmem:[#allocation51_spill] sm:$0xff] %v7887_v10  ;;  %5079 = vrot.lane.b32.xlu1 %v4971_v56, %s5445_s26  ;;  %v4995_v56 = vrot.slane %v4988_v54, %v5524_v31  ;;  %v3958_v18 = vcombine.low %v7913_v55, %v7895_v51  ;;  %v4979_v60 = vrot.slane %v4972_v2, %v5524_v31 }
 0x3d0   : > { %3138 = vrot.lane.b32.xlu0 %v2926_v4, %s5432_s11  ;;  %v5003_v4 = vrot.slane %v4996_v17, %v5524_v31  ;;  %v4987_v5 = vrot.slane %v4980_v6, %v5524_v31  ;;  %v4470_v54 = vcombine.high %v7767_v37, %v7753_v45  ;;  %v3536_v36 = vcombine.low %v3485_v48, %v7919_v42  ;;  %v9218_v45 = vld [vmem:[#allocation42_spill] sm:$0xff]  ;;  %v9219_v37 = vld [vmem:[#allocation43_spill] sm:$0xff] }
 0x3d1   : > { %v7915_v47 = vpop.permute.xlu1 %2171  ;;  %v4438_v2 = vcombine.high %v7777_v63, %v7764_v38  ;;  %v7950_v6 = vrot.slane %v3958_v18, %v5532_v44 }
 0x3d2   : > { %9215 = vst [vmem:[#allocation57_spill] sm:$0xff] %v7915_v47  ;;  %v7925_v49 = vpop.permute.xlu0 %2167  ;;  %v5012_v58 = vcombine.low %v4995_v56, %v5003_v4  ;;  %v7961_v56 = vrot.slane %v4470_v54, %v5532_v44 }
 0x3d3   : > { %9216 = vst [vmem:[#allocation64_spill] sm:$0xff] %v7925_v49  ;;  %3142 = vrot.lane.b32.xlu1 %v3055_v28, %s5428_s9  ;;  %v7942_v28 = vrot.slane %v3990_v1, %v5532_v44  ;;  %v7970_v4 = vrot.slane %v4438_v2, %v5532_v44 }
 0x3d4   : > { %3597 = vrot.lane.b32.xlu0 %v3400_v39, %s5435_s14  ;;  %v5004_v39 = vcombine.low %v4979_v60, %v4987_v5  ;;  %v7964_v38 = vrot.slane %v5012_v58, %v5532_v44  ;;  %v9222_v60 = vcombine.low %v7121_v29, %v7106_v57  ;;  %v9223_v29 = vld [vmem:[#allocation73_spill] sm:$0xff] }
 0x3d5   : > { %v7938_v17 = vpop.permute.xlu1 %2179  ;;  %v4010_v1 = vcombine.low %v7950_v6, %v7942_v28  ;;  %v4491_v54 = vcombine.low %v7970_v4, %v7961_v56 }
 0x3d6   : > { %9217 = vst [vmem:[#allocation63_spill] sm:$0xff] %v7938_v17  ;;  %v7944_v47 = vpop.permute.xlu0 %2175  ;;  %v9220_v17 = vcombine.low %v9218_v45, %v9219_v37  ;;  %v7973_v18 = vrot.slane %v5004_v39, %v5532_v44  ;;  %v9224_v39 = vld [vmem:[#allocation80_spill] sm:$0xff] }
 0x3d7   : > { %3629 = vrot.lane.b32.xlu1 %v3536_v36, %s5441_s22 }
 0x3d8   : > { %4077 = vrot.lane.b32.xlu0 %v9220_v17, %s5437_s16  ;;  %v5020_v58 = vcombine.low %v7973_v18, %v7964_v38 }
 0x3d9   : > { %v7956_v49 = vpop.permute.xlu1 %2187 }
 0x3da   : > { %v7966_v63 = vpop.permute.xlu0 %2183 }
 0x3db   : > { %9221 = vst [vmem:[#allocation67_spill] sm:$0xff] %v7966_v63  ;;  %4109 = vrot.lane.b32.xlu1 %v4010_v1, %s5443_s24  ;;  %v2920_v1 = vcombine.high %v9224_v39, %v9223_v29 }
 0x3dc   : > { %4564 = vrot.lane.b32.xlu0 %v9222_v60, %s5439_s20 }
 0x3dd   : > { %v1713_v5 = vpop.permute.xlu1 %1712 }
 0x3de   : > { %v1758_v17 = vsel %vm240_vm0, %v7887_v10, %v1713_v5  ;;  %v1717_v36 = vpop.permute.xlu0 %1716  ;;  %v3056_v5 = vcombine.high %v2999_v12, %v7881_v61  ;;  %v3537_v61 = vcombine.high %v3485_v48, %v7919_v42  ;;  %v5021_v48 = vcombine.high %v7973_v18, %v7964_v38  ;;  %v9233_v18 = vld [vmem:[#allocation62_spill] sm:$0xff] }
 0x3df   : > { %v1759_v2 = vsel %vm8775_vm6, %v1758_v17, %v1717_v36  ;;  %4596 = vrot.lane.b32.xlu1 %v4491_v54, %s5433_s12  ;;  %v3401_v17 = vcombine.high %v7910_v34, %v7892_v52  ;;  %v3455_v36 = vcombine.high %v7180_v24, %v7225_v20  ;;  %v3439_v52 = vcombine.high %v9157_v35, %v9156_v13  ;;  %v9227_v20 = vld [vmem:[#allocation92_spill] sm:$0xff] }
 0x3e0   : > { %5083 = vrot.lane.b32.xlu0 %v5020_v58, %s5427_s8  ;;  %v4011_v24 = vcombine.high %v7950_v6, %v7942_v28  ;;  %v3024_v13 = vcombine.high %v7844_v16, %v7832_v7  ;;  %v9229_v6 = vld [vmem:[#allocation9_spill] sm:$0xff] }
 0x3e1   : > { %v1721_v57 = vpop.permute.xlu1 %1720  ;;  %v8041_v16 = vrot.slane %v3439_v52, %v5524_v31 }
 0x3e2   : > { %v1760_v60 = vsel %vm1249_vm7, %v1759_v2, %v1721_v57  ;;  %v1725_v63 = vpop.permute.xlu0 %1724  ;;  %v9226_v57 = vld [vmem:[#allocation122_spill] sm:$0xff] }
 0x3e3   : > { %v1761_v10 = vsel %vm1251_vm8, %v1760_v60, %v1725_v63  ;;  %3114 = vrot.lane.b32.xlu1 %v2920_v1, %s5434_s13  ;;  %v9225_v63 = vld [vmem:[#allocation7_spill] sm:$0xff]  ;;  %v3423_v60 = vcombine.high %v7129_v59, %v7148_v33  ;;  %v3407_v59 = vcombine.high %v9160_v3, %v9159_v15  ;;  %v8019_v33 = vrot.slane %v3455_v36, %v5524_v31 }
 0x3e4   : > { %3146 = vrot.lane.b32.xlu0 %v3056_v5, %s5440_s21  ;;  %v4493_v1 = vcombine.low %v9226_v57, %v9225_v63  ;;  %v9230_v5 = vld [vmem:[#allocation8_spill] sm:$0xff]  ;;  %v9235_v3 = vcombine.high %v9218_v45, %v9219_v37  ;;  %v2992_v36 = vcombine.high %v7851_v62, %v7841_v53  ;;  %v9237_v63 = vld [vmem:[#allocation55_spill] sm:$0xff]  ;;  %v4492_v45 = vcombine.high %v7970_v4, %v7961_v56  ;;  %v9241_v56 = vld [vmem:[#allocation54_spill] sm:$0xff] }
 0x3e5   : > { %v1729_v54 = vpop.permute.xlu1 %1728  ;;  %v8038_v7 = vrot.slane %v3423_v60, %v5524_v31  ;;  %v8054_v60 = vrot.slane %v3407_v59, %v5524_v31  ;;  %v3518_v53 = vcombine.low %v8041_v16, %v8019_v33 }
 0x3e6   : > { %v1762_v58 = vsel %vm1253_vm9, %v1761_v10, %v1729_v54  ;;  %v1733_v2 = vpop.permute.xlu0 %1732  ;;  %v9228_v10 = vld [vmem:[#allocation71_spill] sm:$0xff]  ;;  %v4509_v54 = vcombine.low %v9230_v5, %v9229_v6  ;;  %v9240_v6 = vld [vmem:[#allocation29_spill] sm:$0xff] }
 0x3e7   : > { %v1763_v12 = vsel %vm1255_vm10, %v1762_v58, %v1733_v2  ;;  %3601 = vrot.lane.b32.xlu1 %v3401_v17, %s5436_s15  ;;  %v2888_v34 = vcombine.high %v9228_v10, %v9227_v20  ;;  %v9231_v17 = vld [vmem:[#allocation126_spill] sm:$0xff]  ;;  %v9232_v58 = vld [vmem:[#allocation125_spill] sm:$0xff]  ;;  %v9238_v10 = vld [vmem:[#allocation124_spill] sm:$0xff]  ;;  %v3350_v4 = vcombine.low %v9241_v56, %v9240_v6  ;;  %v3486_v5 = vcombine.low %v8054_v60, %v8038_v7 }
 0x3e8   : > { %3633 = vrot.lane.b32.xlu0 %v3537_v61, %s5442_s23  ;;  %v4517_v38 = vcombine.low %v9232_v58, %v9231_v17  ;;  %v9234_v2 = vld [vmem:[#allocation82_spill] sm:$0xff]  ;;  %v4516_v17 = vrot.slane %v4509_v54, %v5524_v31 }
 0x3e9   : > { %v1737_v42 = vpop.permute.xlu1 %1736  ;;  %v2856_v61 = vcombine.high %v9234_v2, %v9233_v18  ;;  %v8051_v37 = vrot.slane %v2888_v34, %v5532_v44 }
 0x3ea   : > { %v1741_v35 = vpop.permute.xlu0 %1740  ;;  %v8024_v28 = vsel %vm8774_vm12, %v1763_v12, %v1737_v42  ;;  %v9236_v12 = vld [vmem:[#allocation50_spill] sm:$0xff]  ;;  %v4524_v58 = vrot.slane %v4517_v38, %v5524_v31 }
 0x3eb   : > { %v1765_v15 = vsel %vm1259_vm11, %v1737_v42, %v1741_v35  ;;  %4081 = vrot.lane.b32.xlu1 %v9235_v3, %s5438_s17  ;;  %v3382_v57 = vcombine.low %v9237_v63, %v9236_v12  ;;  %v9239_v42 = vld [vmem:[#allocation123_spill] sm:$0xff]  ;;  %v2870_v59 = vrot.slane %v2856_v61, %v5532_v44  ;;  %v8084_v12 = vrot.slane %v3518_v53, %v5532_v44 }
 0x3ec   : > { %4113 = vrot.lane.b32.xlu0 %v4011_v24, %s5444_s25  ;;  %v8060_v24 = vrot.slane %v3024_v13, %v5532_v44  ;;  %v4501_v35 = vcombine.low %v9239_v42, %v9238_v10  ;;  %v8075_v13 = vrot.slane %v2992_v36, %v5532_v44  ;;  %v4500_v36 = vrot.slane %v4493_v1, %v5524_v31 }
 0x3ed   : > { %v1745_v20 = vpop.permute.xlu1 %1744  ;;  %v2921_v2 = vcombine.low %v2870_v59, %v8051_v37  ;;  %v3358_v63 = vrot.slane %v3350_v4, %v5532_v44 }
 0x3ee   : > { %v1766_v62 = vsel %vm1261_vm13, %v1765_v15, %v1745_v20  ;;  %v1749_v52 = vpop.permute.xlu0 %1748  ;;  %v3390_v15 = vrot.slane %v3382_v57, %v5532_v44  ;;  %v3057_v61 = vcombine.low %v8075_v13, %v8060_v24  ;;  %v4508_v54 = vrot.slane %v4501_v35, %v5524_v31 }
 0x3ef   : > { %v8067_v34 = vsel %vm8773_vm14, %v1766_v62, %v1749_v52  ;;  %4600 = vrot.lane.b32.xlu1 %v4492_v45, %s5445_s26  ;;  %v3494_v20 = vrot.slane %v3486_v5, %v5532_v44 }
 0x3f0   : > { %5087 = vrot.lane.b32.xlu0 %v5021_v48, %s5446_s27  ;;  %v3991_v48 = vcombine.high %v7898_v11, %v7874_v23  ;;  %v3959_v23 = vcombine.high %v7913_v55, %v7895_v51  ;;  %v4533_v11 = vcombine.low %v4516_v17, %v4524_v58  ;;  %v3402_v45 = vcombine.low %v3358_v63, %v3390_v15  ;;  %v9242_v58 = vld [vmem:[#allocation41_spill] sm:$0xff] }
 0x3f1   : > { %v2196_v18 = vpop.permute.xlu1 %2195  ;;  %v3538_v62 = vcombine.low %v3494_v20, %v8084_v12  ;;  %v4525_v10 = vcombine.low %v4500_v36, %v4508_v54 }
 0x3f2   : > { %v2192_v3 = vpop.permute.xlu0 %2191  ;;  %v4005_v52 = vrot.slane %v3991_v48, %v5532_v44  ;;  %v3973_v6 = vrot.slane %v3959_v23, %v5532_v44  ;;  %v4540_v51 = vrot.slane %v4533_v11, %v5532_v44  ;;  %v2960_v23 = vcombine.high %v9183_v30, %v9182_v46  ;;  %v9245_v46 = vld [vmem:[#allocation86_spill] sm:$0xff] }
 0x3f3   : > { %v2237_v38 = vsel %vm240_vm0, %v7956_v49, %v2192_v3  ;;  %3118 = vrot.lane.b32.xlu1 %v2921_v2, %s5435_s14  ;;  %v4532_v5 = vrot.slane %v4525_v10, %v5532_v44 }
 0x3f4   : > { %3150 = vrot.lane.b32.xlu0 %v3057_v61, %s5441_s22  ;;  %v2238_v57 = vsel %vm8775_vm6, %v2237_v38, %v2196_v18  ;;  %v4012_v4 = vcombine.low %v3973_v6, %v4005_v52  ;;  %v9243_v18 = vld [vmem:[#allocation39_spill] sm:$0xff]  ;;  %v2976_v61 = vcombine.high %v9177_v14, %v9176_v27  ;;  %v2922_v38 = vcombine.high %v2870_v59, %v8051_v37 }
 0x3f5   : > { %v2204_v1 = vpop.permute.xlu1 %2203  ;;  %v9244_v2 = vcombine.low %v9242_v58, %v9243_v18  ;;  %v4541_v36 = vcombine.low %v4532_v5, %v4540_v51  ;;  %v2928_v27 = vcombine.high %v9185_v25, %v9184_v40  ;;  %v8143_v40 = vrot.slane %v2960_v23, %v5524_v31 }
 0x3f6   : > { %v2200_v53 = vpop.permute.xlu0 %2199  ;;  %v8131_v14 = vrot.slane %v2976_v61, %v5524_v31  ;;  %v3539_v61 = vcombine.high %v3494_v20, %v8084_v12 }
 0x3f7   : > { %v2239_v42 = vsel %vm1249_vm7, %v2238_v57, %v2200_v53  ;;  %3605 = vrot.lane.b32.xlu1 %v3402_v45, %s5437_s16  ;;  %v2944_v57 = vcombine.high %v9181_v8, %v9180_v41  ;;  %v3058_v8 = vcombine.high %v8075_v13, %v8060_v24  ;;  %v9246_v41 = vld [vmem:[#allocation70_spill] sm:$0xff]  ;;  %v3403_v45 = vcombine.high %v3358_v63, %v3390_v15  ;;  %v9247_v53 = vld [vmem:[#allocation49_spill] sm:$0xff]  ;;  %v9252_v15 = vld [vmem:[#allocation40_spill] sm:$0xff] }
 0x3f8   : > { %3637 = vrot.lane.b32.xlu0 %v3538_v62, %s5443_s24  ;;  %v2240_v35 = vsel %vm1251_vm8, %v2239_v42, %v2204_v1  ;;  %v2903_v30 = vcombine.low %v9246_v41, %v9245_v46  ;;  %v9248_v62 = vld [vmem:[#allocation47_spill] sm:$0xff]  ;;  %v9250_v24 = vld [vmem:[#allocation77_spill] sm:$0xff]  ;;  %v8158_v18 = vrot.slane %v2928_v27, %v5524_v31 }
 0x3f9   : > { %v2212_v55 = vpop.permute.xlu1 %2211  ;;  %v4038_v10 = vcombine.low %v9248_v62, %v9247_v53  ;;  %v8140_v42 = vrot.slane %v2944_v57, %v5524_v31  ;;  %v9256_v57 = vld [vmem:[#allocation38_spill] sm:$0xff]  ;;  %v3487_v53 = vcombine.high %v8054_v60, %v8038_v7  ;;  %v9257_v60 = vcombine.low %v9172_v26, %v9171_v43  ;;  %v9265_v43 = vld [vmem:[#allocation127_spill] sm:$0xff] }
 0x3fa   : > { %v2208_v56 = vpop.permute.xlu0 %2207 }
 0x3fb   : > { %v2241_v17 = vsel %vm1253_vm9, %v2240_v35, %v2208_v56  ;;  %4085 = vrot.lane.b32.xlu1 %v9244_v2, %s5439_s20  ;;  %v9249_v35 = vld [vmem:[#allocation72_spill] sm:$0xff]  ;;  %v3039_v2 = vcombine.low %v8143_v40, %v8131_v14  ;;  %v3007_v27 = vcombine.low %v8158_v18, %v8140_v42  ;;  %v3501_v7 = vrot.slane %v3487_v53, %v5532_v44 }
 0x3fc   : > { %4117 = vrot.lane.b32.xlu0 %v4012_v4, %s5433_s12  ;;  %v2242_v3 = vsel %vm1255_vm10, %v2241_v17, %v2212_v55  ;;  %v2871_v13 = vcombine.low %v9250_v24, %v9249_v35  ;;  %v9251_v55 = vld [vmem:[#allocation45_spill] sm:$0xff]  ;;  %v9253_v56 = vld [vmem:[#allocation48_spill] sm:$0xff]  ;;  %v9254_v4 = vld [vmem:[#allocation46_spill] sm:$0xff] }
 0x3fd   : > { %v2220_v48 = vpop.permute.xlu1 %2219  ;;  %v4022_v63 = vcombine.low %v9252_v15, %v9251_v55  ;;  %v4030_v17 = vcombine.low %v9254_v4, %v9253_v56  ;;  %v3047_v46 = vrot.slane %v3039_v2, %v5532_v44  ;;  %v3015_v62 = vrot.slane %v3007_v27, %v5532_v44  ;;  %v9258_v24 = vld [vmem:[#allocation17_spill] sm:$0xff]  ;;  %v9260_v15 = vld [vmem:[#allocation130_spill] sm:$0xff] }
 0x3fe   : > { %v2216_v54 = vpop.permute.xlu0 %2215 }
 0x3ff   : > { %v2244_v11 = vsel %vm1259_vm11, %v2216_v54, %v2220_v48  ;;  %4604 = vrot.lane.b32.xlu1 %v4541_v36, %s5427_s8  ;;  %v8125_v1 = vsel %vm8774_vm12, %v2242_v3, %v2216_v54  ;;  %v4013_v36 = vcombine.high %v3973_v6, %v4005_v52  ;;  %v2911_v54 = vrot.slane %v2903_v30, %v5532_v44 }
 0x400   : > { %3122 = vrot.lane.b32.xlu0 %v2922_v38, %s5436_s15  ;;  %v9255_v38 = vld [vmem:[#allocation44_spill] sm:$0xff]  ;;  %v4029_v12 = vrot.slane %v4022_v63, %v5524_v31  ;;  %v4037_v20 = vrot.slane %v4030_v17, %v5524_v31  ;;  %v3519_v52 = vcombine.high %v8041_v16, %v8019_v33  ;;  %v9261_v63 = vld [vmem:[#allocation129_spill] sm:$0xff] }
 0x401   : > { %v2228_v37 = vpop.permute.xlu1 %2227  ;;  %v4014_v23 = vcombine.low %v9256_v57, %v9255_v38  ;;  %v3566_v56 = vcombine.low %v9261_v63, %v9260_v15  ;;  %v9263_v38 = vld [vmem:[#allocation10_spill] sm:$0xff]  ;;  %v9272_v15 = vld [vmem:[#allocation133_spill] sm:$0xff]  ;;  %v9273_v63 = vld [vmem:[#allocation131_spill] sm:$0xff] }
 0x402   : > { %v2224_v59 = vpop.permute.xlu0 %2223 }
 0x403   : > { %v2245_v25 = vsel %vm1261_vm13, %v2244_v11, %v2224_v59  ;;  %3154 = vrot.lane.b32.xlu1 %v3058_v8, %s5442_s23  ;;  %v4045_v11 = vrot.slane %v4038_v10, %v5524_v31  ;;  %v4542_v8 = vcombine.high %v4532_v5, %v4540_v51  ;;  %v4021_v59 = vrot.slane %v4014_v23, %v5524_v31  ;;  %v9264_v23 = vld [vmem:[#allocation128_spill] sm:$0xff] }
 0x404   : > { %3609 = vrot.lane.b32.xlu0 %v3403_v45, %s5438_s17  ;;  %v8155_v58 = vsel %vm8773_vm14, %v2245_v25, %v2228_v37  ;;  %v2879_v37 = vrot.slane %v2871_v13, %v5532_v44  ;;  %v3059_v51 = vcombine.low %v3015_v62, %v3047_v46  ;;  %v3533_v5 = vrot.slane %v3519_v52, %v5532_v44  ;;  %v9259_v13 = vld [vmem:[#allocation16_spill] sm:$0xff] }
 0x405   : > { %v8162_v3 = vpop.permute.xlu1 %5047  ;;  %v4054_v45 = vcombine.low %v4037_v20, %v4045_v11  ;;  %v4046_v33 = vcombine.low %v4021_v59, %v4029_v12  ;;  %v3558_v55 = vcombine.low %v9259_v13, %v9258_v24  ;;  %v3550_v26 = vcombine.low %v9265_v43, %v9264_v23  ;;  %v9266_v52 = vld [vmem:[#allocation136_spill] sm:$0xff]  ;;  %v9268_v59 = vld [vmem:[#allocation137_spill] sm:$0xff] }
 0x406   : > { %v8165_v48 = vpop.permute.xlu0 %5051  ;;  %v2923_v30 = vcombine.low %v2879_v37, %v2911_v54  ;;  %v3540_v17 = vcombine.low %v3501_v7, %v3533_v5  ;;  %v3573_v27 = vrot.slane %v3566_v56, %v5524_v31  ;;  %v2924_v20 = vcombine.high %v2879_v37, %v2911_v54  ;;  %v9271_v54 = vld [vmem:[#allocation19_spill] sm:$0xff] }
 0x407   : > { %3641 = vrot.lane.b32.xlu1 %v3539_v61, %s5444_s25  ;;  %v4061_v25 = vrot.slane %v4054_v45, %v5532_v44  ;;  %v4053_v35 = vrot.slane %v4046_v33, %v5532_v44  ;;  %v3565_v11 = vrot.slane %v3558_v55, %v5524_v31  ;;  %v9269_v45 = vld [vmem:[#allocation135_spill] sm:$0xff]  ;;  %v3040_v33 = vcombine.high %v8143_v40, %v8131_v14  ;;  %v9270_v55 = vld [vmem:[#allocation132_spill] sm:$0xff] }
 0x408   : > { %4121 = vrot.lane.b32.xlu0 %v4013_v36, %s5445_s26  ;;  %v9262_v36 = vld [vmem:[#allocation13_spill] sm:$0xff]  ;;  %v3087_v53 = vcombine.low %v9269_v45, %v9268_v59  ;;  %v3557_v13 = vrot.slane %v3550_v26, %v5524_v31  ;;  %v3063_v37 = vcombine.low %v9271_v54, %v9270_v55  ;;  %v3071_v56 = vcombine.low %v9273_v63, %v9272_v15 }
 0x409   : > { %v8180_v6 = vpop.permute.xlu1 %5023  ;;  %v4062_v61 = vcombine.low %v4053_v35, %v4061_v25  ;;  %v3542_v57 = vcombine.low %v9263_v38, %v9262_v36  ;;  %v3582_v14 = vcombine.low %v3565_v11, %v3573_v27  ;;  %v4063_v38 = vcombine.high %v4053_v35, %v4061_v25 }
 0x40a   : > { %v8183_v41 = vpop.permute.xlu0 %5055  ;;  %v3070_v43 = vrot.slane %v3063_v37, %v5524_v31  ;;  %v9274_v27 = vcombine.low %v9210_v22, %v7437_v19  ;;  %v9275_v22 = vmov 0.0   ;;  %v5097_v15 = vsel %vm240_vm0, %v8162_v3, %v8165_v48 }
 0x40b   : > { %4608 = vrot.lane.b32.xlu1 %v4542_v8, %s5446_s27  ;;  %v9267_v8 = vld [vmem:[#allocation134_spill] sm:$0xff]  ;;  %v3549_v24 = vrot.slane %v3542_v57, %v5524_v31  ;;  %v3054_v57 = vrot.slane %v3040_v33, %v5532_v44  ;;  %5365 = vmatprep.mubr.msk.f32.mxu0 %vm5447_vm15, %v9275_v22  ;;  %v9276_v63 = vcombine.low %v9142_v32, %v9141_v9  ;;  %vm1242_vm15 = vcmask 883712  }
 0x40c   : > { %3126 = vrot.lane.b32.xlu0 %v2923_v30, %s5437_s16  ;;  %v3079_v30 = vcombine.low %v9267_v8, %v9266_v52  ;;  %vm1244_vm14 = vcmask 1031168  }
 0x40d   : > { %v8191_v16 = vpop.permute.xlu1 %4568  ;;  %v3574_v23 = vcombine.low %v3549_v24, %v3557_v13 }
 0x40e   : > { %v8194_v10 = vpop.permute.xlu0 %4572 }
 0x40f   : > { %3158 = vrot.lane.b32.xlu1 %v3059_v51, %s5443_s24  ;;  %v3581_v35 = vrot.slane %v3574_v23, %v5532_v44 }
 0x410   : > { %3613 = vrot.lane.b32.xlu0 %v9257_v60, %s5439_s20  ;;  %v3060_v60 = vcombine.high %v3015_v62, %v3047_v46  ;;  %v3541_v46 = vcombine.high %v3501_v7, %v3533_v5  ;;  %v3086_v62 = vrot.slane %v3079_v30, %v5524_v31  ;;  %v3589_v5 = vrot.slane %v3582_v14, %v5532_v44 }
 0x411   : > { %v8208_v4 = vpop.permute.xlu1 %5027  ;;  %v5098_v14 = vsel %vm8775_vm6, %v5097_v15, %v8183_v41 }
 0x412   : > { %v8210_v2 = vpop.permute.xlu0 %5059  ;;  %v3590_v52 = vcombine.low %v3581_v35, %v3589_v5  ;;  %v3591_v33 = vcombine.high %v3581_v35, %v3589_v5 }
 0x413   : > { %3645 = vrot.lane.b32.xlu1 %v3540_v17, %s5433_s12  ;;  %v3008_v17 = vcombine.high %v8158_v18, %v8140_v42  ;;  %v3078_v42 = vrot.slane %v3071_v56, %v5524_v31  ;;  %v5090_v56 = vsel %vm1232_vm1, %v9276_v63, %v8180_v6 }
 0x414   : > { %4125 = vrot.lane.b32.xlu0 %v4062_v61, %s5427_s8  ;;  %v3094_v61 = vrot.slane %v3087_v53, %v5524_v31 }
 0x415   : > { %v8220_v12 = vpop.permute.xlu1 %4544  ;;  %v3022_v18 = vrot.slane %v3008_v17, %v5532_v44  ;;  %v3095_v31 = vcombine.low %v3070_v43, %v3078_v42  ;;  %v9277_v42 = vcombine.low %v9188_v0, %v9187_v50  ;;  %v9278_v0 = vld [vmem:[#allocation28_spill] sm:$0xff] }
 0x416   : > { %v8228_v51 = vpop.permute.xlu0 %4576  ;;  %v3103_v26 = vcombine.low %v3086_v62, %v3094_v61  ;;  %v5099_v61 = vsel %vm1249_vm7, %v5098_v14, %v8210_v2  ;;  %v9279_v50 = vcombine.low %v7124_v21, %v9278_v0  ;;  %v9289_v0 = vld [vmem:[#allocation15_spill] sm:$0xff] }
 0x417   : > { %3130 = vrot.lane.b32.xlu1 %v2924_v20, %s5438_s17  ;;  %v3061_v25 = vcombine.low %v3022_v18, %v3054_v57  ;;  %v3062_v59 = vcombine.high %v3022_v18, %v3054_v57  ;;  %v3102_v45 = vrot.slane %v3095_v31, %v5532_v44 }
 0x418   : > { %3162 = vrot.lane.b32.xlu0 %v3060_v60, %s5444_s25  ;;  %v3110_v8 = vrot.slane %v3103_v26, %v5532_v44  ;;  %v5108_v44 = vld [vmem:[%s8574_s4] sm:$0xff] }
 0x419   : > { %v5032_v40 = vpop.permute.xlu1 %5031 }
 0x41a   : > { %v5064_v36 = vpop.permute.xlu0 %5063  ;;  %v3111_v19 = vcombine.low %v3102_v45, %v3110_v8  ;;  %v3112_v13 = vcombine.high %v3102_v45, %v3110_v8 }
 0x41b   : > { %3649 = vrot.lane.b32.xlu1 %v3541_v46, %s5445_s26  ;;  %v5091_v46 = vsel %vm1234_vm2, %v5090_v56, %v8208_v4  ;;  %v5100_v32 = vsel %vm1251_vm8, %v5099_v61, %v5064_v36 }
 0x41c   : > { %4129 = vrot.lane.b32.xlu0 %v4063_v38, %s5446_s27  ;;  %v5092_v48 = vsel %vm1236_vm3, %v5091_v46, %v5032_v40 }
 0x41d   : > { %v8249_v7 = vpop.permute.xlu1 %4548 }
 0x41e   : > { %v8251_v11 = vpop.permute.xlu0 %4580 }
 0x41f   : > { %3134 = vrot.lane.b32.xlu1 %v9274_v27, %s5439_s20 }
 0x420   : > { %3166 = vrot.lane.b32.xlu0 %v3061_v25, %s5433_s12 }
 0x421   : > { %v5036_v20 = vpop.permute.xlu1 %5035 }
 0x422   : > { %v5068_v30 = vpop.permute.xlu0 %5067  ;;  %v5093_v9 = vsel %vm1238_vm4, %v5092_v48, %v5036_v20 }
 0x423   : > { %3653 = vrot.lane.b32.xlu1 %v3590_v52, %s5427_s8  ;;  %v5101_v6 = vsel %vm1253_vm9, %v5100_v32, %v5068_v30  ;;  %v4611_v30 = vsel %vm1232_vm1, %v9279_v50, %v8220_v12 }
 0x424   : > { %3170 = vrot.lane.b32.xlu0 %v3062_v59, %s5445_s26  ;;  %v4618_v59 = vsel %vm240_vm0, %v8191_v16, %v8194_v10  ;;  %v4612_v45 = vsel %vm1234_vm2, %v4611_v30, %v8249_v7  ;;  %v9290_v30 = vld [vmem:[#allocation12_spill] sm:$0xff] }
 0x425   : > { %v4553_v53 = vpop.permute.xlu1 %4552 }
 0x426   : > { %v8263_v60 = vpop.permute.xlu0 %4584 }
 0x427   : > { %3657 = vrot.lane.b32.xlu1 %v3591_v33, %s5446_s27  ;;  %v4619_v33 = vsel %vm8775_vm6, %v4618_v59, %v8228_v51 }
 0x428   : > { %3174 = vrot.lane.b32.xlu0 %v3111_v19, %s5427_s8  ;;  %v4613_v19 = vsel %vm1236_vm3, %v4612_v45, %v4553_v53  ;;  %v9291_v45 = vld [vmem:[#allocation30_spill] sm:$0xff] }
 0x429   : > { %v5040_v24 = vpop.permute.xlu1 %5039 }
 0x42a   : > { %v5072_v55 = vpop.permute.xlu0 %5071  ;;  %v5094_v41 = vsel %vm1240_vm5, %v5093_v9, %v5040_v24 }
 0x42b   : > { %3178 = vrot.lane.b32.xlu1 %v3112_v13, %s5446_s27  ;;  %v5102_v4 = vsel %vm1255_vm10, %v5101_v6, %v5072_v55  ;;  %v4620_v13 = vsel %vm1249_vm7, %v4619_v33, %v8251_v11 }
 0x42c   : > { %5111 = vperm.xlu0 %5405, %v5108_v44   ;;  %v4621_v12 = vsel %vm1251_vm8, %v4620_v13, %v8263_v60 }
 0x42d   : > { %v8272_v54 = vpop.permute.xlu1 %3617 }
 0x42e   : > { %v3622_v37 = vpop.permute.xlu0 %3621 }
 0x42f   : > { %v3667_v43 = vsel %vm240_vm0, %v8272_v54, %v3622_v37 }
 0x431   : > { %v4557_v17 = vpop.permute.xlu1 %4556 }
 0x432   : > { %v4589_v62 = vpop.permute.xlu0 %4588  ;;  %v4614_v21 = vsel %vm1238_vm4, %v4613_v19, %v4557_v17 }
 0x433   : > { %v4622_v55 = vsel %vm1253_vm9, %v4621_v12, %v4589_v62 }
 0x435   : > { %v5044_v38 = vpop.permute.xlu1 %5043 }
 0x436   : > { %v5095_v57 = vsel %vm1242_vm15, %v5094_v41, %v5044_v38  ;;  %v5076_v23 = vpop.permute.xlu0 %5075  ;;  %v9281_v41 = vld [vmem:[#allocation20_spill] sm:$0xff]  ;;  %v9282_v38 = vld [vmem:[#allocation21_spill] sm:$0xff] }
 0x437   : > { %v5103_v2 = vsel %vm8774_vm12, %v5102_v4, %v5076_v23  ;;  %v5096_v40 = vsel %vm1244_vm14, %v5095_v57, %v8162_v3  ;;  %v4139_v4 = vsel %vm240_vm0, %v9282_v38, %v9281_v41  ;;  %v9283_v57 = vld [vmem:[#allocation18_spill] sm:$0xff] }
 0x438   : > { %5131 = vmatprep.subr.mxu1 %v5103_v2  ;;  %v9284_v2 = vld [vmem:[#allocation37_spill] sm:$0xff] }
 0x439   : > { %5132 = vmatpush1.msra.mxu1 %v5096_v40  ;;  %v3594_v36 = vpop.permute.xlu1 %3593 }
 0x43a   : > { %v8304_v18 = vsel %vm1232_vm1, %v9277_v42, %v3594_v36  ;;  %v3626_v5 = vpop.permute.xlu0 %3625  ;;  %v9287_v42 = vld [vmem:[#allocation143_spill] sm:$0xff] }
 0x43b   : > { %v8307_v26 = vsel %vm8775_vm6, %v3667_v43, %v3626_v5  ;;  %v4140_v5 = vsel %vm8775_vm6, %v4139_v4, %v9287_v42  ;;  %vm9293_vm6 = vcmask 408576   ;;  %v9295_v42 = vld [vmem:[#allocation4_spill] sm:$0xff] }
 0x43c   : > { %v4141_v50 = vsel %vm1249_vm7, %v4140_v5, %v9289_v0 }
 0x43d   : > { %v4561_v25 = vpop.permute.xlu1 %4560  ;;  %v4142_v33 = vsel %vm1251_vm8, %v4141_v50, %v9291_v45  ;;  %v9301_v50 = vld [vmem:[#allocation88_spill] sm:$0xff] }
 0x43e   : > { %v4593_v35 = vpop.permute.xlu0 %4592  ;;  %v4615_v10 = vsel %vm1240_vm5, %v4614_v21, %v4561_v25  ;;  %v9288_v25 = vld [vmem:[#allocation144_spill] sm:$0xff] }
 0x43f   : > { %v4623_v51 = vsel %vm1255_vm10, %v4622_v55, %v4593_v35 }
 0x441   : > { %v5080_v27 = vpop.permute.xlu1 %5079 }
 0x442   : > { %v8309_v3 = vpop.permute.xlu0 %3138  ;;  %v5104_v62 = vsel %vm1259_vm11, %v5076_v23, %v5080_v27  ;;  %v9285_v23 = vld [vmem:[#allocation36_spill] sm:$0xff] }
 0x443   : > { %v9286_v40 = vcombine.low %v9284_v2, %v9285_v23 }
 0x445   : > { %v8311_v31 = vpop.permute.xlu1 %3142  ;;  %v4132_v36 = vsel %vm1232_vm1, %v9286_v40, %v9283_v57 }
 0x446   : > { %v8313_v20 = vpop.permute.xlu0 %3597  ;;  %v4133_v35 = vsel %vm1234_vm2, %v4132_v36, %v9288_v25 }
 0x447   : > { %v4134_v59 = vsel %vm1236_vm3, %v4133_v35, %v9290_v30  ;;  %v3661_v41 = vsel %vm1234_vm2, %v8304_v18, %v8313_v20 }
 0x449   : > { %v8315_v52 = vpop.permute.xlu1 %3629 }
 0x44a   : > { %v4078_v8 = vpop.permute.xlu0 %4077 }
 0x44b   : > { %v4135_v19 = vsel %vm1238_vm4, %v4134_v59, %v4078_v8  ;;  %v9302_v59 = vld [vmem:[#allocation104_spill] sm:$0xff] }
 0x44d   : > { %v4110_v24 = vpop.permute.xlu1 %4109 }
 0x44e   : > { %v4565_v44 = vpop.permute.xlu0 %4564  ;;  %v4143_v13 = vsel %vm1253_vm9, %v4142_v33, %v4110_v24  ;;  %v9303_v33 = vld [vmem:[#allocation11_spill] sm:$0xff] }
 0x44f   : > { %v4616_v7 = vsel %vm1242_vm15, %v4615_v10, %v4565_v44 }
 0x450   : > { %v4617_v11 = vsel %vm1244_vm14, %v4616_v7, %v8191_v16 }
 0x451   : > { %v4597_v37 = vpop.permute.xlu1 %4596 }
 0x452   : > { %v5084_v53 = vpop.permute.xlu0 %5083  ;;  %v4624_v15 = vsel %vm8774_vm12, %v4623_v51, %v4597_v37  ;;  %vm9280_vm12 = vcmask 408576  }
 0x453   : > { %5133 = vmatprep.subr.mxu1 %v4624_v15  ;;  %v5105_v48 = vsel %vm1261_vm13, %v5104_v62, %v5084_v53 }
 0x454   : > { %5134 = vmatpush1.msra.mxu1 %v4617_v11 }
 0x455   : > { %v8342_v63 = vpop.permute.xlu1 %3114 }
 0x456   : > { %v8344_v60 = vpop.permute.xlu0 %3146 }
 0x459   : > { %v3602_v56 = vpop.permute.xlu1 %3601 }
 0x45a   : > { %v3634_v17 = vpop.permute.xlu0 %3633 }
 0x45d   : > { %v4082_v14 = vpop.permute.xlu1 %4081 }
 0x45e   : > { %v4114_v46 = vpop.permute.xlu0 %4113  ;;  %v4136_v21 = vsel %vm1240_vm5, %v4135_v19, %v4082_v14  ;;  %v9304_v19 = vld [vmem:[#allocation94_spill] sm:$0xff] }
 0x45f   : > { %v4144_v12 = vsel %vm1255_vm10, %v4143_v13, %v4114_v46  ;;  %v2709_v13 = vsel %vm240_vm0, %v9304_v19, %v9303_v33 }
 0x461   : > { %v4601_v61 = vpop.permute.xlu1 %4600 }
 0x462   : > { %v5088_v32 = vpop.permute.xlu0 %5087  ;;  %v4625_v14 = vsel %vm1259_vm11, %v4597_v37, %v4601_v61  ;;  %v3669_v37 = vsel %vm1249_vm7, %v8307_v26, %v8315_v52  ;;  %v9297_v52 = vld [vmem:[#allocation109_spill] sm:$0xff] }
 0x463   : > { %v5106_v9 = vsel %vm9280_vm12, %v5105_v48, %v5088_v32  ;;  %vm9292_vm12 = vcmask 1014784   ;;  %v3670_v2 = vsel %vm1251_vm8, %v3669_v37, %v3634_v17  ;;  %v9299_v17 = vld [vmem:[#allocation34_spill] sm:$0xff] }
 0x464   : > { %5348 = vmatpush3.msra.mxu0 %v5106_v9 }
 0x465   : > { %v8349_v6 = vpop.permute.xlu1 %3118  ;;  %5349 = vmatprep.subr.mxu0 %v9275_v22 }
 0x466   : > { %v8352_v16 = vpop.permute.xlu0 %3150 }
 0x469   : > { %v3606_v43 = vpop.permute.xlu1 %3605 }
 0x46a   : > { %v3638_v27 = vpop.permute.xlu0 %3637 }
 0x46b   : > { %v3671_v40 = vsel %vm1253_vm9, %v3670_v2, %v3638_v27  ;;  %v9317_v2 = vld [vmem:[#allocation76_spill] sm:$0xff] }
 0x46d   : > { %v4086_v44 = vpop.permute.xlu1 %4085 }
 0x46e   : > { %v4137_v10 = vsel %vm1242_vm15, %v4136_v21, %v4086_v44  ;;  %v4118_v55 = vpop.permute.xlu0 %4117 }
 0x46f   : > { %v4145_v7 = vsel %vm9292_vm12, %v4144_v12, %v4118_v55  ;;  %v4138_v51 = vsel %vm1244_vm14, %v4137_v10, %v9282_v38  ;;  %v3662_v38 = vsel %vm1236_vm3, %v3661_v41, %v3602_v56  ;;  %v9294_v56 = vld [vmem:[#allocation6_spill] sm:$0xff]  ;;  %v9305_v12 = vld [vmem:[#allocation83_spill] sm:$0xff] }
 0x470   : > { %5135 = vmatprep.subr.mxu1 %v4145_v7  ;;  %v3663_v61 = vsel %vm1238_vm4, %v3662_v38, %v3606_v43  ;;  %v970_v5 = vcombine.low %v9295_v42, %v9294_v56  ;;  %v9298_v43 = vld [vmem:[#allocation35_spill] sm:$0xff]  ;;  %v9306_v7 = vld [vmem:[#allocation89_spill] sm:$0xff]  ;;  %v9314_v38 = vld [vmem:[#allocation2_spill] sm:$0xff]  ;;  %v3188_v56 = vsel %vm240_vm0, %v8309_v3, %v8311_v31  ;;  %v9320_v42 = vcombine.low %v9224_v39, %v9223_v29 }
 0x471   : > { %5136 = vmatpush1.msra.mxu1 %v4138_v51  ;;  %v4605_v53 = vpop.permute.xlu1 %4604  ;;  %v9300_v35 = vcombine.low %v9298_v43, %v9299_v17  ;;  %v9307_v51 = vld [vmem:[#allocation85_spill] sm:$0xff]  ;;  %v9321_v43 = vld [vmem:[#allocation27_spill] sm:$0xff]  ;;  %v9322_v17 = vld [vmem:[#allocation66_spill] sm:$0xff] }
 0x472   : > { %v3123_v15 = vpop.permute.xlu0 %3122  ;;  %v4626_v46 = vsel %vm1261_vm13, %v4625_v14, %v4605_v53  ;;  %v1233_v30 = vsel %vm1232_vm1, %v970_v5, %v9301_v50  ;;  %v9308_v53 = vld [vmem:[#allocation98_spill] sm:$0xff]  ;;  %v3181_v5 = vsel %vm1232_vm1, %v9320_v42, %v8342_v63  ;;  %v9341_v42 = vld [vmem:[#allocation67_spill] sm:$0xff] }
 0x473   : > { %v2702_v0 = vsel %vm1232_vm1, %v9300_v35, %v9297_v52  ;;  %v1235_v10 = vsel %vm1234_vm2, %v1233_v30, %v9305_v12  ;;  %v9323_v35 = vld [vmem:[#allocation65_spill] sm:$0xff]  ;;  %v3182_v31 = vsel %vm1234_vm2, %v3181_v5, %v8349_v6  ;;  %v9326_v39 = vld [vmem:[#allocation142_spill] sm:$0xff]  ;;  %v9330_v12 = vld [vmem:[#allocation31_spill] sm:$0xff] }
 0x474   : > { %v2703_v45 = vsel %vm1234_vm2, %v2702_v0, %v9302_v59  ;;  %v9324_v0 = vcombine.low %v9322_v17, %v9323_v35 }
 0x475   : > { %v3155_v8 = vpop.permute.xlu1 %3154 }
 0x476   : > { %v3610_v11 = vpop.permute.xlu0 %3609 }
 0x477   : > { %v3664_v23 = vsel %vm1240_vm5, %v3663_v61, %v3610_v11  ;;  %v2704_v11 = vsel %vm1236_vm3, %v2703_v45, %v9308_v53  ;;  %v9315_v61 = vld [vmem:[#allocation23_spill] sm:$0xff]  ;;  %v9328_v45 = vld [vmem:[#allocation14_spill] sm:$0xff] }
 0x479   : > { %v3642_v24 = vpop.permute.xlu1 %3641 }
 0x47a   : > { %v4122_v62 = vpop.permute.xlu0 %4121  ;;  %v3672_v20 = vsel %vm1255_vm10, %v3671_v40, %v3642_v24  ;;  %v9309_v24 = vld [vmem:[#allocation141_spill] sm:$0xff] }
 0x47d   : > { %v4609_v48 = vpop.permute.xlu1 %4608 }
 0x47e   : > { %v4627_v32 = vsel %vm9293_vm6, %v4626_v46, %v4609_v48  ;;  %v3127_v9 = vpop.permute.xlu0 %3126  ;;  %vm9296_vm6 = vmmov %vm9292_vm12  ;;  %vm9310_vm12 = vcmask 277504   ;;  %v9311_v46 = vld [vmem:[#allocation84_spill] sm:$0xff] }
 0x47f   : > { %5350 = vmatpush3.msra.mxu0 %v4627_v32  ;;  %v2710_v14 = vsel %vm9310_vm12, %v2709_v13, %v9309_v24  ;;  %v9313_v32 = vld [vmem:[#allocation110_spill] sm:$0xff] }
 0x480   : > { %5351 = vmatprep.subr.mxu0 %v9275_v22  ;;  %v2705_v41 = vsel %vm1238_vm4, %v2704_v11, %v9313_v32  ;;  %v2711_v37 = vsel %vm1249_vm7, %v2710_v14, %v9314_v38  ;;  %v9331_v11 = vld [vmem:[#allocation106_spill] sm:$0xff] }
 0x481   : > { %v3159_v4 = vpop.permute.xlu1 %3158  ;;  %v2712_v63 = vsel %vm1251_vm8, %v2711_v37, %v9326_v39  ;;  %v2706_v24 = vsel %vm1240_vm5, %v2705_v41, %v9331_v11  ;;  %v9333_v38 = vld [vmem:[#allocation138_spill] sm:$0xff]  ;;  %v9336_v41 = vld [vmem:[#allocation79_spill] sm:$0xff] }
 0x482   : > { %v3614_v57 = vpop.permute.xlu0 %3613  ;;  %v2713_v33 = vsel %vm1253_vm9, %v2712_v63, %v9328_v45  ;;  %v9348_v63 = vld [vmem:[#allocation103_spill] sm:$0xff] }
 0x483   : > { %v3665_v18 = vsel %vm1242_vm15, %v3664_v23, %v3614_v57  ;;  %v9316_v57 = vld [vmem:[#allocation78_spill] sm:$0xff] }
 0x484   : > { %v3666_v27 = vsel %vm1244_vm14, %v3665_v18, %v8272_v54  ;;  %v1246_v54 = vsel %vm240_vm0, %v9307_v51, %v9306_v7  ;;  %v9318_v23 = vcombine.low %v9316_v57, %v9317_v2  ;;  %v9319_v18 = vld [vmem:[#allocation64_spill] sm:$0xff]  ;;  %vm9327_vm0 = vcmask 408576  }
 0x485   : > { %v8397_v36 = vpop.permute.xlu1 %3645  ;;  %v1237_v57 = vsel %vm1236_vm3, %v1235_v10, %v9336_v41  ;;  %v9337_v2 = vld [vmem:[#allocation112_spill] sm:$0xff] }
 0x486   : > { %v4126_v25 = vpop.permute.xlu0 %4125  ;;  %v3673_v26 = vsel %vm9296_vm6, %v3672_v20, %v8397_v36  ;;  %vm9312_vm6 = vmmov %vm9310_vm12  ;;  %v2230_v40 = vsel %vm1232_vm1, %v9318_v23, %v9315_v61  ;;  %v9338_v23 = vld [vmem:[#allocation139_spill] sm:$0xff] }
 0x487   : > { %5137 = vmatprep.subr.mxu1 %v3673_v26  ;;  %v1248_v48 = vsel %vm9312_vm6, %v1246_v54, %v9311_v46  ;;  %v2231_v20 = vsel %vm1234_vm2, %v2230_v40, %v9319_v18  ;;  %v4146_v26 = vsel %vm1259_vm11, %v4118_v55, %v4122_v62  ;;  %vm9325_vm12 = vmmov %vm9312_vm6  ;;  %v3183_v62 = vsel %vm1236_vm3, %v3182_v31, %v3123_v15  ;;  %v9339_v18 = vld [vmem:[#allocation63_spill] sm:$0xff]  ;;  %v9346_v31 = vld [vmem:[#allocation108_spill] sm:$0xff] }
 0x488   : > { %5138 = vmatpush1.msra.mxu1 %v3666_v27  ;;  %v1751_v27 = vsel %vm1232_vm1, %v9324_v0, %v9321_v43  ;;  %v3189_v50 = vsel %vm9325_vm12, %v3188_v56, %v8344_v60  ;;  %v4147_v30 = vsel %vm1261_vm13, %v4146_v26, %v4126_v25  ;;  %v9329_v60 = vld [vmem:[#allocation57_spill] sm:$0xff]  ;;  %v3184_v25 = vsel %vm1238_vm4, %v3183_v62, %v3127_v9  ;;  %v9342_v26 = vld [vmem:[#allocation3_spill] sm:$0xff]  ;;  %v9344_v43 = vld [vmem:[#allocation22_spill] sm:$0xff] }
 0x489   : > { %v3131_v21 = vpop.permute.xlu1 %3130  ;;  %v3190_v55 = vsel %vm1249_vm7, %v3189_v50, %v8352_v16  ;;  %v2232_v13 = vsel %vm1236_vm3, %v2231_v20, %v9329_v60  ;;  %v1752_v7 = vsel %vm1234_vm2, %v1751_v27, %v9330_v12  ;;  %vm9335_vm1 = vcmask 1014784   ;;  %v9340_v20 = vld [vmem:[#allocation26_spill] sm:$0xff]  ;;  %v9345_v27 = vld [vmem:[#allocation81_spill] sm:$0xff]  ;;  %vm9359_vm2 = vmmov %vm9327_vm0 }
 0x48a   : > { %v3163_v44 = vpop.permute.xlu0 %3162  ;;  %v3191_v6 = vsel %vm1251_vm8, %v3190_v55, %v3155_v8  ;;  %v2233_v16 = vsel %vm1238_vm4, %v2232_v13, %v7944_v47  ;;  %v3185_v54 = vsel %vm1240_vm5, %v3184_v25, %v3131_v21  ;;  %v9332_v8 = vld [vmem:[#allocation25_spill] sm:$0xff]  ;;  %v1250_v47 = vsel %vm1249_vm7, %v1248_v48, %v9333_v38  ;;  %vm9343_vm7 = vmmov %vm9335_vm1  ;;  %v9350_v13 = vld [vmem:[#allocation140_spill] sm:$0xff] }
 0x48b   : > { %v3192_v15 = vsel %vm1253_vm9, %v3191_v6, %v3159_v4  ;;  %v1753_v9 = vsel %vm1236_vm3, %v1752_v7, %v9332_v8  ;;  %v9334_v4 = vld [vmem:[#allocation100_spill] sm:$0xff]  ;;  %v2714_v40 = vsel %vm1255_vm10, %v2713_v33, %v9338_v23  ;;  %v2234_v48 = vsel %vm1240_vm5, %v2233_v16, %v9339_v18  ;;  %v9354_v7 = vld [vmem:[#allocation97_spill] sm:$0xff]  ;;  %v9361_v38 = vld [vmem:[#allocation107_spill] sm:$0xff] }
 0x48c   : > { %v3193_v14 = vsel %vm1255_vm10, %v3192_v15, %v3163_v44  ;;  %v2707_v21 = vsel %vm1242_vm15, %v2706_v24, %v9334_v4  ;;  %v1252_v44 = vsel %vm1251_vm8, %v1250_v47, %v9337_v2  ;;  %v1754_v56 = vsel %vm1238_vm4, %v1753_v9, %v9340_v20  ;;  %v9349_v33 = vld [vmem:[#allocation24_spill] sm:$0xff]  ;;  %vm9351_vm8 = vmmov %vm9327_vm0  ;;  %v5107_v15 = vld [vmem:[%s8573_s3] sm:$0xff] }
 0x48d   : > { %v3650_v52 = vpop.permute.xlu1 %3649  ;;  %v2235_v5 = vsel %vm1242_vm15, %v2234_v48, %v9341_v42  ;;  %v2715_v10 = vsel %vm9343_vm7, %v2714_v40, %v9342_v26  ;;  %v1755_v17 = vsel %vm1240_vm5, %v1754_v56, %v9344_v43  ;;  %v2708_v0 = vsel %vm1244_vm14, %v2707_v21, %v9304_v19  ;;  %v9362_v4 = vld [vmem:[#allocation101_spill] sm:$0xff] }
 0x48e   : > { %v4130_v29 = vpop.permute.xlu0 %4129  ;;  %v1239_v50 = vsel %vm1238_vm4, %v1237_v57, %v9345_v27  ;;  %v3674_v62 = vsel %vm1259_vm11, %v8397_v36, %v3650_v52  ;;  %v2236_v19 = vsel %vm1244_vm14, %v2235_v5, %v7956_v49  ;;  %v1756_v60 = vsel %vm1242_vm15, %v1755_v17, %v9349_v33  ;;  %v9353_v49 = vld [vmem:[#allocation91_spill] sm:$0xff] }
 0x48f   : > { %v4148_v59 = vsel %vm9327_vm0, %v4147_v30, %v4130_v29  ;;  %v1254_v30 = vsel %vm1253_vm9, %v1252_v44, %v9346_v31  ;;  %v9347_v29 = vld [vmem:[#allocation74_spill] sm:$0xff]  ;;  %v2716_v6 = vsel %vm1259_vm11, %v9342_v26, %v9350_v13  ;;  %vm9355_vm9 = vmmov %vm9335_vm1 }
 0x490   : > { %5352 = vmatpush3.msra.mxu0 %v4148_v59  ;;  %v1241_v39 = vsel %vm1240_vm5, %v1239_v50, %v9347_v29  ;;  %v1256_v55 = vsel %vm1255_vm10, %v1254_v30, %v9348_v63  ;;  %vm9357_vm10 = vmmov %vm9327_vm0 }
 0x491   : > { %v3135_v53 = vpop.permute.xlu1 %3134  ;;  %5353 = vmatprep.subr.mxu0 %v9275_v22  ;;  %v1243_v12 = vsel %vm1242_vm15, %v1241_v39, %v9353_v49  ;;  %v1258_v16 = vsel %vm9355_vm9, %v1256_v55, %v9354_v7 }
 0x492   : > { %v3186_v46 = vsel %vm1242_vm15, %v3185_v54, %v3135_v53  ;;  %v3167_v32 = vpop.permute.xlu0 %3166  ;;  %v9356_v53 = vld [vmem:[#allocation113_spill] sm:$0xff] }
 0x493   : > { %v3194_v37 = vsel %vm9335_vm1, %v3193_v14, %v3167_v32  ;;  %v3187_v61 = vsel %vm1244_vm14, %v3186_v46, %v8309_v3  ;;  %v2717_v11 = vsel %vm1261_vm13, %v2716_v6, %v9356_v53  ;;  %v9358_v14 = vld [vmem:[#allocation95_spill] sm:$0xff] }
 0x494   : > { %5139 = vmatprep.subr.mxu1 %v3194_v37  ;;  %v2718_v46 = vsel %vm9359_vm2, %v2717_v11, %v9358_v14 }
 0x495   : > { %5140 = vmatpush1.msra.mxu1 %v3187_v61  ;;  %v3654_v3 = vpop.permute.xlu1 %3653 }
 0x496   : > { %5141 = vmatprep.subr.mxu1 %v2715_v10  ;;  %v3171_v35 = vpop.permute.xlu0 %3170  ;;  %v3675_v59 = vsel %vm1261_vm13, %v3674_v62, %v3654_v3 }
 0x497   : > { %5142 = vmatpush1.msra.mxu1 %v2708_v0  ;;  %v3195_v54 = vsel %vm1259_vm11, %v3167_v32, %v3171_v35 }
 0x498   : > { %5143 = vmatprep.subr.mxu1 %v8125_v1  ;;  %v9352_v1 = vld [vmem:[#allocation51_spill] sm:$0xff] }
 0x499   : > { %5144 = vmatpush1.msra.mxu1 %v2236_v19  ;;  %v3658_v45 = vpop.permute.xlu1 %3657  ;;  %v1757_v52 = vsel %vm1244_vm14, %v1756_v60, %v9352_v1 }
 0x49a   : > { %v3676_v25 = vsel %vm9351_vm8, %v3675_v59, %v3658_v45  ;;  %5145 = vmatprep.subr.mxu1 %v8024_v28  ;;  %v3175_v36 = vpop.permute.xlu0 %3174  ;;  %v1245_v28 = vsel %vm1244_vm14, %v1243_v12, %v9307_v51  ;;  %v9360_v51 = vld [vmem:[#allocation111_spill] sm:$0xff]  ;;  %vm9363_vm14 = vmmov %vm9327_vm0 }
 0x49b   : > { %5146 = vmatpush1.msra.mxu1 %v1757_v52  ;;  %5354 = vmatpush3.msra.mxu0 %v3676_v25  ;;  %v3196_v24 = vsel %vm1261_vm13, %v3195_v54, %v3175_v36  ;;  %v1260_v32 = vsel %vm1259_vm11, %v9354_v7, %v9360_v51  ;;  %vm5266_vm11 = vcmask 556032  }
 0x49c   : > { %5147 = vmatprep.subr.mxu1 %v1258_v16  ;;  %5355 = vmatprep.subr.mxu0 %v9275_v22  ;;  %v1262_v47 = vsel %vm1261_vm13, %v1260_v32, %v9361_v38 }
 0x49d   : > { %5148 = vmatpush1.msra.mxu1 %v1245_v28  ;;  %v3179_v8 = vpop.permute.xlu1 %3178  ;;  %v1264_v21 = vsel %vm9363_vm14, %v1262_v47, %v9362_v4 }
 0x49e   : > { %v3197_v9 = vsel %vm9357_vm10, %v3196_v24, %v3179_v8  ;;  %5332 = vmatmul.mubr.msk.f32.vlgmr.msra.gmra.mxu1 %vm1238_vm4, %v5107_v15 }
 0x49f   : > { %5356 = vmatpush3.msra.mxu0 %v3197_v9 }
 0x4a0   : > { %5357 = vmatprep.subr.mxu0 %v9275_v22 }
 0x4a1   : > { %5358 = vmatpush3.msra.mxu0 %v2718_v46 }
 0x4a2   : > { %5359 = vmatprep.subr.mxu0 %v9275_v22 }
 0x4a3   : > { %5360 = vmatpush3.msra.mxu0 %v8155_v58 }
 0x4a4   : > { %5361 = vmatprep.subr.mxu0 %v9275_v22 }
 0x4a5   : > { %5362 = vmatpush3.msra.mxu0 %v8067_v34 }
 0x4a6   : > { %5363 = vmatprep.subr.mxu0 %v9275_v22 }
 0x4a7   : > { %5364 = vmatpush3.msra.mxu0 %v1264_v21  ;;  %v5112_v37 = vpop.permute.xlu0 %5111 }
 0x4a8   : > { %5366 = vmatmul.mubr.msk.f32.vlgmr.msra.gmra.mxu0 %vm1238_vm4, %v5107_v15 }
 0x55e   : > { %v5183_v61 = vpop.f32.mrf.mxu1 }
 0x55f   : > { %v5184_v41 = vadd.f32 %v5183_v61, %v5112_v37 }
 0x560   : > { %v5185_v58 = vpop.f32.mrf.mxu1 }
 0x561   : > { %v5258_v57 = vmax.f32 %v5184_v41, 0.0  ;;  %v5186_v2 = vadd.f32 %v5185_v58, %v5112_v37 }
 0x563   : > { %5406 = vtanh.f32 %v5258_v57  ;;  %v5259_v44 = vmax.f32 %v5186_v2, 0.0 }
 0x565   : > { %5408 = vtanh.f32 %v5259_v44 }
 0x568   : > { %v5254_v23 = vpop.f32.mrf.mxu0 }
 0x569   : > { %v5255_v34 = vadd.f32 %v5254_v23, %v5112_v37 }
 0x56a   : > { %v5367_v40 = vpop.f32.mrf.mxu0 }
 0x56b   : > { %v5260_v18 = vmax.f32 %v5255_v34, 0.0 }
 0x56d   : > { %5410 = vtanh.f32 %v5260_v18 }
 0x570   : > { %v5407_v22 = vpop.eup %5406 }
 0x571   : > { %5264 = vst [vmem:[%s224_s10] sm:$0xff] %v5407_v22 }
 0x572   : > { %v5409_v48 = vpop.eup %5408 }
 0x573   : > { %5265 = vst [vmem:[%s224_s10 + $0x8] sm:$0xff] %v5409_v48 }
 0x57a   : > { %v5411_v20 = vpop.eup %5410 }
 0x57b   : > { %5267 = vst.msk [vmem:[%s224_s10 + $0x10] sm:$0xff] %vm5266_vm11, %v5411_v20 }
 0x57c PF: > { %s15_s18 = sadd.s32 1, %s5418_s18  }
 0x57d   : > { %p12_p4 = scmp.ge.s32.totalorder %s15_s18, 4  }
 0x57f   :  { %14 = sbr.rel (!%p12_p4) target bundleno = 1 (0x1), region = 70 }

</bundles_post_ra>
